<compile_context>
chip_gen: v7x
topology: tpu7x:2x2x1
jax: 0.10.0
libtpu: 0.0.40
codegen_flags: <defaults>
</compile_context>

<pallas_src>
import functools

import numpy as np
import jax
import jax.numpy as jnp
from jax.experimental import pallas as pl
from jax.experimental.pallas import tpu as pltpu  # noqa: F401  (TPU backend)

LANE = 128          # lane-dense padding of the reconstruction's channel axis
BN_EPS = 1e-5       # nn.BatchNorm2d default (eval-mode folding)
LEAKY_SLOPE = 0.01  # nn.LeakyReLU default


# ---------------------------------------------------------------------------
# Pallas kernel
# ---------------------------------------------------------------------------
def _tap_block(x, sel_ref, w_ref, shift, act):
    """act( sum_t sel[t] @ x @ w[t] + shift ); bf16 MXU inputs, f32 accumulate."""
    xb = x.astype(jnp.bfloat16)
    ntaps, rows, _ = sel_ref.shape
    cout = w_ref.shape[-1]
    acc = jnp.zeros((rows, cout), jnp.float32)
    for t in range(ntaps):                      # static unroll over kernel taps
        g = jnp.dot(sel_ref[t], xb, preferred_element_type=jnp.float32)
        acc = acc + jnp.dot(g.astype(jnp.bfloat16), w_ref[t],
                            preferred_element_type=jnp.float32)
    y = acc + shift
    if act == "leaky":
        y = jnp.where(y >= 0, y, LEAKY_SLOPE * y)
    elif act == "tanh":
        y = jnp.tanh(y)
    return y


def _vae_kernel(*refs, n_enc, n_dec, enc_acts, dec_acts):
    recon_ref, mu_ref, logvar_ref = refs[-3], refs[-2], refs[-1]
    x_ref, eps_ref = refs[0], refs[1]
    pos = 2

    # ---- encoder: conv + folded BN + LeakyReLU ----
    h = x_ref[...]
    for i in range(n_enc):
        sel, w, b = refs[pos], refs[pos + 1], refs[pos + 2]
        pos += 3
        h = _tap_block(h, sel, w, b[...], enc_acts[i])

    # ---- latent heads: z_mu and z_var share the flatten-gather ----
    selg, wmu, bmu, wlv, blv = refs[pos:pos + 5]
    pos += 5
    hb = h.astype(jnp.bfloat16)
    acc_mu = jnp.zeros(mu_ref.shape, jnp.float32)
    acc_lv = jnp.zeros(logvar_ref.shape, jnp.float32)
    for p in range(selg.shape[0]):              # one tap per 2x2 spatial slot
        g = jnp.dot(selg[p], hb, preferred_element_type=jnp.float32)
        gb = g.astype(jnp.bfloat16)
        acc_mu = acc_mu + jnp.dot(gb, wmu[p], preferred_element_type=jnp.float32)
        acc_lv = acc_lv + jnp.dot(gb, wlv[p], preferred_element_type=jnp.float32)
    mu = acc_mu + bmu[...]
    logvar = acc_lv + blv[...]
    mu_ref[...] = mu
    logvar_ref[...] = logvar

    # ---- reparameterize: z = eps * exp(0.5*logvar) + mu ----
    # TODO(synk): the Lie.LieAlgebra.AlgebraCreate('so3', ...) calls in the
    # original reparameterize are dead code (results unused, module undefined);
    # only `eps * std + mu` affects the forward output and is implemented here.
    y = eps_ref[...] * jnp.exp(0.5 * logvar) + mu

    # ---- decoder_input linear, decoder convT blocks, final layer ----
    for i in range(n_dec):
        sel, w, b = refs[pos], refs[pos + 1], refs[pos + 2]
        pos += 3
        y = _tap_block(y, sel, w, b[...], dec_acts[i])

    recon_ref[...] = y


# ---------------------------------------------------------------------------
# Static selection matrices (built once, at trace time, with numpy)
# ---------------------------------------------------------------------------
def _conv_sel(n, ih, iw, oh, ow, k, stride, pad):
    s = np.zeros((k * k, n * oh * ow, n * ih * iw), np.float32)
    for ki in range(k):
        for kj in range(k):
            t = ki * k + kj
            for b in range(n):
                for y in range(oh):
                    for x in range(ow):
                        yi = y * stride - pad + ki
                        xi = x * stride - pad + kj
                        if 0 <= yi < ih and 0 <= xi < iw:
                            s[t, (b * oh + y) * ow + x, (b * ih + yi) * iw + xi] = 1.0
    return s


def _convT_sel(n, ih, iw, oh, ow, k, stride, pad):
    s = np.zeros((k * k, n * oh * ow, n * ih * iw), np.float32)
    for ki in range(k):
        for kj in range(k):
            t = ki * k + kj
            for b in range(n):
                for y in range(oh):
                    for x in range(ow):
                        ny, nx = y + pad - ki, x + pad - kj
                        if ny % stride or nx % stride:
                            continue
                        yi, xi = ny // stride, nx // stride
                        if 0 <= yi < ih and 0 <= xi < iw:
                            s[t, (b * oh + y) * ow + x, (b * ih + yi) * iw + xi] = 1.0
    return s


# ---------------------------------------------------------------------------
# Weight folding / operand preparation
# ---------------------------------------------------------------------------
def _fold_bn(bias, bn):
    gamma, beta, mean, var = bn
    scale = gamma / jnp.sqrt(var + BN_EPS)            # eval-mode BatchNorm2d
    shift = beta + (bias - mean) * scale
    return scale, shift


def _conv_taps(weight, scale):       # (Cout, Cin, k, k) -> (k*k, Cin, Cout)
    cout, cin, k, _ = weight.shape
    w = jnp.transpose(weight, (2, 3, 1, 0)).reshape(k * k, cin, cout)
    return w * scale[None, None, :]


def _convT_taps(weight, scale):      # (Cin, Cout, k, k) -> (k*k, Cin, Cout)
    cin, cout, k, _ = weight.shape
    w = jnp.transpose(weight, (2, 3, 0, 1)).reshape(k * k, cin, cout)
    return w * scale[None, None, :]


def _bf16(a):
    return jnp.asarray(a, jnp.bfloat16)


def _build_operands(params, n, npad, spatial):
    """Per-layer (selection, tap-weights, shift) operands for the fused kernel."""
    hd, ld = params["hidden_dims"], params["latent_dim"]
    f32 = jnp.float32

    enc_ops, enc_acts = [], []
    sp = spatial
    for blk in params["encoder"]:
        osp = (sp + 2 * 1 - 3) // 2 + 1                 # k=3, stride=2, pad=1
        sel = _conv_sel(n, sp, sp, osp, osp, 3, 2, 1)
        scale, shift = _fold_bn(blk["b"], blk["bn"])
        enc_ops += [_bf16(sel), _bf16(_conv_taps(blk["w"], scale)),
                    shift.reshape(1, -1).astype(f32)]
        enc_acts.append("leaky")
        sp = osp
    assert sp == 2, "encoder must end at 2x2 so hidden_dims[-1]*4 matches"

    npos = sp * sp                                      # 4 spatial positions
    # flatten-gather (row (b, p) of encoder output) and its inverse scatter;
    # padded to `npad` latent rows so no matmul sees a dim of 2.
    selg = np.zeros((npos, npad, n * npos), np.float32)
    scat = np.zeros((npos, n * npos, npad), np.float32)
    for p in range(npos):
        for b in range(n):
            selg[p, b, b * npos + p] = 1.0
            scat[p, b * npos + p, b] = 1.0
    # torch.flatten(NCHW) ordering: feature index = c*npos + p
    wmu = jnp.transpose(params["z_mu"]["w"].reshape(ld, hd[-1], npos), (2, 1, 0))
    wlv = jnp.transpose(params["z_var"]["w"].reshape(ld, hd[-1], npos), (2, 1, 0))
    lat_ops = [_bf16(selg),
               _bf16(wmu), params["z_mu"]["b"].reshape(1, ld).astype(f32),
               _bf16(wlv), params["z_var"]["b"].reshape(1, ld).astype(f32)]

    dec_ops, dec_acts = [], []
    # decoder_input Linear scattered back into (n*2*2, C) channels-last rows
    wd = jnp.transpose(params["dec_in"]["w"].reshape(hd[-1], npos, ld), (1, 2, 0))
    bd = jnp.tile(params["dec_in"]["b"].reshape(hd[-1], npos).T, (n, 1))
    dec_ops += [_bf16(scat), _bf16(wd), bd.astype(f32)]
    dec_acts.append("none")

    for blk in params["decoder"]:                       # convT + BN + LeakyReLU
        osp = (sp - 1) * 2 - 2 * 1 + 3 + 1              # stride 2, pad 1, outpad 1
        sel = _convT_sel(n, sp, sp, osp, osp, 3, 2, 1)
        scale, shift = _fold_bn(blk["b"], blk["bn"])
        dec_ops += [_bf16(sel), _bf16(_convT_taps(blk["w"], scale)),
                    shift.reshape(1, -1).astype(f32)]
        dec_acts.append("leaky")
        sp = osp

    fl = params["final"]                                # final convT + BN + LeakyReLU
    osp = (sp - 1) * 2 - 2 * 1 + 3 + 1
    sel = _convT_sel(n, sp, sp, osp, osp, 3, 2, 1)
    scale, shift = _fold_bn(fl["convT_b"], fl["bn"])
    dec_ops += [_bf16(sel), _bf16(_convT_taps(fl["convT_w"], scale)),
                shift.reshape(1, -1).astype(f32)]
    dec_acts.append("leaky")
    sp = osp

    # final conv (no BN) + tanh; channels zero-padded 3 -> LANE so the
    # reconstruction store is lane-dense.
    sel = _conv_sel(n, sp, sp, sp, sp, 3, 1, 1)
    cout = fl["conv_w"].shape[0]
    w = _conv_taps(fl["conv_w"], jnp.ones((cout,), f32))
    w = jnp.pad(w, ((0, 0), (0, 0), (0, LANE - cout)))
    shift = jnp.pad(fl["conv_b"], (0, LANE - cout)).reshape(1, LANE).astype(f32)
    dec_ops += [_bf16(sel), _bf16(w), shift]
    dec_acts.append("tanh")

    return enc_ops, tuple(enc_acts), lat_ops, dec_ops, tuple(dec_acts), sp


# ---------------------------------------------------------------------------
# Forward pass (mirrors MyVAE.forward) — one pallas_call
# ---------------------------------------------------------------------------
def vae_forward(params, x, eps_key):
    n, cin, spatial, _ = x.shape
    ld = params["latent_dim"]
    npad = -(-n // 8) * 8                               # pad latent rows to sublane

    enc_ops, enc_acts, lat_ops, dec_ops, dec_acts, out_sp = _build_operands(
        params, n, npad, spatial)

    # channels-last 2-D activation: rows = (n, h, w) row-major, cols = channels
    x_mat = _bf16(jnp.transpose(x, (0, 2, 3, 1)).reshape(n * spatial * spatial, cin))
    eps = jax.random.normal(eps_key, (n, ld), jnp.float32)
    eps = jnp.pad(eps, ((0, npad - n), (0, 0)))

    kernel = functools.partial(
        _vae_kernel, n_enc=len(enc_acts), n_dec=len(dec_acts),
        enc_acts=enc_acts, dec_acts=dec_acts)

    out_shape = (
        jax.ShapeDtypeStruct((n * out_sp * out_sp, LANE), jnp.float32),  # recon slab
        jax.ShapeDtypeStruct((npad, ld), jnp.float32),                   # mu
        jax.ShapeDtypeStruct((npad, ld), jnp.float32),                   # log_var
    )
    # Single fused launch: grid=() -> every operand is a whole-array VMEM block.
    recon_mat, mu_p, logvar_p = pl.pallas_call(kernel, out_shape=out_shape)(
        x_mat, eps, *enc_ops, *lat_ops, *dec_ops)

    recon = recon_mat[:, :3].reshape(n, out_sp, out_sp, 3).transpose(0, 3, 1, 2)
    return [recon, x, mu_p[:n], logvar_p[:n]]


# ---------------------------------------------------------------------------
# Parameter construction (deterministic, PyTorch default BN stats, eval mode)
# ---------------------------------------------------------------------------
def init_params(key, in_channels, latent_dim, hidden_dims):
    def nrm(key, shape, s=0.1):
        return s * jax.random.normal(key, shape, jnp.float32)

    keys = iter(jax.random.split(key, 64))
    p = {"hidden_dims": list(hidden_dims), "latent_dim": latent_dim}

    def bn_params(c):
        return (jnp.ones((c,), jnp.float32), jnp.zeros((c,), jnp.float32),
                jnp.zeros((c,), jnp.float32), jnp.ones((c,), jnp.float32))

    enc, in_dim = [], in_channels
    for h in hidden_dims:
        enc.append({"w": nrm(next(keys), (h, in_dim, 3, 3)),
                    "b": nrm(next(keys), (h,)), "bn": bn_params(h)})
        in_dim = h
    p["encoder"] = enc

    feat = hidden_dims[-1] * 4
    p["z_mu"] = {"w": nrm(next(keys), (latent_dim, feat)), "b": nrm(next(keys), (latent_dim,))}
    p["z_var"] = {"w": nrm(next(keys), (latent_dim, feat)), "b": nrm(next(keys), (latent_dim,))}
    p["dec_in"] = {"w": nrm(next(keys), (feat, latent_dim)), "b": nrm(next(keys), (feat,))}

    rev = list(reversed(hidden_dims))
    dec = []
    for i in range(len(rev) - 1):
        dec.append({"w": nrm(next(keys), (rev[i], rev[i + 1], 3, 3)),
                    "b": nrm(next(keys), (rev[i + 1],)), "bn": bn_params(rev[i + 1])})
    p["decoder"] = dec

    last = rev[-1]
    p["final"] = {
        "convT_w": nrm(next(keys), (last, last, 3, 3)),
        "convT_b": nrm(next(keys), (last,)),
        "bn": bn_params(last),
        "conv_w": nrm(next(keys), (3, last, 3, 3)),
        "conv_b": nrm(next(keys), (3,)),
    }
    return p


if __name__ == "__main__":
    key = jax.random.PRNGKey(0)
    k_param, k_x, k_eps = jax.random.split(key, 3)

    in_channels, latent_dim, hidden_dims = 3, 8, [16, 32]
    batch, spatial = 2, 8                          # 8 -> 4 -> 2 through the encoder
    params = init_params(k_param, in_channels, latent_dim, hidden_dims)
    x = jax.random.normal(k_x, (batch, in_channels, spatial, spatial), jnp.float32)

    fwd = jax.jit(lambda xx, kk: vae_forward(params, xx, kk))
    recon, x_out, mu, log_var = fwd(x, k_eps)
    jax.block_until_ready((recon, x_out, mu, log_var))

    assert recon.shape == (batch, 3, spatial, spatial), recon.shape
    assert mu.shape == (batch, latent_dim) and log_var.shape == (batch, latent_dim)
    print("KERNEL_OK")
</pallas_src>

<mosaic_0001>
module attributes {stable_mosaic.version = 11 : i64} {
  func.func @_vae_kernel(%arg0: memref<128x3xbf16, #tpu.memory_space<vmem>>, %arg1: memref<8x8xf32, #tpu.memory_space<vmem>>, %arg2: memref<9x32x128xbf16, #tpu.memory_space<vmem>>, %arg3: memref<9x3x16xbf16, #tpu.memory_space<vmem>>, %arg4: memref<1x16xf32, #tpu.memory_space<vmem>>, %arg5: memref<9x8x32xbf16, #tpu.memory_space<vmem>>, %arg6: memref<9x16x32xbf16, #tpu.memory_space<vmem>>, %arg7: memref<1x32xf32, #tpu.memory_space<vmem>>, %arg8: memref<4x8x8xbf16, #tpu.memory_space<vmem>>, %arg9: memref<4x32x8xbf16, #tpu.memory_space<vmem>>, %arg10: memref<1x8xf32, #tpu.memory_space<vmem>>, %arg11: memref<4x32x8xbf16, #tpu.memory_space<vmem>>, %arg12: memref<1x8xf32, #tpu.memory_space<vmem>>, %arg13: memref<4x8x8xbf16, #tpu.memory_space<vmem>>, %arg14: memref<4x8x32xbf16, #tpu.memory_space<vmem>>, %arg15: memref<8x32xf32, #tpu.memory_space<vmem>>, %arg16: memref<9x32x8xbf16, #tpu.memory_space<vmem>>, %arg17: memref<9x32x16xbf16, #tpu.memory_space<vmem>>, %arg18: memref<1x16xf32, #tpu.memory_space<vmem>>, %arg19: memref<9x128x32xbf16, #tpu.memory_space<vmem>>, %arg20: memref<9x16x16xbf16, #tpu.memory_space<vmem>>, %arg21: memref<1x16xf32, #tpu.memory_space<vmem>>, %arg22: memref<9x128x128xbf16, #tpu.memory_space<vmem>>, %arg23: memref<9x16x128xbf16, #tpu.memory_space<vmem>>, %arg24: memref<1x128xf32, #tpu.memory_space<vmem>>, %arg25: memref<128x128xf32, #tpu.memory_space<vmem>>, %arg26: memref<8x8xf32, #tpu.memory_space<vmem>>, %arg27: memref<8x8xf32, #tpu.memory_space<vmem>>) attributes {dimension_semantics = [], scalar_prefetch = 0 : i64, scratch_operands = 0 : i64, tpu.core_type = #tpu.core_type<tc>} {
    %c0 = arith.constant 0 : index
    %c0_0 = arith.constant 0 : index
    %0 = vector.load %arg0[%c0, %c0_0] : memref<128x3xbf16, #tpu.memory_space<vmem>>, vector<128x3xbf16>
    %c0_1 = arith.constant 0 : index
    %c0_2 = arith.constant 0 : index
    %1 = vector.load %arg4[%c0_1, %c0_2] : memref<1x16xf32, #tpu.memory_space<vmem>>, vector<1x16xf32>
    %cst = arith.constant 0.000000e+00 : f32
    %2 = vector.broadcast %cst : f32 to vector<32x16xf32>
    %c0_3 = arith.constant 0 : index
    %c0_4 = arith.constant 0 : index
    %c0_5 = arith.constant 0 : index
    %3 = vector.load %arg2[%c0_3, %c0_4, %c0_5] : memref<9x32x128xbf16, #tpu.memory_space<vmem>>, vector<1x32x128xbf16>
    %4 = vector.shape_cast %3 : vector<1x32x128xbf16> to vector<32x128xbf16>
    %cst_6 = arith.constant dense<0.000000e+00> : vector<32x3xf32>
    %5 = tpu.matmul %4, %0, %cst_6 {dimension_numbers = #tpu.dot_dimension_numbers<[1], [0], [0], [1], [0, 0, 1, 1], [], []>} : vector<32x128xbf16>, vector<128x3xbf16>, vector<32x3xf32> -> vector<32x3xf32>
    %6 = arith.truncf %5 : vector<32x3xf32> to vector<32x3xbf16>
    %c0_7 = arith.constant 0 : index
    %c0_8 = arith.constant 0 : index
    %c0_9 = arith.constant 0 : index
    %7 = vector.load %arg3[%c0_7, %c0_8, %c0_9] : memref<9x3x16xbf16, #tpu.memory_space<vmem>>, vector<1x3x16xbf16>
    %8 = vector.shape_cast %7 : vector<1x3x16xbf16> to vector<3x16xbf16>
    %cst_10 = arith.constant dense<0.000000e+00> : vector<32x16xf32>
    %9 = tpu.matmul %6, %8, %cst_10 {dimension_numbers = #tpu.dot_dimension_numbers<[1], [0], [0], [1], [0, 0, 1, 1], [], []>} : vector<32x3xbf16>, vector<3x16xbf16>, vector<32x16xf32> -> vector<32x16xf32>
    %10 = arith.addf %2, %9 : vector<32x16xf32>
    %c1 = arith.constant 1 : index
    %c0_11 = arith.constant 0 : index
    %c0_12 = arith.constant 0 : index
    %11 = vector.load %arg2[%c1, %c0_11, %c0_12] : memref<9x32x128xbf16, #tpu.memory_space<vmem>>, vector<1x32x128xbf16>
    %12 = vector.shape_cast %11 : vector<1x32x128xbf16> to vector<32x128xbf16>
    %cst_13 = arith.constant dense<0.000000e+00> : vector<32x3xf32>
    %13 = tpu.matmul %12, %0, %cst_13 {dimension_numbers = #tpu.dot_dimension_numbers<[1], [0], [0], [1], [0, 0, 1, 1], [], []>} : vector<32x128xbf16>, vector<128x3xbf16>, vector<32x3xf32> -> vector<32x3xf32>
    %14 = arith.truncf %13 : vector<32x3xf32> to vector<32x3xbf16>
    %c1_14 = arith.constant 1 : index
    %c0_15 = arith.constant 0 : index
    %c0_16 = arith.constant 0 : index
    %15 = vector.load %arg3[%c1_14, %c0_15, %c0_16] : memref<9x3x16xbf16, #tpu.memory_space<vmem>>, vector<1x3x16xbf16>
    %16 = vector.shape_cast %15 : vector<1x3x16xbf16> to vector<3x16xbf16>
    %cst_17 = arith.constant dense<0.000000e+00> : vector<32x16xf32>
    %17 = tpu.matmul %14, %16, %cst_17 {dimension_numbers = #tpu.dot_dimension_numbers<[1], [0], [0], [1], [0, 0, 1, 1], [], []>} : vector<32x3xbf16>, vector<3x16xbf16>, vector<32x16xf32> -> vector<32x16xf32>
    %18 = arith.addf %10, %17 : vector<32x16xf32>
    %c2 = arith.constant 2 : index
    %c0_18 = arith.constant 0 : index
    %c0_19 = arith.constant 0 : index
    %19 = vector.load %arg2[%c2, %c0_18, %c0_19] : memref<9x32x128xbf16, #tpu.memory_space<vmem>>, vector<1x32x128xbf16>
    %20 = vector.shape_cast %19 : vector<1x32x128xbf16> to vector<32x128xbf16>
    %cst_20 = arith.constant dense<0.000000e+00> : vector<32x3xf32>
    %21 = tpu.matmul %20, %0, %cst_20 {dimension_numbers = #tpu.dot_dimension_numbers<[1], [0], [0], [1], [0, 0, 1, 1], [], []>} : vector<32x128xbf16>, vector<128x3xbf16>, vector<32x3xf32> -> vector<32x3xf32>
    %22 = arith.truncf %21 : vector<32x3xf32> to vector<32x3xbf16>
    %c2_21 = arith.constant 2 : index
    %c0_22 = arith.constant 0 : index
    %c0_23 = arith.constant 0 : index
    %23 = vector.load %arg3[%c2_21, %c0_22, %c0_23] : memref<9x3x16xbf16, #tpu.memory_space<vmem>>, vector<1x3x16xbf16>
    %24 = vector.shape_cast %23 : vector<1x3x16xbf16> to vector<3x16xbf16>
    %cst_24 = arith.constant dense<0.000000e+00> : vector<32x16xf32>
    %25 = tpu.matmul %22, %24, %cst_24 {dimension_numbers = #tpu.dot_dimension_numbers<[1], [0], [0], [1], [0, 0, 1, 1], [], []>} : vector<32x3xbf16>, vector<3x16xbf16>, vector<32x16xf32> -> vector<32x16xf32>
    %26 = arith.addf %18, %25 : vector<32x16xf32>
    %c3 = arith.constant 3 : index
    %c0_25 = arith.constant 0 : index
    %c0_26 = arith.constant 0 : index
    %27 = vector.load %arg2[%c3, %c0_25, %c0_26] : memref<9x32x128xbf16, #tpu.memory_space<vmem>>, vector<1x32x128xbf16>
    %28 = vector.shape_cast %27 : vector<1x32x128xbf16> to vector<32x128xbf16>
    %cst_27 = arith.constant dense<0.000000e+00> : vector<32x3xf32>
    %29 = tpu.matmul %28, %0, %cst_27 {dimension_numbers = #tpu.dot_dimension_numbers<[1], [0], [0], [1], [0, 0, 1, 1], [], []>} : vector<32x128xbf16>, vector<128x3xbf16>, vector<32x3xf32> -> vector<32x3xf32>
    %30 = arith.truncf %29 : vector<32x3xf32> to vector<32x3xbf16>
    %c3_28 = arith.constant 3 : index
    %c0_29 = arith.constant 0 : index
    %c0_30 = arith.constant 0 : index
    %31 = vector.load %arg3[%c3_28, %c0_29, %c0_30] : memref<9x3x16xbf16, #tpu.memory_space<vmem>>, vector<1x3x16xbf16>
    %32 = vector.shape_cast %31 : vector<1x3x16xbf16> to vector<3x16xbf16>
    %cst_31 = arith.constant dense<0.000000e+00> : vector<32x16xf32>
    %33 = tpu.matmul %30, %32, %cst_31 {dimension_numbers = #tpu.dot_dimension_numbers<[1], [0], [0], [1], [0, 0, 1, 1], [], []>} : vector<32x3xbf16>, vector<3x16xbf16>, vector<32x16xf32> -> vector<32x16xf32>
    %34 = arith.addf %26, %33 : vector<32x16xf32>
    %c4 = arith.constant 4 : index
    %c0_32 = arith.constant 0 : index
    %c0_33 = arith.constant 0 : index
    %35 = vector.load %arg2[%c4, %c0_32, %c0_33] : memref<9x32x128xbf16, #tpu.memory_space<vmem>>, vector<1x32x128xbf16>
    %36 = vector.shape_cast %35 : vector<1x32x128xbf16> to vector<32x128xbf16>
    %cst_34 = arith.constant dense<0.000000e+00> : vector<32x3xf32>
    %37 = tpu.matmul %36, %0, %cst_34 {dimension_numbers = #tpu.dot_dimension_numbers<[1], [0], [0], [1], [0, 0, 1, 1], [], []>} : vector<32x128xbf16>, vector<128x3xbf16>, vector<32x3xf32> -> vector<32x3xf32>
    %38 = arith.truncf %37 : vector<32x3xf32> to vector<32x3xbf16>
    %c4_35 = arith.constant 4 : index
    %c0_36 = arith.constant 0 : index
    %c0_37 = arith.constant 0 : index
    %39 = vector.load %arg3[%c4_35, %c0_36, %c0_37] : memref<9x3x16xbf16, #tpu.memory_space<vmem>>, vector<1x3x16xbf16>
    %40 = vector.shape_cast %39 : vector<1x3x16xbf16> to vector<3x16xbf16>
    %cst_38 = arith.constant dense<0.000000e+00> : vector<32x16xf32>
    %41 = tpu.matmul %38, %40, %cst_38 {dimension_numbers = #tpu.dot_dimension_numbers<[1], [0], [0], [1], [0, 0, 1, 1], [], []>} : vector<32x3xbf16>, vector<3x16xbf16>, vector<32x16xf32> -> vector<32x16xf32>
    %42 = arith.addf %34, %41 : vector<32x16xf32>
    %c5 = arith.constant 5 : index
    %c0_39 = arith.constant 0 : index
    %c0_40 = arith.constant 0 : index
    %43 = vector.load %arg2[%c5, %c0_39, %c0_40] : memref<9x32x128xbf16, #tpu.memory_space<vmem>>, vector<1x32x128xbf16>
    %44 = vector.shape_cast %43 : vector<1x32x128xbf16> to vector<32x128xbf16>
    %cst_41 = arith.constant dense<0.000000e+00> : vector<32x3xf32>
    %45 = tpu.matmul %44, %0, %cst_41 {dimension_numbers = #tpu.dot_dimension_numbers<[1], [0], [0], [1], [0, 0, 1, 1], [], []>} : vector<32x128xbf16>, vector<128x3xbf16>, vector<32x3xf32> -> vector<32x3xf32>
    %46 = arith.truncf %45 : vector<32x3xf32> to vector<32x3xbf16>
    %c5_42 = arith.constant 5 : index
    %c0_43 = arith.constant 0 : index
    %c0_44 = arith.constant 0 : index
    %47 = vector.load %arg3[%c5_42, %c0_43, %c0_44] : memref<9x3x16xbf16, #tpu.memory_space<vmem>>, vector<1x3x16xbf16>
    %48 = vector.shape_cast %47 : vector<1x3x16xbf16> to vector<3x16xbf16>
    %cst_45 = arith.constant dense<0.000000e+00> : vector<32x16xf32>
    %49 = tpu.matmul %46, %48, %cst_45 {dimension_numbers = #tpu.dot_dimension_numbers<[1], [0], [0], [1], [0, 0, 1, 1], [], []>} : vector<32x3xbf16>, vector<3x16xbf16>, vector<32x16xf32> -> vector<32x16xf32>
    %50 = arith.addf %42, %49 : vector<32x16xf32>
    %c6 = arith.constant 6 : index
    %c0_46 = arith.constant 0 : index
    %c0_47 = arith.constant 0 : index
    %51 = vector.load %arg2[%c6, %c0_46, %c0_47] : memref<9x32x128xbf16, #tpu.memory_space<vmem>>, vector<1x32x128xbf16>
    %52 = vector.shape_cast %51 : vector<1x32x128xbf16> to vector<32x128xbf16>
    %cst_48 = arith.constant dense<0.000000e+00> : vector<32x3xf32>
    %53 = tpu.matmul %52, %0, %cst_48 {dimension_numbers = #tpu.dot_dimension_numbers<[1], [0], [0], [1], [0, 0, 1, 1], [], []>} : vector<32x128xbf16>, vector<128x3xbf16>, vector<32x3xf32> -> vector<32x3xf32>
    %54 = arith.truncf %53 : vector<32x3xf32> to vector<32x3xbf16>
    %c6_49 = arith.constant 6 : index
    %c0_50 = arith.constant 0 : index
    %c0_51 = arith.constant 0 : index
    %55 = vector.load %arg3[%c6_49, %c0_50, %c0_51] : memref<9x3x16xbf16, #tpu.memory_space<vmem>>, vector<1x3x16xbf16>
    %56 = vector.shape_cast %55 : vector<1x3x16xbf16> to vector<3x16xbf16>
    %cst_52 = arith.constant dense<0.000000e+00> : vector<32x16xf32>
    %57 = tpu.matmul %54, %56, %cst_52 {dimension_numbers = #tpu.dot_dimension_numbers<[1], [0], [0], [1], [0, 0, 1, 1], [], []>} : vector<32x3xbf16>, vector<3x16xbf16>, vector<32x16xf32> -> vector<32x16xf32>
    %58 = arith.addf %50, %57 : vector<32x16xf32>
    %c7 = arith.constant 7 : index
    %c0_53 = arith.constant 0 : index
    %c0_54 = arith.constant 0 : index
    %59 = vector.load %arg2[%c7, %c0_53, %c0_54] : memref<9x32x128xbf16, #tpu.memory_space<vmem>>, vector<1x32x128xbf16>
    %60 = vector.shape_cast %59 : vector<1x32x128xbf16> to vector<32x128xbf16>
    %cst_55 = arith.constant dense<0.000000e+00> : vector<32x3xf32>
    %61 = tpu.matmul %60, %0, %cst_55 {dimension_numbers = #tpu.dot_dimension_numbers<[1], [0], [0], [1], [0, 0, 1, 1], [], []>} : vector<32x128xbf16>, vector<128x3xbf16>, vector<32x3xf32> -> vector<32x3xf32>
    %62 = arith.truncf %61 : vector<32x3xf32> to vector<32x3xbf16>
    %c7_56 = arith.constant 7 : index
    %c0_57 = arith.constant 0 : index
    %c0_58 = arith.constant 0 : index
    %63 = vector.load %arg3[%c7_56, %c0_57, %c0_58] : memref<9x3x16xbf16, #tpu.memory_space<vmem>>, vector<1x3x16xbf16>
    %64 = vector.shape_cast %63 : vector<1x3x16xbf16> to vector<3x16xbf16>
    %cst_59 = arith.constant dense<0.000000e+00> : vector<32x16xf32>
    %65 = tpu.matmul %62, %64, %cst_59 {dimension_numbers = #tpu.dot_dimension_numbers<[1], [0], [0], [1], [0, 0, 1, 1], [], []>} : vector<32x3xbf16>, vector<3x16xbf16>, vector<32x16xf32> -> vector<32x16xf32>
    %66 = arith.addf %58, %65 : vector<32x16xf32>
    %c8 = arith.constant 8 : index
    %c0_60 = arith.constant 0 : index
    %c0_61 = arith.constant 0 : index
    %67 = vector.load %arg2[%c8, %c0_60, %c0_61] : memref<9x32x128xbf16, #tpu.memory_space<vmem>>, vector<1x32x128xbf16>
    %68 = vector.shape_cast %67 : vector<1x32x128xbf16> to vector<32x128xbf16>
    %cst_62 = arith.constant dense<0.000000e+00> : vector<32x3xf32>
    %69 = tpu.matmul %68, %0, %cst_62 {dimension_numbers = #tpu.dot_dimension_numbers<[1], [0], [0], [1], [0, 0, 1, 1], [], []>} : vector<32x128xbf16>, vector<128x3xbf16>, vector<32x3xf32> -> vector<32x3xf32>
    %70 = arith.truncf %69 : vector<32x3xf32> to vector<32x3xbf16>
    %c8_63 = arith.constant 8 : index
    %c0_64 = arith.constant 0 : index
    %c0_65 = arith.constant 0 : index
    %71 = vector.load %arg3[%c8_63, %c0_64, %c0_65] : memref<9x3x16xbf16, #tpu.memory_space<vmem>>, vector<1x3x16xbf16>
    %72 = vector.shape_cast %71 : vector<1x3x16xbf16> to vector<3x16xbf16>
    %cst_66 = arith.constant dense<0.000000e+00> : vector<32x16xf32>
    %73 = tpu.matmul %70, %72, %cst_66 {dimension_numbers = #tpu.dot_dimension_numbers<[1], [0], [0], [1], [0, 0, 1, 1], [], []>} : vector<32x3xbf16>, vector<3x16xbf16>, vector<32x16xf32> -> vector<32x16xf32>
    %74 = arith.addf %66, %73 : vector<32x16xf32>
    %75 = vector.broadcast %1 : vector<1x16xf32> to vector<32x16xf32>
    %76 = arith.addf %74, %75 : vector<32x16xf32>
    %cst_67 = arith.constant 0.000000e+00 : f32
    %77 = vector.broadcast %cst_67 : f32 to vector<32x16xf32>
    %78 = arith.cmpf oge, %76, %77 : vector<32x16xf32>
    %cst_68 = arith.constant 0.00999999977 : f32
    %79 = vector.broadcast %cst_68 : f32 to vector<32x16xf32>
    %80 = arith.mulf %79, %76 : vector<32x16xf32>
    %81 = arith.select %78, %76, %80 : vector<32x16xi1>, vector<32x16xf32>
    %c0_69 = arith.constant 0 : index
    %c0_70 = arith.constant 0 : index
    %82 = vector.load %arg7[%c0_69, %c0_70] : memref<1x32xf32, #tpu.memory_space<vmem>>, vector<1x32xf32>
    %83 = arith.truncf %81 : vector<32x16xf32> to vector<32x16xbf16>
    %cst_71 = arith.constant 0.000000e+00 : f32
    %84 = vector.broadcast %cst_71 : f32 to vector<8x32xf32>
    %c0_72 = arith.constant 0 : index
    %c0_73 = arith.constant 0 : index
    %c0_74 = arith.constant 0 : index
    %85 = vector.load %arg5[%c0_72, %c0_73, %c0_74] : memref<9x8x32xbf16, #tpu.memory_space<vmem>>, vector<1x8x32xbf16>
    %86 = vector.shape_cast %85 : vector<1x8x32xbf16> to vector<8x32xbf16>
    %cst_75 = arith.constant dense<0.000000e+00> : vector<8x16xf32>
    %87 = tpu.matmul %86, %83, %cst_75 {dimension_numbers = #tpu.dot_dimension_numbers<[1], [0], [0], [1], [0, 0, 1, 1], [], []>} : vector<8x32xbf16>, vector<32x16xbf16>, vector<8x16xf32> -> vector<8x16xf32>
    %88 = arith.truncf %87 : vector<8x16xf32> to vector<8x16xbf16>
    %c0_76 = arith.constant 0 : index
    %c0_77 = arith.constant 0 : index
    %c0_78 = arith.constant 0 : index
    %89 = vector.load %arg6[%c0_76, %c0_77, %c0_78] : memref<9x16x32xbf16, #tpu.memory_space<vmem>>, vector<1x16x32xbf16>
    %90 = vector.shape_cast %89 : vector<1x16x32xbf16> to vector<16x32xbf16>
    %cst_79 = arith.constant dense<0.000000e+00> : vector<8x32xf32>
    %91 = tpu.matmul %88, %90, %cst_79 {dimension_numbers = #tpu.dot_dimension_numbers<[1], [0], [0], [1], [0, 0, 1, 1], [], []>} : vector<8x16xbf16>, vector<16x32xbf16>, vector<8x32xf32> -> vector<8x32xf32>
    %92 = arith.addf %84, %91 : vector<8x32xf32>
    %c1_80 = arith.constant 1 : index
    %c0_81 = arith.constant 0 : index
    %c0_82 = arith.constant 0 : index
    %93 = vector.load %arg5[%c1_80, %c0_81, %c0_82] : memref<9x8x32xbf16, #tpu.memory_space<vmem>>, vector<1x8x32xbf16>
    %94 = vector.shape_cast %93 : vector<1x8x32xbf16> to vector<8x32xbf16>
    %cst_83 = arith.constant dense<0.000000e+00> : vector<8x16xf32>
    %95 = tpu.matmul %94, %83, %cst_83 {dimension_numbers = #tpu.dot_dimension_numbers<[1], [0], [0], [1], [0, 0, 1, 1], [], []>} : vector<8x32xbf16>, vector<32x16xbf16>, vector<8x16xf32> -> vector<8x16xf32>
    %96 = arith.truncf %95 : vector<8x16xf32> to vector<8x16xbf16>
    %c1_84 = arith.constant 1 : index
    %c0_85 = arith.constant 0 : index
    %c0_86 = arith.constant 0 : index
    %97 = vector.load %arg6[%c1_84, %c0_85, %c0_86] : memref<9x16x32xbf16, #tpu.memory_space<vmem>>, vector<1x16x32xbf16>
    %98 = vector.shape_cast %97 : vector<1x16x32xbf16> to vector<16x32xbf16>
    %cst_87 = arith.constant dense<0.000000e+00> : vector<8x32xf32>
    %99 = tpu.matmul %96, %98, %cst_87 {dimension_numbers = #tpu.dot_dimension_numbers<[1], [0], [0], [1], [0, 0, 1, 1], [], []>} : vector<8x16xbf16>, vector<16x32xbf16>, vector<8x32xf32> -> vector<8x32xf32>
    %100 = arith.addf %92, %99 : vector<8x32xf32>
    %c2_88 = arith.constant 2 : index
    %c0_89 = arith.constant 0 : index
    %c0_90 = arith.constant 0 : index
    %101 = vector.load %arg5[%c2_88, %c0_89, %c0_90] : memref<9x8x32xbf16, #tpu.memory_space<vmem>>, vector<1x8x32xbf16>
    %102 = vector.shape_cast %101 : vector<1x8x32xbf16> to vector<8x32xbf16>
    %cst_91 = arith.constant dense<0.000000e+00> : vector<8x16xf32>
    %103 = tpu.matmul %102, %83, %cst_91 {dimension_numbers = #tpu.dot_dimension_numbers<[1], [0], [0], [1], [0, 0, 1, 1], [], []>} : vector<8x32xbf16>, vector<32x16xbf16>, vector<8x16xf32> -> vector<8x16xf32>
    %104 = arith.truncf %103 : vector<8x16xf32> to vector<8x16xbf16>
    %c2_92 = arith.constant 2 : index
    %c0_93 = arith.constant 0 : index
    %c0_94 = arith.constant 0 : index
    %105 = vector.load %arg6[%c2_92, %c0_93, %c0_94] : memref<9x16x32xbf16, #tpu.memory_space<vmem>>, vector<1x16x32xbf16>
    %106 = vector.shape_cast %105 : vector<1x16x32xbf16> to vector<16x32xbf16>
    %cst_95 = arith.constant dense<0.000000e+00> : vector<8x32xf32>
    %107 = tpu.matmul %104, %106, %cst_95 {dimension_numbers = #tpu.dot_dimension_numbers<[1], [0], [0], [1], [0, 0, 1, 1], [], []>} : vector<8x16xbf16>, vector<16x32xbf16>, vector<8x32xf32> -> vector<8x32xf32>
    %108 = arith.addf %100, %107 : vector<8x32xf32>
    %c3_96 = arith.constant 3 : index
    %c0_97 = arith.constant 0 : index
    %c0_98 = arith.constant 0 : index
    %109 = vector.load %arg5[%c3_96, %c0_97, %c0_98] : memref<9x8x32xbf16, #tpu.memory_space<vmem>>, vector<1x8x32xbf16>
    %110 = vector.shape_cast %109 : vector<1x8x32xbf16> to vector<8x32xbf16>
    %cst_99 = arith.constant dense<0.000000e+00> : vector<8x16xf32>
    %111 = tpu.matmul %110, %83, %cst_99 {dimension_numbers = #tpu.dot_dimension_numbers<[1], [0], [0], [1], [0, 0, 1, 1], [], []>} : vector<8x32xbf16>, vector<32x16xbf16>, vector<8x16xf32> -> vector<8x16xf32>
    %112 = arith.truncf %111 : vector<8x16xf32> to vector<8x16xbf16>
    %c3_100 = arith.constant 3 : index
    %c0_101 = arith.constant 0 : index
    %c0_102 = arith.constant 0 : index
    %113 = vector.load %arg6[%c3_100, %c0_101, %c0_102] : memref<9x16x32xbf16, #tpu.memory_space<vmem>>, vector<1x16x32xbf16>
    %114 = vector.shape_cast %113 : vector<1x16x32xbf16> to vector<16x32xbf16>
    %cst_103 = arith.constant dense<0.000000e+00> : vector<8x32xf32>
    %115 = tpu.matmul %112, %114, %cst_103 {dimension_numbers = #tpu.dot_dimension_numbers<[1], [0], [0], [1], [0, 0, 1, 1], [], []>} : vector<8x16xbf16>, vector<16x32xbf16>, vector<8x32xf32> -> vector<8x32xf32>
    %116 = arith.addf %108, %115 : vector<8x32xf32>
    %c4_104 = arith.constant 4 : index
    %c0_105 = arith.constant 0 : index
    %c0_106 = arith.constant 0 : index
    %117 = vector.load %arg5[%c4_104, %c0_105, %c0_106] : memref<9x8x32xbf16, #tpu.memory_space<vmem>>, vector<1x8x32xbf16>
    %118 = vector.shape_cast %117 : vector<1x8x32xbf16> to vector<8x32xbf16>
    %cst_107 = arith.constant dense<0.000000e+00> : vector<8x16xf32>
    %119 = tpu.matmul %118, %83, %cst_107 {dimension_numbers = #tpu.dot_dimension_numbers<[1], [0], [0], [1], [0, 0, 1, 1], [], []>} : vector<8x32xbf16>, vector<32x16xbf16>, vector<8x16xf32> -> vector<8x16xf32>
    %120 = arith.truncf %119 : vector<8x16xf32> to vector<8x16xbf16>
    %c4_108 = arith.constant 4 : index
    %c0_109 = arith.constant 0 : index
    %c0_110 = arith.constant 0 : index
    %121 = vector.load %arg6[%c4_108, %c0_109, %c0_110] : memref<9x16x32xbf16, #tpu.memory_space<vmem>>, vector<1x16x32xbf16>
    %122 = vector.shape_cast %121 : vector<1x16x32xbf16> to vector<16x32xbf16>
    %cst_111 = arith.constant dense<0.000000e+00> : vector<8x32xf32>
    %123 = tpu.matmul %120, %122, %cst_111 {dimension_numbers = #tpu.dot_dimension_numbers<[1], [0], [0], [1], [0, 0, 1, 1], [], []>} : vector<8x16xbf16>, vector<16x32xbf16>, vector<8x32xf32> -> vector<8x32xf32>
    %124 = arith.addf %116, %123 : vector<8x32xf32>
    %c5_112 = arith.constant 5 : index
    %c0_113 = arith.constant 0 : index
    %c0_114 = arith.constant 0 : index
    %125 = vector.load %arg5[%c5_112, %c0_113, %c0_114] : memref<9x8x32xbf16, #tpu.memory_space<vmem>>, vector<1x8x32xbf16>
    %126 = vector.shape_cast %125 : vector<1x8x32xbf16> to vector<8x32xbf16>
    %cst_115 = arith.constant dense<0.000000e+00> : vector<8x16xf32>
    %127 = tpu.matmul %126, %83, %cst_115 {dimension_numbers = #tpu.dot_dimension_numbers<[1], [0], [0], [1], [0, 0, 1, 1], [], []>} : vector<8x32xbf16>, vector<32x16xbf16>, vector<8x16xf32> -> vector<8x16xf32>
    %128 = arith.truncf %127 : vector<8x16xf32> to vector<8x16xbf16>
    %c5_116 = arith.constant 5 : index
    %c0_117 = arith.constant 0 : index
    %c0_118 = arith.constant 0 : index
    %129 = vector.load %arg6[%c5_116, %c0_117, %c0_118] : memref<9x16x32xbf16, #tpu.memory_space<vmem>>, vector<1x16x32xbf16>
    %130 = vector.shape_cast %129 : vector<1x16x32xbf16> to vector<16x32xbf16>
    %cst_119 = arith.constant dense<0.000000e+00> : vector<8x32xf32>
    %131 = tpu.matmul %128, %130, %cst_119 {dimension_numbers = #tpu.dot_dimension_numbers<[1], [0], [0], [1], [0, 0, 1, 1], [], []>} : vector<8x16xbf16>, vector<16x32xbf16>, vector<8x32xf32> -> vector<8x32xf32>
    %132 = arith.addf %124, %131 : vector<8x32xf32>
    %c6_120 = arith.constant 6 : index
    %c0_121 = arith.constant 0 : index
    %c0_122 = arith.constant 0 : index
    %133 = vector.load %arg5[%c6_120, %c0_121, %c0_122] : memref<9x8x32xbf16, #tpu.memory_space<vmem>>, vector<1x8x32xbf16>
    %134 = vector.shape_cast %133 : vector<1x8x32xbf16> to vector<8x32xbf16>
    %cst_123 = arith.constant dense<0.000000e+00> : vector<8x16xf32>
    %135 = tpu.matmul %134, %83, %cst_123 {dimension_numbers = #tpu.dot_dimension_numbers<[1], [0], [0], [1], [0, 0, 1, 1], [], []>} : vector<8x32xbf16>, vector<32x16xbf16>, vector<8x16xf32> -> vector<8x16xf32>
    %136 = arith.truncf %135 : vector<8x16xf32> to vector<8x16xbf16>
    %c6_124 = arith.constant 6 : index
    %c0_125 = arith.constant 0 : index
    %c0_126 = arith.constant 0 : index
    %137 = vector.load %arg6[%c6_124, %c0_125, %c0_126] : memref<9x16x32xbf16, #tpu.memory_space<vmem>>, vector<1x16x32xbf16>
    %138 = vector.shape_cast %137 : vector<1x16x32xbf16> to vector<16x32xbf16>
    %cst_127 = arith.constant dense<0.000000e+00> : vector<8x32xf32>
    %139 = tpu.matmul %136, %138, %cst_127 {dimension_numbers = #tpu.dot_dimension_numbers<[1], [0], [0], [1], [0, 0, 1, 1], [], []>} : vector<8x16xbf16>, vector<16x32xbf16>, vector<8x32xf32> -> vector<8x32xf32>
    %140 = arith.addf %132, %139 : vector<8x32xf32>
    %c7_128 = arith.constant 7 : index
    %c0_129 = arith.constant 0 : index
    %c0_130 = arith.constant 0 : index
    %141 = vector.load %arg5[%c7_128, %c0_129, %c0_130] : memref<9x8x32xbf16, #tpu.memory_space<vmem>>, vector<1x8x32xbf16>
    %142 = vector.shape_cast %141 : vector<1x8x32xbf16> to vector<8x32xbf16>
    %cst_131 = arith.constant dense<0.000000e+00> : vector<8x16xf32>
    %143 = tpu.matmul %142, %83, %cst_131 {dimension_numbers = #tpu.dot_dimension_numbers<[1], [0], [0], [1], [0, 0, 1, 1], [], []>} : vector<8x32xbf16>, vector<32x16xbf16>, vector<8x16xf32> -> vector<8x16xf32>
    %144 = arith.truncf %143 : vector<8x16xf32> to vector<8x16xbf16>
    %c7_132 = arith.constant 7 : index
    %c0_133 = arith.constant 0 : index
    %c0_134 = arith.constant 0 : index
    %145 = vector.load %arg6[%c7_132, %c0_133, %c0_134] : memref<9x16x32xbf16, #tpu.memory_space<vmem>>, vector<1x16x32xbf16>
    %146 = vector.shape_cast %145 : vector<1x16x32xbf16> to vector<16x32xbf16>
    %cst_135 = arith.constant dense<0.000000e+00> : vector<8x32xf32>
    %147 = tpu.matmul %144, %146, %cst_135 {dimension_numbers = #tpu.dot_dimension_numbers<[1], [0], [0], [1], [0, 0, 1, 1], [], []>} : vector<8x16xbf16>, vector<16x32xbf16>, vector<8x32xf32> -> vector<8x32xf32>
    %148 = arith.addf %140, %147 : vector<8x32xf32>
    %c8_136 = arith.constant 8 : index
    %c0_137 = arith.constant 0 : index
    %c0_138 = arith.constant 0 : index
    %149 = vector.load %arg5[%c8_136, %c0_137, %c0_138] : memref<9x8x32xbf16, #tpu.memory_space<vmem>>, vector<1x8x32xbf16>
    %150 = vector.shape_cast %149 : vector<1x8x32xbf16> to vector<8x32xbf16>
    %cst_139 = arith.constant dense<0.000000e+00> : vector<8x16xf32>
    %151 = tpu.matmul %150, %83, %cst_139 {dimension_numbers = #tpu.dot_dimension_numbers<[1], [0], [0], [1], [0, 0, 1, 1], [], []>} : vector<8x32xbf16>, vector<32x16xbf16>, vector<8x16xf32> -> vector<8x16xf32>
    %152 = arith.truncf %151 : vector<8x16xf32> to vector<8x16xbf16>
    %c8_140 = arith.constant 8 : index
    %c0_141 = arith.constant 0 : index
    %c0_142 = arith.constant 0 : index
    %153 = vector.load %arg6[%c8_140, %c0_141, %c0_142] : memref<9x16x32xbf16, #tpu.memory_space<vmem>>, vector<1x16x32xbf16>
    %154 = vector.shape_cast %153 : vector<1x16x32xbf16> to vector<16x32xbf16>
    %cst_143 = arith.constant dense<0.000000e+00> : vector<8x32xf32>
    %155 = tpu.matmul %152, %154, %cst_143 {dimension_numbers = #tpu.dot_dimension_numbers<[1], [0], [0], [1], [0, 0, 1, 1], [], []>} : vector<8x16xbf16>, vector<16x32xbf16>, vector<8x32xf32> -> vector<8x32xf32>
    %156 = arith.addf %148, %155 : vector<8x32xf32>
    %157 = vector.broadcast %82 : vector<1x32xf32> to vector<8x32xf32>
    %158 = arith.addf %156, %157 : vector<8x32xf32>
    %cst_144 = arith.constant 0.000000e+00 : f32
    %159 = vector.broadcast %cst_144 : f32 to vector<8x32xf32>
    %160 = arith.cmpf oge, %158, %159 : vector<8x32xf32>
    %cst_145 = arith.constant 0.00999999977 : f32
    %161 = vector.broadcast %cst_145 : f32 to vector<8x32xf32>
    %162 = arith.mulf %161, %158 : vector<8x32xf32>
    %163 = arith.select %160, %158, %162 : vector<8x32xi1>, vector<8x32xf32>
    %164 = arith.truncf %163 : vector<8x32xf32> to vector<8x32xbf16>
    %cst_146 = arith.constant 0.000000e+00 : f32
    %165 = vector.broadcast %cst_146 : f32 to vector<8x8xf32>
    %cst_147 = arith.constant 0.000000e+00 : f32
    %166 = vector.broadcast %cst_147 : f32 to vector<8x8xf32>
    %c0_148 = arith.constant 0 : index
    %c0_149 = arith.constant 0 : index
    %c0_150 = arith.constant 0 : index
    %167 = vector.load %arg8[%c0_148, %c0_149, %c0_150] : memref<4x8x8xbf16, #tpu.memory_space<vmem>>, vector<1x8x8xbf16>
    %168 = vector.shape_cast %167 : vector<1x8x8xbf16> to vector<8x8xbf16>
    %cst_151 = arith.constant dense<0.000000e+00> : vector<8x32xf32>
    %169 = tpu.matmul %168, %164, %cst_151 {dimension_numbers = #tpu.dot_dimension_numbers<[1], [0], [0], [1], [0, 0, 1, 1], [], []>} : vector<8x8xbf16>, vector<8x32xbf16>, vector<8x32xf32> -> vector<8x32xf32>
    %170 = arith.truncf %169 : vector<8x32xf32> to vector<8x32xbf16>
    %c0_152 = arith.constant 0 : index
    %c0_153 = arith.constant 0 : index
    %c0_154 = arith.constant 0 : index
    %171 = vector.load %arg9[%c0_152, %c0_153, %c0_154] : memref<4x32x8xbf16, #tpu.memory_space<vmem>>, vector<1x32x8xbf16>
    %172 = vector.shape_cast %171 : vector<1x32x8xbf16> to vector<32x8xbf16>
    %cst_155 = arith.constant dense<0.000000e+00> : vector<8x8xf32>
    %173 = tpu.matmul %170, %172, %cst_155 {dimension_numbers = #tpu.dot_dimension_numbers<[1], [0], [0], [1], [0, 0, 1, 1], [], []>} : vector<8x32xbf16>, vector<32x8xbf16>, vector<8x8xf32> -> vector<8x8xf32>
    %174 = arith.addf %165, %173 : vector<8x8xf32>
    %c0_156 = arith.constant 0 : index
    %c0_157 = arith.constant 0 : index
    %c0_158 = arith.constant 0 : index
    %175 = vector.load %arg11[%c0_156, %c0_157, %c0_158] : memref<4x32x8xbf16, #tpu.memory_space<vmem>>, vector<1x32x8xbf16>
    %176 = vector.shape_cast %175 : vector<1x32x8xbf16> to vector<32x8xbf16>
    %cst_159 = arith.constant dense<0.000000e+00> : vector<8x8xf32>
    %177 = tpu.matmul %170, %176, %cst_159 {dimension_numbers = #tpu.dot_dimension_numbers<[1], [0], [0], [1], [0, 0, 1, 1], [], []>} : vector<8x32xbf16>, vector<32x8xbf16>, vector<8x8xf32> -> vector<8x8xf32>
    %178 = arith.addf %166, %177 : vector<8x8xf32>
    %c1_160 = arith.constant 1 : index
    %c0_161 = arith.constant 0 : index
    %c0_162 = arith.constant 0 : index
    %179 = vector.load %arg8[%c1_160, %c0_161, %c0_162] : memref<4x8x8xbf16, #tpu.memory_space<vmem>>, vector<1x8x8xbf16>
    %180 = vector.shape_cast %179 : vector<1x8x8xbf16> to vector<8x8xbf16>
    %cst_163 = arith.constant dense<0.000000e+00> : vector<8x32xf32>
    %181 = tpu.matmul %180, %164, %cst_163 {dimension_numbers = #tpu.dot_dimension_numbers<[1], [0], [0], [1], [0, 0, 1, 1], [], []>} : vector<8x8xbf16>, vector<8x32xbf16>, vector<8x32xf32> -> vector<8x32xf32>
    %182 = arith.truncf %181 : vector<8x32xf32> to vector<8x32xbf16>
    %c1_164 = arith.constant 1 : index
    %c0_165 = arith.constant 0 : index
    %c0_166 = arith.constant 0 : index
    %183 = vector.load %arg9[%c1_164, %c0_165, %c0_166] : memref<4x32x8xbf16, #tpu.memory_space<vmem>>, vector<1x32x8xbf16>
    %184 = vector.shape_cast %183 : vector<1x32x8xbf16> to vector<32x8xbf16>
    %cst_167 = arith.constant dense<0.000000e+00> : vector<8x8xf32>
    %185 = tpu.matmul %182, %184, %cst_167 {dimension_numbers = #tpu.dot_dimension_numbers<[1], [0], [0], [1], [0, 0, 1, 1], [], []>} : vector<8x32xbf16>, vector<32x8xbf16>, vector<8x8xf32> -> vector<8x8xf32>
    %186 = arith.addf %174, %185 : vector<8x8xf32>
    %c1_168 = arith.constant 1 : index
    %c0_169 = arith.constant 0 : index
    %c0_170 = arith.constant 0 : index
    %187 = vector.load %arg11[%c1_168, %c0_169, %c0_170] : memref<4x32x8xbf16, #tpu.memory_space<vmem>>, vector<1x32x8xbf16>
    %188 = vector.shape_cast %187 : vector<1x32x8xbf16> to vector<32x8xbf16>
    %cst_171 = arith.constant dense<0.000000e+00> : vector<8x8xf32>
    %189 = tpu.matmul %182, %188, %cst_171 {dimension_numbers = #tpu.dot_dimension_numbers<[1], [0], [0], [1], [0, 0, 1, 1], [], []>} : vector<8x32xbf16>, vector<32x8xbf16>, vector<8x8xf32> -> vector<8x8xf32>
    %190 = arith.addf %178, %189 : vector<8x8xf32>
    %c2_172 = arith.constant 2 : index
    %c0_173 = arith.constant 0 : index
    %c0_174 = arith.constant 0 : index
    %191 = vector.load %arg8[%c2_172, %c0_173, %c0_174] : memref<4x8x8xbf16, #tpu.memory_space<vmem>>, vector<1x8x8xbf16>
    %192 = vector.shape_cast %191 : vector<1x8x8xbf16> to vector<8x8xbf16>
    %cst_175 = arith.constant dense<0.000000e+00> : vector<8x32xf32>
    %193 = tpu.matmul %192, %164, %cst_175 {dimension_numbers = #tpu.dot_dimension_numbers<[1], [0], [0], [1], [0, 0, 1, 1], [], []>} : vector<8x8xbf16>, vector<8x32xbf16>, vector<8x32xf32> -> vector<8x32xf32>
    %194 = arith.truncf %193 : vector<8x32xf32> to vector<8x32xbf16>
    %c2_176 = arith.constant 2 : index
    %c0_177 = arith.constant 0 : index
    %c0_178 = arith.constant 0 : index
    %195 = vector.load %arg9[%c2_176, %c0_177, %c0_178] : memref<4x32x8xbf16, #tpu.memory_space<vmem>>, vector<1x32x8xbf16>
    %196 = vector.shape_cast %195 : vector<1x32x8xbf16> to vector<32x8xbf16>
    %cst_179 = arith.constant dense<0.000000e+00> : vector<8x8xf32>
    %197 = tpu.matmul %194, %196, %cst_179 {dimension_numbers = #tpu.dot_dimension_numbers<[1], [0], [0], [1], [0, 0, 1, 1], [], []>} : vector<8x32xbf16>, vector<32x8xbf16>, vector<8x8xf32> -> vector<8x8xf32>
    %198 = arith.addf %186, %197 : vector<8x8xf32>
    %c2_180 = arith.constant 2 : index
    %c0_181 = arith.constant 0 : index
    %c0_182 = arith.constant 0 : index
    %199 = vector.load %arg11[%c2_180, %c0_181, %c0_182] : memref<4x32x8xbf16, #tpu.memory_space<vmem>>, vector<1x32x8xbf16>
    %200 = vector.shape_cast %199 : vector<1x32x8xbf16> to vector<32x8xbf16>
    %cst_183 = arith.constant dense<0.000000e+00> : vector<8x8xf32>
    %201 = tpu.matmul %194, %200, %cst_183 {dimension_numbers = #tpu.dot_dimension_numbers<[1], [0], [0], [1], [0, 0, 1, 1], [], []>} : vector<8x32xbf16>, vector<32x8xbf16>, vector<8x8xf32> -> vector<8x8xf32>
    %202 = arith.addf %190, %201 : vector<8x8xf32>
    %c3_184 = arith.constant 3 : index
    %c0_185 = arith.constant 0 : index
    %c0_186 = arith.constant 0 : index
    %203 = vector.load %arg8[%c3_184, %c0_185, %c0_186] : memref<4x8x8xbf16, #tpu.memory_space<vmem>>, vector<1x8x8xbf16>
    %204 = vector.shape_cast %203 : vector<1x8x8xbf16> to vector<8x8xbf16>
    %cst_187 = arith.constant dense<0.000000e+00> : vector<8x32xf32>
    %205 = tpu.matmul %204, %164, %cst_187 {dimension_numbers = #tpu.dot_dimension_numbers<[1], [0], [0], [1], [0, 0, 1, 1], [], []>} : vector<8x8xbf16>, vector<8x32xbf16>, vector<8x32xf32> -> vector<8x32xf32>
    %206 = arith.truncf %205 : vector<8x32xf32> to vector<8x32xbf16>
    %c3_188 = arith.constant 3 : index
    %c0_189 = arith.constant 0 : index
    %c0_190 = arith.constant 0 : index
    %207 = vector.load %arg9[%c3_188, %c0_189, %c0_190] : memref<4x32x8xbf16, #tpu.memory_space<vmem>>, vector<1x32x8xbf16>
    %208 = vector.shape_cast %207 : vector<1x32x8xbf16> to vector<32x8xbf16>
    %cst_191 = arith.constant dense<0.000000e+00> : vector<8x8xf32>
    %209 = tpu.matmul %206, %208, %cst_191 {dimension_numbers = #tpu.dot_dimension_numbers<[1], [0], [0], [1], [0, 0, 1, 1], [], []>} : vector<8x32xbf16>, vector<32x8xbf16>, vector<8x8xf32> -> vector<8x8xf32>
    %210 = arith.addf %198, %209 : vector<8x8xf32>
    %c3_192 = arith.constant 3 : index
    %c0_193 = arith.constant 0 : index
    %c0_194 = arith.constant 0 : index
    %211 = vector.load %arg11[%c3_192, %c0_193, %c0_194] : memref<4x32x8xbf16, #tpu.memory_space<vmem>>, vector<1x32x8xbf16>
    %212 = vector.shape_cast %211 : vector<1x32x8xbf16> to vector<32x8xbf16>
    %cst_195 = arith.constant dense<0.000000e+00> : vector<8x8xf32>
    %213 = tpu.matmul %206, %212, %cst_195 {dimension_numbers = #tpu.dot_dimension_numbers<[1], [0], [0], [1], [0, 0, 1, 1], [], []>} : vector<8x32xbf16>, vector<32x8xbf16>, vector<8x8xf32> -> vector<8x8xf32>
    %214 = arith.addf %202, %213 : vector<8x8xf32>
    %c0_196 = arith.constant 0 : index
    %c0_197 = arith.constant 0 : index
    %215 = vector.load %arg10[%c0_196, %c0_197] : memref<1x8xf32, #tpu.memory_space<vmem>>, vector<1x8xf32>
    %216 = vector.broadcast %215 : vector<1x8xf32> to vector<8x8xf32>
    %217 = arith.addf %210, %216 : vector<8x8xf32>
    %c0_198 = arith.constant 0 : index
    %c0_199 = arith.constant 0 : index
    %218 = vector.load %arg12[%c0_198, %c0_199] : memref<1x8xf32, #tpu.memory_space<vmem>>, vector<1x8xf32>
    %219 = vector.broadcast %218 : vector<1x8xf32> to vector<8x8xf32>
    %220 = arith.addf %214, %219 : vector<8x8xf32>
    %c0_200 = arith.constant 0 : index
    %c0_201 = arith.constant 0 : index
    %221 = vector.load %arg26[%c0_200, %c0_201] : memref<8x8xf32, #tpu.memory_space<vmem>>, vector<8x8xf32>
    tpu.vector_store %arg26[%c0_200, %c0_201], %217 {strides = array<i32>} : memref<8x8xf32, #tpu.memory_space<vmem>>, vector<8x8xf32>,
    %c0_202 = arith.constant 0 : index
    %c0_203 = arith.constant 0 : index
    %222 = vector.load %arg27[%c0_202, %c0_203] : memref<8x8xf32, #tpu.memory_space<vmem>>, vector<8x8xf32>
    tpu.vector_store %arg27[%c0_202, %c0_203], %220 {strides = array<i32>} : memref<8x8xf32, #tpu.memory_space<vmem>>, vector<8x8xf32>,
    %c0_204 = arith.constant 0 : index
    %c0_205 = arith.constant 0 : index
    %223 = vector.load %arg1[%c0_204, %c0_205] : memref<8x8xf32, #tpu.memory_space<vmem>>, vector<8x8xf32>
    %cst_206 = arith.constant 5.000000e-01 : f32
    %224 = vector.broadcast %cst_206 : f32 to vector<8x8xf32>
    %225 = arith.mulf %224, %220 : vector<8x8xf32>
    %226 = math.exp %225 : vector<8x8xf32>
    %227 = arith.mulf %223, %226 : vector<8x8xf32>
    %228 = arith.addf %227, %217 : vector<8x8xf32>
    %c0_207 = arith.constant 0 : index
    %c0_208 = arith.constant 0 : index
    %229 = vector.load %arg15[%c0_207, %c0_208] : memref<8x32xf32, #tpu.memory_space<vmem>>, vector<8x32xf32>
    %230 = arith.truncf %228 : vector<8x8xf32> to vector<8x8xbf16>
    %cst_209 = arith.constant 0.000000e+00 : f32
    %231 = vector.broadcast %cst_209 : f32 to vector<8x32xf32>
    %c0_210 = arith.constant 0 : index
    %c0_211 = arith.constant 0 : index
    %c0_212 = arith.constant 0 : index
    %232 = vector.load %arg13[%c0_210, %c0_211, %c0_212] : memref<4x8x8xbf16, #tpu.memory_space<vmem>>, vector<1x8x8xbf16>
    %233 = vector.shape_cast %232 : vector<1x8x8xbf16> to vector<8x8xbf16>
    %cst_213 = arith.constant dense<0.000000e+00> : vector<8x8xf32>
    %234 = tpu.matmul %233, %230, %cst_213 {dimension_numbers = #tpu.dot_dimension_numbers<[1], [0], [0], [1], [0, 0, 1, 1], [], []>} : vector<8x8xbf16>, vector<8x8xbf16>, vector<8x8xf32> -> vector<8x8xf32>
    %235 = arith.truncf %234 : vector<8x8xf32> to vector<8x8xbf16>
    %c0_214 = arith.constant 0 : index
    %c0_215 = arith.constant 0 : index
    %c0_216 = arith.constant 0 : index
    %236 = vector.load %arg14[%c0_214, %c0_215, %c0_216] : memref<4x8x32xbf16, #tpu.memory_space<vmem>>, vector<1x8x32xbf16>
    %237 = vector.shape_cast %236 : vector<1x8x32xbf16> to vector<8x32xbf16>
    %cst_217 = arith.constant dense<0.000000e+00> : vector<8x32xf32>
    %238 = tpu.matmul %235, %237, %cst_217 {dimension_numbers = #tpu.dot_dimension_numbers<[1], [0], [0], [1], [0, 0, 1, 1], [], []>} : vector<8x8xbf16>, vector<8x32xbf16>, vector<8x32xf32> -> vector<8x32xf32>
    %239 = arith.addf %231, %238 : vector<8x32xf32>
    %c1_218 = arith.constant 1 : index
    %c0_219 = arith.constant 0 : index
    %c0_220 = arith.constant 0 : index
    %240 = vector.load %arg13[%c1_218, %c0_219, %c0_220] : memref<4x8x8xbf16, #tpu.memory_space<vmem>>, vector<1x8x8xbf16>
    %241 = vector.shape_cast %240 : vector<1x8x8xbf16> to vector<8x8xbf16>
    %cst_221 = arith.constant dense<0.000000e+00> : vector<8x8xf32>
    %242 = tpu.matmul %241, %230, %cst_221 {dimension_numbers = #tpu.dot_dimension_numbers<[1], [0], [0], [1], [0, 0, 1, 1], [], []>} : vector<8x8xbf16>, vector<8x8xbf16>, vector<8x8xf32> -> vector<8x8xf32>
    %243 = arith.truncf %242 : vector<8x8xf32> to vector<8x8xbf16>
    %c1_222 = arith.constant 1 : index
    %c0_223 = arith.constant 0 : index
    %c0_224 = arith.constant 0 : index
    %244 = vector.load %arg14[%c1_222, %c0_223, %c0_224] : memref<4x8x32xbf16, #tpu.memory_space<vmem>>, vector<1x8x32xbf16>
    %245 = vector.shape_cast %244 : vector<1x8x32xbf16> to vector<8x32xbf16>
    %cst_225 = arith.constant dense<0.000000e+00> : vector<8x32xf32>
    %246 = tpu.matmul %243, %245, %cst_225 {dimension_numbers = #tpu.dot_dimension_numbers<[1], [0], [0], [1], [0, 0, 1, 1], [], []>} : vector<8x8xbf16>, vector<8x32xbf16>, vector<8x32xf32> -> vector<8x32xf32>
    %247 = arith.addf %239, %246 : vector<8x32xf32>
    %c2_226 = arith.constant 2 : index
    %c0_227 = arith.constant 0 : index
    %c0_228 = arith.constant 0 : index
    %248 = vector.load %arg13[%c2_226, %c0_227, %c0_228] : memref<4x8x8xbf16, #tpu.memory_space<vmem>>, vector<1x8x8xbf16>
    %249 = vector.shape_cast %248 : vector<1x8x8xbf16> to vector<8x8xbf16>
    %cst_229 = arith.constant dense<0.000000e+00> : vector<8x8xf32>
    %250 = tpu.matmul %249, %230, %cst_229 {dimension_numbers = #tpu.dot_dimension_numbers<[1], [0], [0], [1], [0, 0, 1, 1], [], []>} : vector<8x8xbf16>, vector<8x8xbf16>, vector<8x8xf32> -> vector<8x8xf32>
    %251 = arith.truncf %250 : vector<8x8xf32> to vector<8x8xbf16>
    %c2_230 = arith.constant 2 : index
    %c0_231 = arith.constant 0 : index
    %c0_232 = arith.constant 0 : index
    %252 = vector.load %arg14[%c2_230, %c0_231, %c0_232] : memref<4x8x32xbf16, #tpu.memory_space<vmem>>, vector<1x8x32xbf16>
    %253 = vector.shape_cast %252 : vector<1x8x32xbf16> to vector<8x32xbf16>
    %cst_233 = arith.constant dense<0.000000e+00> : vector<8x32xf32>
    %254 = tpu.matmul %251, %253, %cst_233 {dimension_numbers = #tpu.dot_dimension_numbers<[1], [0], [0], [1], [0, 0, 1, 1], [], []>} : vector<8x8xbf16>, vector<8x32xbf16>, vector<8x32xf32> -> vector<8x32xf32>
    %255 = arith.addf %247, %254 : vector<8x32xf32>
    %c3_234 = arith.constant 3 : index
    %c0_235 = arith.constant 0 : index
    %c0_236 = arith.constant 0 : index
    %256 = vector.load %arg13[%c3_234, %c0_235, %c0_236] : memref<4x8x8xbf16, #tpu.memory_space<vmem>>, vector<1x8x8xbf16>
    %257 = vector.shape_cast %256 : vector<1x8x8xbf16> to vector<8x8xbf16>
    %cst_237 = arith.constant dense<0.000000e+00> : vector<8x8xf32>
    %258 = tpu.matmul %257, %230, %cst_237 {dimension_numbers = #tpu.dot_dimension_numbers<[1], [0], [0], [1], [0, 0, 1, 1], [], []>} : vector<8x8xbf16>, vector<8x8xbf16>, vector<8x8xf32> -> vector<8x8xf32>
    %259 = arith.truncf %258 : vector<8x8xf32> to vector<8x8xbf16>
    %c3_238 = arith.constant 3 : index
    %c0_239 = arith.constant 0 : index
    %c0_240 = arith.constant 0 : index
    %260 = vector.load %arg14[%c3_238, %c0_239, %c0_240] : memref<4x8x32xbf16, #tpu.memory_space<vmem>>, vector<1x8x32xbf16>
    %261 = vector.shape_cast %260 : vector<1x8x32xbf16> to vector<8x32xbf16>
    %cst_241 = arith.constant dense<0.000000e+00> : vector<8x32xf32>
    %262 = tpu.matmul %259, %261, %cst_241 {dimension_numbers = #tpu.dot_dimension_numbers<[1], [0], [0], [1], [0, 0, 1, 1], [], []>} : vector<8x8xbf16>, vector<8x32xbf16>, vector<8x32xf32> -> vector<8x32xf32>
    %263 = arith.addf %255, %262 : vector<8x32xf32>
    %264 = arith.addf %263, %229 : vector<8x32xf32>
    %c0_242 = arith.constant 0 : index
    %c0_243 = arith.constant 0 : index
    %265 = vector.load %arg18[%c0_242, %c0_243] : memref<1x16xf32, #tpu.memory_space<vmem>>, vector<1x16xf32>
    %266 = arith.truncf %264 : vector<8x32xf32> to vector<8x32xbf16>
    %cst_244 = arith.constant 0.000000e+00 : f32
    %267 = vector.broadcast %cst_244 : f32 to vector<32x16xf32>
    %c0_245 = arith.constant 0 : index
    %c0_246 = arith.constant 0 : index
    %c0_247 = arith.constant 0 : index
    %268 = vector.load %arg16[%c0_245, %c0_246, %c0_247] : memref<9x32x8xbf16, #tpu.memory_space<vmem>>, vector<1x32x8xbf16>
    %269 = vector.shape_cast %268 : vector<1x32x8xbf16> to vector<32x8xbf16>
    %cst_248 = arith.constant dense<0.000000e+00> : vector<32x32xf32>
    %270 = tpu.matmul %269, %266, %cst_248 {dimension_numbers = #tpu.dot_dimension_numbers<[1], [0], [0], [1], [0, 0, 1, 1], [], []>} : vector<32x8xbf16>, vector<8x32xbf16>, vector<32x32xf32> -> vector<32x32xf32>
    %271 = arith.truncf %270 : vector<32x32xf32> to vector<32x32xbf16>
    %c0_249 = arith.constant 0 : index
    %c0_250 = arith.constant 0 : index
    %c0_251 = arith.constant 0 : index
    %272 = vector.load %arg17[%c0_249, %c0_250, %c0_251] : memref<9x32x16xbf16, #tpu.memory_space<vmem>>, vector<1x32x16xbf16>
    %273 = vector.shape_cast %272 : vector<1x32x16xbf16> to vector<32x16xbf16>
    %cst_252 = arith.constant dense<0.000000e+00> : vector<32x16xf32>
    %274 = tpu.matmul %271, %273, %cst_252 {dimension_numbers = #tpu.dot_dimension_numbers<[1], [0], [0], [1], [0, 0, 1, 1], [], []>} : vector<32x32xbf16>, vector<32x16xbf16>, vector<32x16xf32> -> vector<32x16xf32>
    %275 = arith.addf %267, %274 : vector<32x16xf32>
    %c1_253 = arith.constant 1 : index
    %c0_254 = arith.constant 0 : index
    %c0_255 = arith.constant 0 : index
    %276 = vector.load %arg16[%c1_253, %c0_254, %c0_255] : memref<9x32x8xbf16, #tpu.memory_space<vmem>>, vector<1x32x8xbf16>
    %277 = vector.shape_cast %276 : vector<1x32x8xbf16> to vector<32x8xbf16>
    %cst_256 = arith.constant dense<0.000000e+00> : vector<32x32xf32>
    %278 = tpu.matmul %277, %266, %cst_256 {dimension_numbers = #tpu.dot_dimension_numbers<[1], [0], [0], [1], [0, 0, 1, 1], [], []>} : vector<32x8xbf16>, vector<8x32xbf16>, vector<32x32xf32> -> vector<32x32xf32>
    %279 = arith.truncf %278 : vector<32x32xf32> to vector<32x32xbf16>
    %c1_257 = arith.constant 1 : index
    %c0_258 = arith.constant 0 : index
    %c0_259 = arith.constant 0 : index
    %280 = vector.load %arg17[%c1_257, %c0_258, %c0_259] : memref<9x32x16xbf16, #tpu.memory_space<vmem>>, vector<1x32x16xbf16>
    %281 = vector.shape_cast %280 : vector<1x32x16xbf16> to vector<32x16xbf16>
    %cst_260 = arith.constant dense<0.000000e+00> : vector<32x16xf32>
    %282 = tpu.matmul %279, %281, %cst_260 {dimension_numbers = #tpu.dot_dimension_numbers<[1], [0], [0], [1], [0, 0, 1, 1], [], []>} : vector<32x32xbf16>, vector<32x16xbf16>, vector<32x16xf32> -> vector<32x16xf32>
    %283 = arith.addf %275, %282 : vector<32x16xf32>
    %c2_261 = arith.constant 2 : index
    %c0_262 = arith.constant 0 : index
    %c0_263 = arith.constant 0 : index
    %284 = vector.load %arg16[%c2_261, %c0_262, %c0_263] : memref<9x32x8xbf16, #tpu.memory_space<vmem>>, vector<1x32x8xbf16>
    %285 = vector.shape_cast %284 : vector<1x32x8xbf16> to vector<32x8xbf16>
    %cst_264 = arith.constant dense<0.000000e+00> : vector<32x32xf32>
    %286 = tpu.matmul %285, %266, %cst_264 {dimension_numbers = #tpu.dot_dimension_numbers<[1], [0], [0], [1], [0, 0, 1, 1], [], []>} : vector<32x8xbf16>, vector<8x32xbf16>, vector<32x32xf32> -> vector<32x32xf32>
    %287 = arith.truncf %286 : vector<32x32xf32> to vector<32x32xbf16>
    %c2_265 = arith.constant 2 : index
    %c0_266 = arith.constant 0 : index
    %c0_267 = arith.constant 0 : index
    %288 = vector.load %arg17[%c2_265, %c0_266, %c0_267] : memref<9x32x16xbf16, #tpu.memory_space<vmem>>, vector<1x32x16xbf16>
    %289 = vector.shape_cast %288 : vector<1x32x16xbf16> to vector<32x16xbf16>
    %cst_268 = arith.constant dense<0.000000e+00> : vector<32x16xf32>
    %290 = tpu.matmul %287, %289, %cst_268 {dimension_numbers = #tpu.dot_dimension_numbers<[1], [0], [0], [1], [0, 0, 1, 1], [], []>} : vector<32x32xbf16>, vector<32x16xbf16>, vector<32x16xf32> -> vector<32x16xf32>
    %291 = arith.addf %283, %290 : vector<32x16xf32>
    %c3_269 = arith.constant 3 : index
    %c0_270 = arith.constant 0 : index
    %c0_271 = arith.constant 0 : index
    %292 = vector.load %arg16[%c3_269, %c0_270, %c0_271] : memref<9x32x8xbf16, #tpu.memory_space<vmem>>, vector<1x32x8xbf16>
    %293 = vector.shape_cast %292 : vector<1x32x8xbf16> to vector<32x8xbf16>
    %cst_272 = arith.constant dense<0.000000e+00> : vector<32x32xf32>
    %294 = tpu.matmul %293, %266, %cst_272 {dimension_numbers = #tpu.dot_dimension_numbers<[1], [0], [0], [1], [0, 0, 1, 1], [], []>} : vector<32x8xbf16>, vector<8x32xbf16>, vector<32x32xf32> -> vector<32x32xf32>
    %295 = arith.truncf %294 : vector<32x32xf32> to vector<32x32xbf16>
    %c3_273 = arith.constant 3 : index
    %c0_274 = arith.constant 0 : index
    %c0_275 = arith.constant 0 : index
    %296 = vector.load %arg17[%c3_273, %c0_274, %c0_275] : memref<9x32x16xbf16, #tpu.memory_space<vmem>>, vector<1x32x16xbf16>
    %297 = vector.shape_cast %296 : vector<1x32x16xbf16> to vector<32x16xbf16>
    %cst_276 = arith.constant dense<0.000000e+00> : vector<32x16xf32>
    %298 = tpu.matmul %295, %297, %cst_276 {dimension_numbers = #tpu.dot_dimension_numbers<[1], [0], [0], [1], [0, 0, 1, 1], [], []>} : vector<32x32xbf16>, vector<32x16xbf16>, vector<32x16xf32> -> vector<32x16xf32>
    %299 = arith.addf %291, %298 : vector<32x16xf32>
    %c4_277 = arith.constant 4 : index
    %c0_278 = arith.constant 0 : index
    %c0_279 = arith.constant 0 : index
    %300 = vector.load %arg16[%c4_277, %c0_278, %c0_279] : memref<9x32x8xbf16, #tpu.memory_space<vmem>>, vector<1x32x8xbf16>
    %301 = vector.shape_cast %300 : vector<1x32x8xbf16> to vector<32x8xbf16>
    %cst_280 = arith.constant dense<0.000000e+00> : vector<32x32xf32>
    %302 = tpu.matmul %301, %266, %cst_280 {dimension_numbers = #tpu.dot_dimension_numbers<[1], [0], [0], [1], [0, 0, 1, 1], [], []>} : vector<32x8xbf16>, vector<8x32xbf16>, vector<32x32xf32> -> vector<32x32xf32>
    %303 = arith.truncf %302 : vector<32x32xf32> to vector<32x32xbf16>
    %c4_281 = arith.constant 4 : index
    %c0_282 = arith.constant 0 : index
    %c0_283 = arith.constant 0 : index
    %304 = vector.load %arg17[%c4_281, %c0_282, %c0_283] : memref<9x32x16xbf16, #tpu.memory_space<vmem>>, vector<1x32x16xbf16>
    %305 = vector.shape_cast %304 : vector<1x32x16xbf16> to vector<32x16xbf16>
    %cst_284 = arith.constant dense<0.000000e+00> : vector<32x16xf32>
    %306 = tpu.matmul %303, %305, %cst_284 {dimension_numbers = #tpu.dot_dimension_numbers<[1], [0], [0], [1], [0, 0, 1, 1], [], []>} : vector<32x32xbf16>, vector<32x16xbf16>, vector<32x16xf32> -> vector<32x16xf32>
    %307 = arith.addf %299, %306 : vector<32x16xf32>
    %c5_285 = arith.constant 5 : index
    %c0_286 = arith.constant 0 : index
    %c0_287 = arith.constant 0 : index
    %308 = vector.load %arg16[%c5_285, %c0_286, %c0_287] : memref<9x32x8xbf16, #tpu.memory_space<vmem>>, vector<1x32x8xbf16>
    %309 = vector.shape_cast %308 : vector<1x32x8xbf16> to vector<32x8xbf16>
    %cst_288 = arith.constant dense<0.000000e+00> : vector<32x32xf32>
    %310 = tpu.matmul %309, %266, %cst_288 {dimension_numbers = #tpu.dot_dimension_numbers<[1], [0], [0], [1], [0, 0, 1, 1], [], []>} : vector<32x8xbf16>, vector<8x32xbf16>, vector<32x32xf32> -> vector<32x32xf32>
    %311 = arith.truncf %310 : vector<32x32xf32> to vector<32x32xbf16>
    %c5_289 = arith.constant 5 : index
    %c0_290 = arith.constant 0 : index
    %c0_291 = arith.constant 0 : index
    %312 = vector.load %arg17[%c5_289, %c0_290, %c0_291] : memref<9x32x16xbf16, #tpu.memory_space<vmem>>, vector<1x32x16xbf16>
    %313 = vector.shape_cast %312 : vector<1x32x16xbf16> to vector<32x16xbf16>
    %cst_292 = arith.constant dense<0.000000e+00> : vector<32x16xf32>
    %314 = tpu.matmul %311, %313, %cst_292 {dimension_numbers = #tpu.dot_dimension_numbers<[1], [0], [0], [1], [0, 0, 1, 1], [], []>} : vector<32x32xbf16>, vector<32x16xbf16>, vector<32x16xf32> -> vector<32x16xf32>
    %315 = arith.addf %307, %314 : vector<32x16xf32>
    %c6_293 = arith.constant 6 : index
    %c0_294 = arith.constant 0 : index
    %c0_295 = arith.constant 0 : index
    %316 = vector.load %arg16[%c6_293, %c0_294, %c0_295] : memref<9x32x8xbf16, #tpu.memory_space<vmem>>, vector<1x32x8xbf16>
    %317 = vector.shape_cast %316 : vector<1x32x8xbf16> to vector<32x8xbf16>
    %cst_296 = arith.constant dense<0.000000e+00> : vector<32x32xf32>
    %318 = tpu.matmul %317, %266, %cst_296 {dimension_numbers = #tpu.dot_dimension_numbers<[1], [0], [0], [1], [0, 0, 1, 1], [], []>} : vector<32x8xbf16>, vector<8x32xbf16>, vector<32x32xf32> -> vector<32x32xf32>
    %319 = arith.truncf %318 : vector<32x32xf32> to vector<32x32xbf16>
    %c6_297 = arith.constant 6 : index
    %c0_298 = arith.constant 0 : index
    %c0_299 = arith.constant 0 : index
    %320 = vector.load %arg17[%c6_297, %c0_298, %c0_299] : memref<9x32x16xbf16, #tpu.memory_space<vmem>>, vector<1x32x16xbf16>
    %321 = vector.shape_cast %320 : vector<1x32x16xbf16> to vector<32x16xbf16>
    %cst_300 = arith.constant dense<0.000000e+00> : vector<32x16xf32>
    %322 = tpu.matmul %319, %321, %cst_300 {dimension_numbers = #tpu.dot_dimension_numbers<[1], [0], [0], [1], [0, 0, 1, 1], [], []>} : vector<32x32xbf16>, vector<32x16xbf16>, vector<32x16xf32> -> vector<32x16xf32>
    %323 = arith.addf %315, %322 : vector<32x16xf32>
    %c7_301 = arith.constant 7 : index
    %c0_302 = arith.constant 0 : index
    %c0_303 = arith.constant 0 : index
    %324 = vector.load %arg16[%c7_301, %c0_302, %c0_303] : memref<9x32x8xbf16, #tpu.memory_space<vmem>>, vector<1x32x8xbf16>
    %325 = vector.shape_cast %324 : vector<1x32x8xbf16> to vector<32x8xbf16>
    %cst_304 = arith.constant dense<0.000000e+00> : vector<32x32xf32>
    %326 = tpu.matmul %325, %266, %cst_304 {dimension_numbers = #tpu.dot_dimension_numbers<[1], [0], [0], [1], [0, 0, 1, 1], [], []>} : vector<32x8xbf16>, vector<8x32xbf16>, vector<32x32xf32> -> vector<32x32xf32>
    %327 = arith.truncf %326 : vector<32x32xf32> to vector<32x32xbf16>
    %c7_305 = arith.constant 7 : index
    %c0_306 = arith.constant 0 : index
    %c0_307 = arith.constant 0 : index
    %328 = vector.load %arg17[%c7_305, %c0_306, %c0_307] : memref<9x32x16xbf16, #tpu.memory_space<vmem>>, vector<1x32x16xbf16>
    %329 = vector.shape_cast %328 : vector<1x32x16xbf16> to vector<32x16xbf16>
    %cst_308 = arith.constant dense<0.000000e+00> : vector<32x16xf32>
    %330 = tpu.matmul %327, %329, %cst_308 {dimension_numbers = #tpu.dot_dimension_numbers<[1], [0], [0], [1], [0, 0, 1, 1], [], []>} : vector<32x32xbf16>, vector<32x16xbf16>, vector<32x16xf32> -> vector<32x16xf32>
    %331 = arith.addf %323, %330 : vector<32x16xf32>
    %c8_309 = arith.constant 8 : index
    %c0_310 = arith.constant 0 : index
    %c0_311 = arith.constant 0 : index
    %332 = vector.load %arg16[%c8_309, %c0_310, %c0_311] : memref<9x32x8xbf16, #tpu.memory_space<vmem>>, vector<1x32x8xbf16>
    %333 = vector.shape_cast %332 : vector<1x32x8xbf16> to vector<32x8xbf16>
    %cst_312 = arith.constant dense<0.000000e+00> : vector<32x32xf32>
    %334 = tpu.matmul %333, %266, %cst_312 {dimension_numbers = #tpu.dot_dimension_numbers<[1], [0], [0], [1], [0, 0, 1, 1], [], []>} : vector<32x8xbf16>, vector<8x32xbf16>, vector<32x32xf32> -> vector<32x32xf32>
    %335 = arith.truncf %334 : vector<32x32xf32> to vector<32x32xbf16>
    %c8_313 = arith.constant 8 : index
    %c0_314 = arith.constant 0 : index
    %c0_315 = arith.constant 0 : index
    %336 = vector.load %arg17[%c8_313, %c0_314, %c0_315] : memref<9x32x16xbf16, #tpu.memory_space<vmem>>, vector<1x32x16xbf16>
    %337 = vector.shape_cast %336 : vector<1x32x16xbf16> to vector<32x16xbf16>
    %cst_316 = arith.constant dense<0.000000e+00> : vector<32x16xf32>
    %338 = tpu.matmul %335, %337, %cst_316 {dimension_numbers = #tpu.dot_dimension_numbers<[1], [0], [0], [1], [0, 0, 1, 1], [], []>} : vector<32x32xbf16>, vector<32x16xbf16>, vector<32x16xf32> -> vector<32x16xf32>
    %339 = arith.addf %331, %338 : vector<32x16xf32>
    %340 = vector.broadcast %265 : vector<1x16xf32> to vector<32x16xf32>
    %341 = arith.addf %339, %340 : vector<32x16xf32>
    %cst_317 = arith.constant 0.000000e+00 : f32
    %342 = vector.broadcast %cst_317 : f32 to vector<32x16xf32>
    %343 = arith.cmpf oge, %341, %342 : vector<32x16xf32>
    %cst_318 = arith.constant 0.00999999977 : f32
    %344 = vector.broadcast %cst_318 : f32 to vector<32x16xf32>
    %345 = arith.mulf %344, %341 : vector<32x16xf32>
    %346 = arith.select %343, %341, %345 : vector<32x16xi1>, vector<32x16xf32>
    %c0_319 = arith.constant 0 : index
    %c0_320 = arith.constant 0 : index
    %347 = vector.load %arg21[%c0_319, %c0_320] : memref<1x16xf32, #tpu.memory_space<vmem>>, vector<1x16xf32>
    %348 = arith.truncf %346 : vector<32x16xf32> to vector<32x16xbf16>
    %cst_321 = arith.constant 0.000000e+00 : f32
    %349 = vector.broadcast %cst_321 : f32 to vector<128x16xf32>
    %c0_322 = arith.constant 0 : index
    %c0_323 = arith.constant 0 : index
    %c0_324 = arith.constant 0 : index
    %350 = vector.load %arg19[%c0_322, %c0_323, %c0_324] : memref<9x128x32xbf16, #tpu.memory_space<vmem>>, vector<1x128x32xbf16>
    %351 = vector.shape_cast %350 : vector<1x128x32xbf16> to vector<128x32xbf16>
    %cst_325 = arith.constant dense<0.000000e+00> : vector<128x16xf32>
    %352 = tpu.matmul %351, %348, %cst_325 {dimension_numbers = #tpu.dot_dimension_numbers<[1], [0], [0], [1], [0, 0, 1, 1], [], []>} : vector<128x32xbf16>, vector<32x16xbf16>, vector<128x16xf32> -> vector<128x16xf32>
    %353 = arith.truncf %352 : vector<128x16xf32> to vector<128x16xbf16>
    %c0_326 = arith.constant 0 : index
    %c0_327 = arith.constant 0 : index
    %c0_328 = arith.constant 0 : index
    %354 = vector.load %arg20[%c0_326, %c0_327, %c0_328] : memref<9x16x16xbf16, #tpu.memory_space<vmem>>, vector<1x16x16xbf16>
    %355 = vector.shape_cast %354 : vector<1x16x16xbf16> to vector<16x16xbf16>
    %cst_329 = arith.constant dense<0.000000e+00> : vector<128x16xf32>
    %356 = tpu.matmul %353, %355, %cst_329 {dimension_numbers = #tpu.dot_dimension_numbers<[1], [0], [0], [1], [0, 0, 1, 1], [], []>} : vector<128x16xbf16>, vector<16x16xbf16>, vector<128x16xf32> -> vector<128x16xf32>
    %357 = arith.addf %349, %356 : vector<128x16xf32>
    %c1_330 = arith.constant 1 : index
    %c0_331 = arith.constant 0 : index
    %c0_332 = arith.constant 0 : index
    %358 = vector.load %arg19[%c1_330, %c0_331, %c0_332] : memref<9x128x32xbf16, #tpu.memory_space<vmem>>, vector<1x128x32xbf16>
    %359 = vector.shape_cast %358 : vector<1x128x32xbf16> to vector<128x32xbf16>
    %cst_333 = arith.constant dense<0.000000e+00> : vector<128x16xf32>
    %360 = tpu.matmul %359, %348, %cst_333 {dimension_numbers = #tpu.dot_dimension_numbers<[1], [0], [0], [1], [0, 0, 1, 1], [], []>} : vector<128x32xbf16>, vector<32x16xbf16>, vector<128x16xf32> -> vector<128x16xf32>
    %361 = arith.truncf %360 : vector<128x16xf32> to vector<128x16xbf16>
    %c1_334 = arith.constant 1 : index
    %c0_335 = arith.constant 0 : index
    %c0_336 = arith.constant 0 : index
    %362 = vector.load %arg20[%c1_334, %c0_335, %c0_336] : memref<9x16x16xbf16, #tpu.memory_space<vmem>>, vector<1x16x16xbf16>
    %363 = vector.shape_cast %362 : vector<1x16x16xbf16> to vector<16x16xbf16>
    %cst_337 = arith.constant dense<0.000000e+00> : vector<128x16xf32>
    %364 = tpu.matmul %361, %363, %cst_337 {dimension_numbers = #tpu.dot_dimension_numbers<[1], [0], [0], [1], [0, 0, 1, 1], [], []>} : vector<128x16xbf16>, vector<16x16xbf16>, vector<128x16xf32> -> vector<128x16xf32>
    %365 = arith.addf %357, %364 : vector<128x16xf32>
    %c2_338 = arith.constant 2 : index
    %c0_339 = arith.constant 0 : index
    %c0_340 = arith.constant 0 : index
    %366 = vector.load %arg19[%c2_338, %c0_339, %c0_340] : memref<9x128x32xbf16, #tpu.memory_space<vmem>>, vector<1x128x32xbf16>
    %367 = vector.shape_cast %366 : vector<1x128x32xbf16> to vector<128x32xbf16>
    %cst_341 = arith.constant dense<0.000000e+00> : vector<128x16xf32>
    %368 = tpu.matmul %367, %348, %cst_341 {dimension_numbers = #tpu.dot_dimension_numbers<[1], [0], [0], [1], [0, 0, 1, 1], [], []>} : vector<128x32xbf16>, vector<32x16xbf16>, vector<128x16xf32> -> vector<128x16xf32>
    %369 = arith.truncf %368 : vector<128x16xf32> to vector<128x16xbf16>
    %c2_342 = arith.constant 2 : index
    %c0_343 = arith.constant 0 : index
    %c0_344 = arith.constant 0 : index
    %370 = vector.load %arg20[%c2_342, %c0_343, %c0_344] : memref<9x16x16xbf16, #tpu.memory_space<vmem>>, vector<1x16x16xbf16>
    %371 = vector.shape_cast %370 : vector<1x16x16xbf16> to vector<16x16xbf16>
    %cst_345 = arith.constant dense<0.000000e+00> : vector<128x16xf32>
    %372 = tpu.matmul %369, %371, %cst_345 {dimension_numbers = #tpu.dot_dimension_numbers<[1], [0], [0], [1], [0, 0, 1, 1], [], []>} : vector<128x16xbf16>, vector<16x16xbf16>, vector<128x16xf32> -> vector<128x16xf32>
    %373 = arith.addf %365, %372 : vector<128x16xf32>
    %c3_346 = arith.constant 3 : index
    %c0_347 = arith.constant 0 : index
    %c0_348 = arith.constant 0 : index
    %374 = vector.load %arg19[%c3_346, %c0_347, %c0_348] : memref<9x128x32xbf16, #tpu.memory_space<vmem>>, vector<1x128x32xbf16>
    %375 = vector.shape_cast %374 : vector<1x128x32xbf16> to vector<128x32xbf16>
    %cst_349 = arith.constant dense<0.000000e+00> : vector<128x16xf32>
    %376 = tpu.matmul %375, %348, %cst_349 {dimension_numbers = #tpu.dot_dimension_numbers<[1], [0], [0], [1], [0, 0, 1, 1], [], []>} : vector<128x32xbf16>, vector<32x16xbf16>, vector<128x16xf32> -> vector<128x16xf32>
    %377 = arith.truncf %376 : vector<128x16xf32> to vector<128x16xbf16>
    %c3_350 = arith.constant 3 : index
    %c0_351 = arith.constant 0 : index
    %c0_352 = arith.constant 0 : index
    %378 = vector.load %arg20[%c3_350, %c0_351, %c0_352] : memref<9x16x16xbf16, #tpu.memory_space<vmem>>, vector<1x16x16xbf16>
    %379 = vector.shape_cast %378 : vector<1x16x16xbf16> to vector<16x16xbf16>
    %cst_353 = arith.constant dense<0.000000e+00> : vector<128x16xf32>
    %380 = tpu.matmul %377, %379, %cst_353 {dimension_numbers = #tpu.dot_dimension_numbers<[1], [0], [0], [1], [0, 0, 1, 1], [], []>} : vector<128x16xbf16>, vector<16x16xbf16>, vector<128x16xf32> -> vector<128x16xf32>
    %381 = arith.addf %373, %380 : vector<128x16xf32>
    %c4_354 = arith.constant 4 : index
    %c0_355 = arith.constant 0 : index
    %c0_356 = arith.constant 0 : index
    %382 = vector.load %arg19[%c4_354, %c0_355, %c0_356] : memref<9x128x32xbf16, #tpu.memory_space<vmem>>, vector<1x128x32xbf16>
    %383 = vector.shape_cast %382 : vector<1x128x32xbf16> to vector<128x32xbf16>
    %cst_357 = arith.constant dense<0.000000e+00> : vector<128x16xf32>
    %384 = tpu.matmul %383, %348, %cst_357 {dimension_numbers = #tpu.dot_dimension_numbers<[1], [0], [0], [1], [0, 0, 1, 1], [], []>} : vector<128x32xbf16>, vector<32x16xbf16>, vector<128x16xf32> -> vector<128x16xf32>
    %385 = arith.truncf %384 : vector<128x16xf32> to vector<128x16xbf16>
    %c4_358 = arith.constant 4 : index
    %c0_359 = arith.constant 0 : index
    %c0_360 = arith.constant 0 : index
    %386 = vector.load %arg20[%c4_358, %c0_359, %c0_360] : memref<9x16x16xbf16, #tpu.memory_space<vmem>>, vector<1x16x16xbf16>
    %387 = vector.shape_cast %386 : vector<1x16x16xbf16> to vector<16x16xbf16>
    %cst_361 = arith.constant dense<0.000000e+00> : vector<128x16xf32>
    %388 = tpu.matmul %385, %387, %cst_361 {dimension_numbers = #tpu.dot_dimension_numbers<[1], [0], [0], [1], [0, 0, 1, 1], [], []>} : vector<128x16xbf16>, vector<16x16xbf16>, vector<128x16xf32> -> vector<128x16xf32>
    %389 = arith.addf %381, %388 : vector<128x16xf32>
    %c5_362 = arith.constant 5 : index
    %c0_363 = arith.constant 0 : index
    %c0_364 = arith.constant 0 : index
    %390 = vector.load %arg19[%c5_362, %c0_363, %c0_364] : memref<9x128x32xbf16, #tpu.memory_space<vmem>>, vector<1x128x32xbf16>
    %391 = vector.shape_cast %390 : vector<1x128x32xbf16> to vector<128x32xbf16>
    %cst_365 = arith.constant dense<0.000000e+00> : vector<128x16xf32>
    %392 = tpu.matmul %391, %348, %cst_365 {dimension_numbers = #tpu.dot_dimension_numbers<[1], [0], [0], [1], [0, 0, 1, 1], [], []>} : vector<128x32xbf16>, vector<32x16xbf16>, vector<128x16xf32> -> vector<128x16xf32>
    %393 = arith.truncf %392 : vector<128x16xf32> to vector<128x16xbf16>
    %c5_366 = arith.constant 5 : index
    %c0_367 = arith.constant 0 : index
    %c0_368 = arith.constant 0 : index
    %394 = vector.load %arg20[%c5_366, %c0_367, %c0_368] : memref<9x16x16xbf16, #tpu.memory_space<vmem>>, vector<1x16x16xbf16>
    %395 = vector.shape_cast %394 : vector<1x16x16xbf16> to vector<16x16xbf16>
    %cst_369 = arith.constant dense<0.000000e+00> : vector<128x16xf32>
    %396 = tpu.matmul %393, %395, %cst_369 {dimension_numbers = #tpu.dot_dimension_numbers<[1], [0], [0], [1], [0, 0, 1, 1], [], []>} : vector<128x16xbf16>, vector<16x16xbf16>, vector<128x16xf32> -> vector<128x16xf32>
    %397 = arith.addf %389, %396 : vector<128x16xf32>
    %c6_370 = arith.constant 6 : index
    %c0_371 = arith.constant 0 : index
    %c0_372 = arith.constant 0 : index
    %398 = vector.load %arg19[%c6_370, %c0_371, %c0_372] : memref<9x128x32xbf16, #tpu.memory_space<vmem>>, vector<1x128x32xbf16>
    %399 = vector.shape_cast %398 : vector<1x128x32xbf16> to vector<128x32xbf16>
    %cst_373 = arith.constant dense<0.000000e+00> : vector<128x16xf32>
    %400 = tpu.matmul %399, %348, %cst_373 {dimension_numbers = #tpu.dot_dimension_numbers<[1], [0], [0], [1], [0, 0, 1, 1], [], []>} : vector<128x32xbf16>, vector<32x16xbf16>, vector<128x16xf32> -> vector<128x16xf32>
    %401 = arith.truncf %400 : vector<128x16xf32> to vector<128x16xbf16>
    %c6_374 = arith.constant 6 : index
    %c0_375 = arith.constant 0 : index
    %c0_376 = arith.constant 0 : index
    %402 = vector.load %arg20[%c6_374, %c0_375, %c0_376] : memref<9x16x16xbf16, #tpu.memory_space<vmem>>, vector<1x16x16xbf16>
    %403 = vector.shape_cast %402 : vector<1x16x16xbf16> to vector<16x16xbf16>
    %cst_377 = arith.constant dense<0.000000e+00> : vector<128x16xf32>
    %404 = tpu.matmul %401, %403, %cst_377 {dimension_numbers = #tpu.dot_dimension_numbers<[1], [0], [0], [1], [0, 0, 1, 1], [], []>} : vector<128x16xbf16>, vector<16x16xbf16>, vector<128x16xf32> -> vector<128x16xf32>
    %405 = arith.addf %397, %404 : vector<128x16xf32>
    %c7_378 = arith.constant 7 : index
    %c0_379 = arith.constant 0 : index
    %c0_380 = arith.constant 0 : index
    %406 = vector.load %arg19[%c7_378, %c0_379, %c0_380] : memref<9x128x32xbf16, #tpu.memory_space<vmem>>, vector<1x128x32xbf16>
    %407 = vector.shape_cast %406 : vector<1x128x32xbf16> to vector<128x32xbf16>
    %cst_381 = arith.constant dense<0.000000e+00> : vector<128x16xf32>
    %408 = tpu.matmul %407, %348, %cst_381 {dimension_numbers = #tpu.dot_dimension_numbers<[1], [0], [0], [1], [0, 0, 1, 1], [], []>} : vector<128x32xbf16>, vector<32x16xbf16>, vector<128x16xf32> -> vector<128x16xf32>
    %409 = arith.truncf %408 : vector<128x16xf32> to vector<128x16xbf16>
    %c7_382 = arith.constant 7 : index
    %c0_383 = arith.constant 0 : index
    %c0_384 = arith.constant 0 : index
    %410 = vector.load %arg20[%c7_382, %c0_383, %c0_384] : memref<9x16x16xbf16, #tpu.memory_space<vmem>>, vector<1x16x16xbf16>
    %411 = vector.shape_cast %410 : vector<1x16x16xbf16> to vector<16x16xbf16>
    %cst_385 = arith.constant dense<0.000000e+00> : vector<128x16xf32>
    %412 = tpu.matmul %409, %411, %cst_385 {dimension_numbers = #tpu.dot_dimension_numbers<[1], [0], [0], [1], [0, 0, 1, 1], [], []>} : vector<128x16xbf16>, vector<16x16xbf16>, vector<128x16xf32> -> vector<128x16xf32>
    %413 = arith.addf %405, %412 : vector<128x16xf32>
    %c8_386 = arith.constant 8 : index
    %c0_387 = arith.constant 0 : index
    %c0_388 = arith.constant 0 : index
    %414 = vector.load %arg19[%c8_386, %c0_387, %c0_388] : memref<9x128x32xbf16, #tpu.memory_space<vmem>>, vector<1x128x32xbf16>
    %415 = vector.shape_cast %414 : vector<1x128x32xbf16> to vector<128x32xbf16>
    %cst_389 = arith.constant dense<0.000000e+00> : vector<128x16xf32>
    %416 = tpu.matmul %415, %348, %cst_389 {dimension_numbers = #tpu.dot_dimension_numbers<[1], [0], [0], [1], [0, 0, 1, 1], [], []>} : vector<128x32xbf16>, vector<32x16xbf16>, vector<128x16xf32> -> vector<128x16xf32>
    %417 = arith.truncf %416 : vector<128x16xf32> to vector<128x16xbf16>
    %c8_390 = arith.constant 8 : index
    %c0_391 = arith.constant 0 : index
    %c0_392 = arith.constant 0 : index
    %418 = vector.load %arg20[%c8_390, %c0_391, %c0_392] : memref<9x16x16xbf16, #tpu.memory_space<vmem>>, vector<1x16x16xbf16>
    %419 = vector.shape_cast %418 : vector<1x16x16xbf16> to vector<16x16xbf16>
    %cst_393 = arith.constant dense<0.000000e+00> : vector<128x16xf32>
    %420 = tpu.matmul %417, %419, %cst_393 {dimension_numbers = #tpu.dot_dimension_numbers<[1], [0], [0], [1], [0, 0, 1, 1], [], []>} : vector<128x16xbf16>, vector<16x16xbf16>, vector<128x16xf32> -> vector<128x16xf32>
    %421 = arith.addf %413, %420 : vector<128x16xf32>
    %422 = vector.broadcast %347 : vector<1x16xf32> to vector<128x16xf32>
    %423 = arith.addf %421, %422 : vector<128x16xf32>
    %cst_394 = arith.constant 0.000000e+00 : f32
    %424 = vector.broadcast %cst_394 : f32 to vector<128x16xf32>
    %425 = arith.cmpf oge, %423, %424 : vector<128x16xf32>
    %cst_395 = arith.constant 0.00999999977 : f32
    %426 = vector.broadcast %cst_395 : f32 to vector<128x16xf32>
    %427 = arith.mulf %426, %423 : vector<128x16xf32>
    %428 = arith.select %425, %423, %427 : vector<128x16xi1>, vector<128x16xf32>
    %c0_396 = arith.constant 0 : index
    %c0_397 = arith.constant 0 : index
    %429 = vector.load %arg24[%c0_396, %c0_397] : memref<1x128xf32, #tpu.memory_space<vmem>>, vector<1x128xf32>
    %430 = arith.truncf %428 : vector<128x16xf32> to vector<128x16xbf16>
    %cst_398 = arith.constant 0.000000e+00 : f32
    %431 = vector.broadcast %cst_398 : f32 to vector<128x128xf32>
    %c0_399 = arith.constant 0 : index
    %c0_400 = arith.constant 0 : index
    %c0_401 = arith.constant 0 : index
    %432 = vector.load %arg22[%c0_399, %c0_400, %c0_401] : memref<9x128x128xbf16, #tpu.memory_space<vmem>>, vector<1x128x128xbf16>
    %433 = vector.shape_cast %432 : vector<1x128x128xbf16> to vector<128x128xbf16>
    %cst_402 = arith.constant dense<0.000000e+00> : vector<128x16xf32>
    %434 = tpu.matmul %433, %430, %cst_402 {dimension_numbers = #tpu.dot_dimension_numbers<[1], [0], [0], [1], [0, 0, 1, 1], [], []>} : vector<128x128xbf16>, vector<128x16xbf16>, vector<128x16xf32> -> vector<128x16xf32>
    %435 = arith.truncf %434 : vector<128x16xf32> to vector<128x16xbf16>
    %c0_403 = arith.constant 0 : index
    %c0_404 = arith.constant 0 : index
    %c0_405 = arith.constant 0 : index
    %436 = vector.load %arg23[%c0_403, %c0_404, %c0_405] : memref<9x16x128xbf16, #tpu.memory_space<vmem>>, vector<1x16x128xbf16>
    %437 = vector.shape_cast %436 : vector<1x16x128xbf16> to vector<16x128xbf16>
    %cst_406 = arith.constant dense<0.000000e+00> : vector<128x128xf32>
    %438 = tpu.matmul %435, %437, %cst_406 {dimension_numbers = #tpu.dot_dimension_numbers<[1], [0], [0], [1], [0, 0, 1, 1], [], []>} : vector<128x16xbf16>, vector<16x128xbf16>, vector<128x128xf32> -> vector<128x128xf32>
    %439 = arith.addf %431, %438 : vector<128x128xf32>
    %c1_407 = arith.constant 1 : index
    %c0_408 = arith.constant 0 : index
    %c0_409 = arith.constant 0 : index
    %440 = vector.load %arg22[%c1_407, %c0_408, %c0_409] : memref<9x128x128xbf16, #tpu.memory_space<vmem>>, vector<1x128x128xbf16>
    %441 = vector.shape_cast %440 : vector<1x128x128xbf16> to vector<128x128xbf16>
    %cst_410 = arith.constant dense<0.000000e+00> : vector<128x16xf32>
    %442 = tpu.matmul %441, %430, %cst_410 {dimension_numbers = #tpu.dot_dimension_numbers<[1], [0], [0], [1], [0, 0, 1, 1], [], []>} : vector<128x128xbf16>, vector<128x16xbf16>, vector<128x16xf32> -> vector<128x16xf32>
    %443 = arith.truncf %442 : vector<128x16xf32> to vector<128x16xbf16>
    %c1_411 = arith.constant 1 : index
    %c0_412 = arith.constant 0 : index
    %c0_413 = arith.constant 0 : index
    %444 = vector.load %arg23[%c1_411, %c0_412, %c0_413] : memref<9x16x128xbf16, #tpu.memory_space<vmem>>, vector<1x16x128xbf16>
    %445 = vector.shape_cast %444 : vector<1x16x128xbf16> to vector<16x128xbf16>
    %cst_414 = arith.constant dense<0.000000e+00> : vector<128x128xf32>
    %446 = tpu.matmul %443, %445, %cst_414 {dimension_numbers = #tpu.dot_dimension_numbers<[1], [0], [0], [1], [0, 0, 1, 1], [], []>} : vector<128x16xbf16>, vector<16x128xbf16>, vector<128x128xf32> -> vector<128x128xf32>
    %447 = arith.addf %439, %446 : vector<128x128xf32>
    %c2_415 = arith.constant 2 : index
    %c0_416 = arith.constant 0 : index
    %c0_417 = arith.constant 0 : index
    %448 = vector.load %arg22[%c2_415, %c0_416, %c0_417] : memref<9x128x128xbf16, #tpu.memory_space<vmem>>, vector<1x128x128xbf16>
    %449 = vector.shape_cast %448 : vector<1x128x128xbf16> to vector<128x128xbf16>
    %cst_418 = arith.constant dense<0.000000e+00> : vector<128x16xf32>
    %450 = tpu.matmul %449, %430, %cst_418 {dimension_numbers = #tpu.dot_dimension_numbers<[1], [0], [0], [1], [0, 0, 1, 1], [], []>} : vector<128x128xbf16>, vector<128x16xbf16>, vector<128x16xf32> -> vector<128x16xf32>
    %451 = arith.truncf %450 : vector<128x16xf32> to vector<128x16xbf16>
    %c2_419 = arith.constant 2 : index
    %c0_420 = arith.constant 0 : index
    %c0_421 = arith.constant 0 : index
    %452 = vector.load %arg23[%c2_419, %c0_420, %c0_421] : memref<9x16x128xbf16, #tpu.memory_space<vmem>>, vector<1x16x128xbf16>
    %453 = vector.shape_cast %452 : vector<1x16x128xbf16> to vector<16x128xbf16>
    %cst_422 = arith.constant dense<0.000000e+00> : vector<128x128xf32>
    %454 = tpu.matmul %451, %453, %cst_422 {dimension_numbers = #tpu.dot_dimension_numbers<[1], [0], [0], [1], [0, 0, 1, 1], [], []>} : vector<128x16xbf16>, vector<16x128xbf16>, vector<128x128xf32> -> vector<128x128xf32>
    %455 = arith.addf %447, %454 : vector<128x128xf32>
    %c3_423 = arith.constant 3 : index
    %c0_424 = arith.constant 0 : index
    %c0_425 = arith.constant 0 : index
    %456 = vector.load %arg22[%c3_423, %c0_424, %c0_425] : memref<9x128x128xbf16, #tpu.memory_space<vmem>>, vector<1x128x128xbf16>
    %457 = vector.shape_cast %456 : vector<1x128x128xbf16> to vector<128x128xbf16>
    %cst_426 = arith.constant dense<0.000000e+00> : vector<128x16xf32>
    %458 = tpu.matmul %457, %430, %cst_426 {dimension_numbers = #tpu.dot_dimension_numbers<[1], [0], [0], [1], [0, 0, 1, 1], [], []>} : vector<128x128xbf16>, vector<128x16xbf16>, vector<128x16xf32> -> vector<128x16xf32>
    %459 = arith.truncf %458 : vector<128x16xf32> to vector<128x16xbf16>
    %c3_427 = arith.constant 3 : index
    %c0_428 = arith.constant 0 : index
    %c0_429 = arith.constant 0 : index
    %460 = vector.load %arg23[%c3_427, %c0_428, %c0_429] : memref<9x16x128xbf16, #tpu.memory_space<vmem>>, vector<1x16x128xbf16>
    %461 = vector.shape_cast %460 : vector<1x16x128xbf16> to vector<16x128xbf16>
    %cst_430 = arith.constant dense<0.000000e+00> : vector<128x128xf32>
    %462 = tpu.matmul %459, %461, %cst_430 {dimension_numbers = #tpu.dot_dimension_numbers<[1], [0], [0], [1], [0, 0, 1, 1], [], []>} : vector<128x16xbf16>, vector<16x128xbf16>, vector<128x128xf32> -> vector<128x128xf32>
    %463 = arith.addf %455, %462 : vector<128x128xf32>
    %c4_431 = arith.constant 4 : index
    %c0_432 = arith.constant 0 : index
    %c0_433 = arith.constant 0 : index
    %464 = vector.load %arg22[%c4_431, %c0_432, %c0_433] : memref<9x128x128xbf16, #tpu.memory_space<vmem>>, vector<1x128x128xbf16>
    %465 = vector.shape_cast %464 : vector<1x128x128xbf16> to vector<128x128xbf16>
    %cst_434 = arith.constant dense<0.000000e+00> : vector<128x16xf32>
    %466 = tpu.matmul %465, %430, %cst_434 {dimension_numbers = #tpu.dot_dimension_numbers<[1], [0], [0], [1], [0, 0, 1, 1], [], []>} : vector<128x128xbf16>, vector<128x16xbf16>, vector<128x16xf32> -> vector<128x16xf32>
    %467 = arith.truncf %466 : vector<128x16xf32> to vector<128x16xbf16>
    %c4_435 = arith.constant 4 : index
    %c0_436 = arith.constant 0 : index
    %c0_437 = arith.constant 0 : index
    %468 = vector.load %arg23[%c4_435, %c0_436, %c0_437] : memref<9x16x128xbf16, #tpu.memory_space<vmem>>, vector<1x16x128xbf16>
    %469 = vector.shape_cast %468 : vector<1x16x128xbf16> to vector<16x128xbf16>
    %cst_438 = arith.constant dense<0.000000e+00> : vector<128x128xf32>
    %470 = tpu.matmul %467, %469, %cst_438 {dimension_numbers = #tpu.dot_dimension_numbers<[1], [0], [0], [1], [0, 0, 1, 1], [], []>} : vector<128x16xbf16>, vector<16x128xbf16>, vector<128x128xf32> -> vector<128x128xf32>
    %471 = arith.addf %463, %470 : vector<128x128xf32>
    %c5_439 = arith.constant 5 : index
    %c0_440 = arith.constant 0 : index
    %c0_441 = arith.constant 0 : index
    %472 = vector.load %arg22[%c5_439, %c0_440, %c0_441] : memref<9x128x128xbf16, #tpu.memory_space<vmem>>, vector<1x128x128xbf16>
    %473 = vector.shape_cast %472 : vector<1x128x128xbf16> to vector<128x128xbf16>
    %cst_442 = arith.constant dense<0.000000e+00> : vector<128x16xf32>
    %474 = tpu.matmul %473, %430, %cst_442 {dimension_numbers = #tpu.dot_dimension_numbers<[1], [0], [0], [1], [0, 0, 1, 1], [], []>} : vector<128x128xbf16>, vector<128x16xbf16>, vector<128x16xf32> -> vector<128x16xf32>
    %475 = arith.truncf %474 : vector<128x16xf32> to vector<128x16xbf16>
    %c5_443 = arith.constant 5 : index
    %c0_444 = arith.constant 0 : index
    %c0_445 = arith.constant 0 : index
    %476 = vector.load %arg23[%c5_443, %c0_444, %c0_445] : memref<9x16x128xbf16, #tpu.memory_space<vmem>>, vector<1x16x128xbf16>
    %477 = vector.shape_cast %476 : vector<1x16x128xbf16> to vector<16x128xbf16>
    %cst_446 = arith.constant dense<0.000000e+00> : vector<128x128xf32>
    %478 = tpu.matmul %475, %477, %cst_446 {dimension_numbers = #tpu.dot_dimension_numbers<[1], [0], [0], [1], [0, 0, 1, 1], [], []>} : vector<128x16xbf16>, vector<16x128xbf16>, vector<128x128xf32> -> vector<128x128xf32>
    %479 = arith.addf %471, %478 : vector<128x128xf32>
    %c6_447 = arith.constant 6 : index
    %c0_448 = arith.constant 0 : index
    %c0_449 = arith.constant 0 : index
    %480 = vector.load %arg22[%c6_447, %c0_448, %c0_449] : memref<9x128x128xbf16, #tpu.memory_space<vmem>>, vector<1x128x128xbf16>
    %481 = vector.shape_cast %480 : vector<1x128x128xbf16> to vector<128x128xbf16>
    %cst_450 = arith.constant dense<0.000000e+00> : vector<128x16xf32>
    %482 = tpu.matmul %481, %430, %cst_450 {dimension_numbers = #tpu.dot_dimension_numbers<[1], [0], [0], [1], [0, 0, 1, 1], [], []>} : vector<128x128xbf16>, vector<128x16xbf16>, vector<128x16xf32> -> vector<128x16xf32>
    %483 = arith.truncf %482 : vector<128x16xf32> to vector<128x16xbf16>
    %c6_451 = arith.constant 6 : index
    %c0_452 = arith.constant 0 : index
    %c0_453 = arith.constant 0 : index
    %484 = vector.load %arg23[%c6_451, %c0_452, %c0_453] : memref<9x16x128xbf16, #tpu.memory_space<vmem>>, vector<1x16x128xbf16>
    %485 = vector.shape_cast %484 : vector<1x16x128xbf16> to vector<16x128xbf16>
    %cst_454 = arith.constant dense<0.000000e+00> : vector<128x128xf32>
    %486 = tpu.matmul %483, %485, %cst_454 {dimension_numbers = #tpu.dot_dimension_numbers<[1], [0], [0], [1], [0, 0, 1, 1], [], []>} : vector<128x16xbf16>, vector<16x128xbf16>, vector<128x128xf32> -> vector<128x128xf32>
    %487 = arith.addf %479, %486 : vector<128x128xf32>
    %c7_455 = arith.constant 7 : index
    %c0_456 = arith.constant 0 : index
    %c0_457 = arith.constant 0 : index
    %488 = vector.load %arg22[%c7_455, %c0_456, %c0_457] : memref<9x128x128xbf16, #tpu.memory_space<vmem>>, vector<1x128x128xbf16>
    %489 = vector.shape_cast %488 : vector<1x128x128xbf16> to vector<128x128xbf16>
    %cst_458 = arith.constant dense<0.000000e+00> : vector<128x16xf32>
    %490 = tpu.matmul %489, %430, %cst_458 {dimension_numbers = #tpu.dot_dimension_numbers<[1], [0], [0], [1], [0, 0, 1, 1], [], []>} : vector<128x128xbf16>, vector<128x16xbf16>, vector<128x16xf32> -> vector<128x16xf32>
    %491 = arith.truncf %490 : vector<128x16xf32> to vector<128x16xbf16>
    %c7_459 = arith.constant 7 : index
    %c0_460 = arith.constant 0 : index
    %c0_461 = arith.constant 0 : index
    %492 = vector.load %arg23[%c7_459, %c0_460, %c0_461] : memref<9x16x128xbf16, #tpu.memory_space<vmem>>, vector<1x16x128xbf16>
    %493 = vector.shape_cast %492 : vector<1x16x128xbf16> to vector<16x128xbf16>
    %cst_462 = arith.constant dense<0.000000e+00> : vector<128x128xf32>
    %494 = tpu.matmul %491, %493, %cst_462 {dimension_numbers = #tpu.dot_dimension_numbers<[1], [0], [0], [1], [0, 0, 1, 1], [], []>} : vector<128x16xbf16>, vector<16x128xbf16>, vector<128x128xf32> -> vector<128x128xf32>
    %495 = arith.addf %487, %494 : vector<128x128xf32>
    %c8_463 = arith.constant 8 : index
    %c0_464 = arith.constant 0 : index
    %c0_465 = arith.constant 0 : index
    %496 = vector.load %arg22[%c8_463, %c0_464, %c0_465] : memref<9x128x128xbf16, #tpu.memory_space<vmem>>, vector<1x128x128xbf16>
    %497 = vector.shape_cast %496 : vector<1x128x128xbf16> to vector<128x128xbf16>
    %cst_466 = arith.constant dense<0.000000e+00> : vector<128x16xf32>
    %498 = tpu.matmul %497, %430, %cst_466 {dimension_numbers = #tpu.dot_dimension_numbers<[1], [0], [0], [1], [0, 0, 1, 1], [], []>} : vector<128x128xbf16>, vector<128x16xbf16>, vector<128x16xf32> -> vector<128x16xf32>
    %499 = arith.truncf %498 : vector<128x16xf32> to vector<128x16xbf16>
    %c8_467 = arith.constant 8 : index
    %c0_468 = arith.constant 0 : index
    %c0_469 = arith.constant 0 : index
    %500 = vector.load %arg23[%c8_467, %c0_468, %c0_469] : memref<9x16x128xbf16, #tpu.memory_space<vmem>>, vector<1x16x128xbf16>
    %501 = vector.shape_cast %500 : vector<1x16x128xbf16> to vector<16x128xbf16>
    %cst_470 = arith.constant dense<0.000000e+00> : vector<128x128xf32>
    %502 = tpu.matmul %499, %501, %cst_470 {dimension_numbers = #tpu.dot_dimension_numbers<[1], [0], [0], [1], [0, 0, 1, 1], [], []>} : vector<128x16xbf16>, vector<16x128xbf16>, vector<128x128xf32> -> vector<128x128xf32>
    %503 = arith.addf %495, %502 : vector<128x128xf32>
    %504 = vector.broadcast %429 : vector<1x128xf32> to vector<128x128xf32>
    %505 = arith.addf %503, %504 : vector<128x128xf32>
    %506 = math.tanh %505 : vector<128x128xf32>
    %c0_471 = arith.constant 0 : index
    %c0_472 = arith.constant 0 : index
    %507 = vector.load %arg25[%c0_471, %c0_472] : memref<128x128xf32, #tpu.memory_space<vmem>>, vector<128x128xf32>
    tpu.vector_store %arg25[%c0_471, %c0_472], %506 {strides = array<i32>} : memref<128x128xf32, #tpu.memory_space<vmem>>, vector<128x128xf32>,
    return
  }
}

</mosaic_0001>

<bundles_post_ra>
// kernel: _lambda_.1
= control target key start
LH: loop header
LB: loop body
LE: loop exit
PB: predicated region body
PF: predicated region fallthrough
CT: control target
= control target key end

     0   :  { %s16182_s0 = inlined_call_operand.vmem [shape: bf16[128,3], index: 0, kind: input, shape index: {}]   ;;  %s16183_s1 = inlined_call_operand.vmem [shape: f32[8,8], index: 1, kind: input, shape index: {}]   ;;  %s16184_s2 = inlined_call_operand.hbm [shape: bf16[9,32,128], index: 2, kind: input, shape index: {}]   ;;  %s16185_s3 = inlined_call_operand.hbm [shape: bf16[9,3,16], index: 3, kind: input, shape index: {}]   ;;  %s16186_s4 = inlined_call_operand.hbm [shape: f32[1,16], index: 4, kind: input, shape index: {}]   ;;  %s16187_s5 = inlined_call_operand.hbm [shape: bf16[9,8,32], index: 5, kind: input, shape index: {}]   ;;  %s16188_s6 = inlined_call_operand.vmem [shape: bf16[9,16,32], index: 6, kind: input, shape index: {}]   ;;  %s16189_s7 = inlined_call_operand.hbm [shape: f32[1,32], index: 7, kind: input, shape index: {}]   ;;  %s16190_s8 = inlined_call_operand.hbm [shape: bf16[4,8,8], index: 8, kind: input, shape index: {}]   ;;  %s16191_s9 = inlined_call_operand.hbm [shape: bf16[4,32,8], index: 9, kind: input, shape index: {}]   ;;  %s16192_s10 = inlined_call_operand.hbm [shape: f32[1,8], index: 10, kind: input, shape index: {}]   ;;  %s16193_s11 = inlined_call_operand.hbm [shape: bf16[4,32,8], index: 11, kind: input, shape index: {}]   ;;  %s16194_s12 = inlined_call_operand.hbm [shape: f32[1,8], index: 12, kind: input, shape index: {}]   ;;  %s16195_s13 = inlined_call_operand.hbm [shape: bf16[4,8,8], index: 13, kind: input, shape index: {}]   ;;  %s16196_s14 = inlined_call_operand.hbm [shape: bf16[4,8,32], index: 14, kind: input, shape index: {}]   ;;  %s16197_s15 = inlined_call_operand.vmem [shape: f32[8,32], index: 15, kind: input, shape index: {}]   ;;  %s16198_s16 = inlined_call_operand.vmem [shape: bf16[9,32,8], index: 16, kind: input, shape index: {}]   ;;  %s16199_s17 = inlined_call_operand.hbm [shape: bf16[9,32,16], index: 17, kind: input, shape index: {}]   ;;  %s16200_s18 = inlined_call_operand.vmem [shape: f32[1,16], index: 18, kind: input, shape index: {}]   ;;  %s16201_s19 = inlined_call_operand.hbm [shape: bf16[9,128,32], index: 19, kind: input, shape index: {}]   ;;  %s16202_s20 = inlined_call_operand.vmem [shape: bf16[9,16,16], index: 20, kind: input, shape index: {}]   ;;  %s16203_s21 = inlined_call_operand.vmem [shape: f32[1,16], index: 21, kind: input, shape index: {}]   ;;  %s16204_s22 = inlined_call_operand.hbm [shape: bf16[9,128,128], index: 22, kind: input, shape index: {}]   ;;  %s16205_s23 = inlined_call_operand.hbm [shape: bf16[9,16,128], index: 23, kind: input, shape index: {}]   ;;  %s16206_s24 = inlined_call_operand.hbm [shape: f32[1,128], index: 24, kind: input, shape index: {}]   ;;  %s16207_s25 = inlined_call_operand.vmem [shape: f32[128,128], index: 25, kind: output, shape index: {0}]   ;;  %s16208_s26 = inlined_call_operand.vmem [shape: f32[8,8], index: 26, kind: output, shape index: {1}]   ;;  %s16209_s27 = inlined_call_operand.vmem [shape: f32[8,8], index: 27, kind: output, shape index: {2}]  }
   0x1   :  { %16223 = sst [smem:[#allocation37_spill]] %s16182_s0 }
   0x2   :  { %16224 = sst [smem:[#allocation38_spill]] %s16183_s1 }
   0x3   :  { %16225 = sst [smem:[#allocation39_spill]] %s16184_s2 }
   0x4   :  { %16226 = sst [smem:[#allocation40_spill]] %s16185_s3 }
   0x5   :  { %16227 = sst [smem:[#allocation41_spill]] %s16186_s4 }
   0x6   :  { %16228 = sst [smem:[#allocation42_spill]] %s16187_s5 }
   0x7   :  { %16229 = sst [smem:[#allocation43_spill]] %s16188_s6 }
   0x8   :  { %16230 = sst [smem:[#allocation44_spill]] %s16189_s7 }
   0x9   :  { %16231 = sst [smem:[#allocation45_spill]] %s16190_s8 }
   0xa   :  { %16232 = sst [smem:[#allocation46_spill]] %s16191_s9 }
   0xb   :  { %16233 = sst [smem:[#allocation47_spill]] %s16192_s10 }
   0xc   :  { %16234 = sst [smem:[#allocation48_spill]] %s16193_s11 }
   0xd   :  { %16235 = sst [smem:[#allocation49_spill]] %s16202_s20 }
   0xe   :  { %16236 = sst [smem:[#allocation50_spill]] %s16203_s21 }
   0xf   :  { %16237 = sst [smem:[#allocation51_spill]] %s16207_s25 }
  0x10   :  { %33 = vsyncpa [#allocation3], 0 }
  0x11   :  { %34 = vsyncpa [#allocation5], 0 }
  0x12   :  { %35 = vsyncpa [#allocation8], 0 }
  0x13   :  { %36 = vsyncpa [#allocation11], 0 }
  0x14   :  { %37 = vsyncpa [#allocation14], 0 }
  0x15   :  { %38 = vsyncpa [#allocation17], 0 }
  0x16   :  { %39 = vsyncpa [#allocation20], 0 }
  0x17   :  { %40 = vsyncpa [#allocation23], 0 }
  0x18   :  { %41 = vsyncpa [#allocation26], 0  ;;  %s14558_s7 = smov [#allocation4]   ;;  %s16238_s9 = sld [smem:[#allocation40_spill]] }
  0x19   :  { %s63_s4 = sshll.u32 %s14558_s7, 4  ;;  %s64_s4 = int_to_ptr.vmem [resolvable:$true] %s63_s4 }
  0x1e   :  { %s14166_s5 = scalar_lea.hbm %s16238_s9, 288 }
  0x1f   :  { %p14167_p0 = scmp.ne.s32.totalorder %s16238_s9, %s14166_s5  ;;  %p14170_p1 = scmp.lt.u32.totalorder %s14166_s5, %s16238_s9 }
  0x21   :  { %p14172_p2 = pnand %p14170_p1, %p14167_p0 }
  0x23   :  { %14175 = shalt.err (!%p14172_p2)
}
  0x24   :  { %s14176_s1 = scalar_lea.vmem %s64_s4, 288  ;;  %p14181_p4 = scmp.lt.s32.totalorder %s64_s4, %s64_s4 }
  0x25   :  { %p14177_p3 = scmp.ne.s32.totalorder %s64_s4, %s14176_s1  ;;  %p14182_p5 = scmp.lt.s32.totalorder %s14176_s1, %s14176_s1 }
  0x27   :  { %p14183_p6 = por %p14182_p5, %p14181_p4 }
  0x29   :  { %p14184_p7 = pnand %p14183_p6, %p14177_p3 }
  0x2b   :  { %14187 = shalt.err (!%p14184_p7)
}
  0x2c   :  { %s14559_s6 = smov 32   ;;  %s14560_s11 = smov 2  }
  0x2d   :  { %69 = dma.hbm_to_vmem [thread:$0]  %s16238_s9, 288, %s64_s4, [#allocation5], %s14559_s6, %s14559_s6, %s14560_s11  }
  0x2e   :  { %s14561_s7 = smov [#allocation7]   ;;  %s14562_s30 = smov [#allocation10]  }
  0x2f   :  { %s85_s8 = sshll.u32 %s14561_s7, 4  ;;  %s109_s5 = sshll.u32 %s14562_s30, 4  ;;  %s86_s8 = int_to_ptr.vmem [resolvable:$true] %s85_s8  ;;  %s110_s5 = int_to_ptr.vmem [resolvable:$true] %s109_s5 }
  0x30   :  { %s16239_s10 = sld [smem:[#allocation42_spill]] }
  0x36   :  { %s14188_s29 = scalar_lea.hbm %s16239_s10, 576 }
  0x37   :  { %p14189_p8 = scmp.ne.s32.totalorder %s16239_s10, %s14188_s29  ;;  %p14192_p9 = scmp.lt.u32.totalorder %s14188_s29, %s16239_s10 }
  0x39   :  { %p14194_p10 = pnand %p14192_p9, %p14189_p8 }
  0x3b   :  { %14197 = shalt.err (!%p14194_p10)
}
  0x3c   :  { %s14198_s4 = scalar_lea.vmem %s86_s8, 576  ;;  %p14203_p12 = scmp.lt.s32.totalorder %s86_s8, %s86_s8 }
  0x3d   :  { %p14199_p11 = scmp.ne.s32.totalorder %s86_s8, %s14198_s4  ;;  %p14204_p13 = scmp.lt.s32.totalorder %s14198_s4, %s14198_s4 }
  0x3f   :  { %p14205_p0 = por %p14204_p13, %p14203_p12 }
  0x41   :  { %p14206_p1 = pnand %p14205_p0, %p14199_p11 }
  0x43   :  { %14209 = shalt.err (!%p14206_p1)
}
  0x44   :  { %s14563_s9 = smov 64   ;;  %s14564_s6 = smov 4  }
  0x45   :  { %91 = dma.hbm_to_vmem [thread:$0]  %s16239_s10, 576, %s86_s8, [#allocation8], %s14563_s9, %s14563_s9, %s14564_s6  }
  0x46   :  { %s16240_s2 = sld [smem:[#allocation45_spill]] }
  0x4c   :  { %s14210_s3 = scalar_lea.hbm %s16240_s2, 256 }
  0x4d   :  { %p14211_p2 = scmp.ne.s32.totalorder %s16240_s2, %s14210_s3  ;;  %p14214_p3 = scmp.lt.u32.totalorder %s14210_s3, %s16240_s2 }
  0x4f   :  { %p14216_p4 = pnand %p14214_p3, %p14211_p2 }
  0x51   :  { %14219 = shalt.err (!%p14216_p4)
}
  0x52   :  { %s14220_s29 = scalar_lea.vmem %s110_s5, 256  ;;  %p14225_p6 = scmp.lt.s32.totalorder %s110_s5, %s110_s5 }
  0x53   :  { %p14221_p5 = scmp.ne.s32.totalorder %s110_s5, %s14220_s29  ;;  %p14226_p7 = scmp.lt.s32.totalorder %s14220_s29, %s14220_s29 }
  0x55   :  { %p14227_p8 = por %p14226_p7, %p14225_p6 }
  0x57   :  { %p14228_p9 = pnand %p14227_p8, %p14221_p5 }
  0x59   :  { %14231 = shalt.err (!%p14228_p9)
}
  0x5a   :  { %115 = dma.hbm_to_vmem [thread:$0]  %s16240_s2, 256, %s110_s5, [#allocation11], %s14563_s9, %s14563_s9, %s14564_s6  }
  0x5b   :  { %s14565_s1 = smov [#allocation13]   ;;  %s14566_s25 = smov [#allocation16]  }
  0x5c   :  { %s134_s4 = sshll.u32 %s14565_s1, 4  ;;  %s156_s11 = sshll.u32 %s14566_s25, 4  ;;  %s135_s4 = int_to_ptr.vmem [resolvable:$true] %s134_s4  ;;  %s157_s11 = int_to_ptr.vmem [resolvable:$true] %s156_s11 }
  0x5d   :  { %s16241_s3 = sld [smem:[#allocation47_spill]] }
  0x63   :  { %s14232_s7 = scalar_lea.hbm %s16241_s3, 16 }
  0x64   :  { %p14233_p10 = scmp.ne.s32.totalorder %s16241_s3, %s14232_s7  ;;  %p14236_p11 = scmp.lt.u32.totalorder %s14232_s7, %s16241_s3 }
  0x66   :  { %p14238_p12 = pnand %p14236_p11, %p14233_p10 }
  0x68   :  { %14241 = shalt.err (!%p14238_p12)
}
  0x69   :  { %s14242_s5 = scalar_lea.vmem %s135_s4, 16  ;;  %s14246_s2 = scalar_lea.vmem %s135_s4, 32 }
  0x6a   :  { %p14243_p13 = scmp.ne.s32.totalorder %s135_s4, %s14242_s5  ;;  %p14247_p0 = scmp.lt.s32.totalorder %s135_s4, %s135_s4 }
  0x6b   :  { %p14248_p1 = scmp.lt.s32.totalorder %s14246_s2, %s14242_s5 }
  0x6d   :  { %p14249_p2 = por %p14248_p1, %p14247_p0 }
  0x6f   :  { %p14250_p3 = pnand %p14249_p2, %p14243_p13 }
  0x71   :  { %14253 = shalt.err (!%p14250_p3)
}
  0x72   :  { %137 = dma.hbm_to_vmem [thread:$0]  %s16241_s3, 16, %s135_s4, [#allocation14]  }
  0x73   :  { %s14254_s20 = scalar_lea.hbm %s16194_s12, 16 }
  0x74   :  { %p14255_p4 = scmp.ne.s32.totalorder %s16194_s12, %s14254_s20  ;;  %p14258_p5 = scmp.lt.u32.totalorder %s14254_s20, %s16194_s12 }
  0x76   :  { %p14260_p6 = pnand %p14258_p5, %p14255_p4 }
  0x78   :  { %14263 = shalt.err (!%p14260_p6)
}
  0x79   :  { %s14264_s0 = scalar_lea.vmem %s157_s11, 16  ;;  %s14268_s29 = scalar_lea.vmem %s157_s11, 32 }
  0x7a   :  { %p14265_p7 = scmp.ne.s32.totalorder %s157_s11, %s14264_s0  ;;  %p14269_p8 = scmp.lt.s32.totalorder %s157_s11, %s157_s11 }
  0x7b   :  { %p14270_p9 = scmp.lt.s32.totalorder %s14268_s29, %s14264_s0 }
  0x7d   :  { %p14271_p10 = por %p14270_p9, %p14269_p8 }
  0x7f   :  { %p14272_p11 = pnand %p14271_p10, %p14265_p7 }
  0x81   :  { %14275 = shalt.err (!%p14272_p11)
}
  0x82   :  { %159 = dma.hbm_to_vmem [thread:$0]  %s16194_s12, 16, %s157_s11, [#allocation17]  }
  0x83   :  { %s14567_s5 = smov [#allocation19]   ;;  %s14568_s8 = smov [#allocation22]  }
  0x84   :  { %s177_s2 = sshll.u32 %s14567_s5, 4  ;;  %s207_s10 = sshll.u32 %s14568_s8, 4  ;;  %s178_s2 = int_to_ptr.vmem [resolvable:$true] %s177_s2  ;;  %s208_s10 = int_to_ptr.vmem [resolvable:$true] %s207_s10 }
  0x85   :  { %s14276_s20 = scalar_lea.hbm %s16196_s14, 256 }
  0x86   :  { %p14277_p12 = scmp.ne.s32.totalorder %s16196_s14, %s14276_s20  ;;  %p14280_p13 = scmp.lt.u32.totalorder %s14276_s20, %s16196_s14 }
  0x88   :  { %p14282_p0 = pnand %p14280_p13, %p14277_p12 }
  0x8a   :  { %14285 = shalt.err (!%p14282_p0)
}
  0x8b   :  { %s14286_s12 = scalar_lea.vmem %s178_s2, 256  ;;  %p14291_p2 = scmp.lt.s32.totalorder %s178_s2, %s178_s2 }
  0x8c   :  { %p14287_p1 = scmp.ne.s32.totalorder %s178_s2, %s14286_s12  ;;  %p14292_p3 = scmp.lt.s32.totalorder %s14286_s12, %s14286_s12 }
  0x8e   :  { %p14293_p4 = por %p14292_p3, %p14291_p2 }
  0x90   :  { %p14294_p5 = pnand %p14293_p4, %p14287_p1 }
  0x92   :  { %14297 = shalt.err (!%p14294_p5)
}
  0x93   :  { %183 = dma.hbm_to_vmem [thread:$0]  %s16196_s14, 256, %s178_s2, [#allocation20], %s14563_s9, %s14563_s9, %s14564_s6  }
  0x94   :  { %s14298_s3 = scalar_lea.hbm %s16201_s19, 9216 }
  0x95   :  { %p14299_p6 = scmp.ne.s32.totalorder %s16201_s19, %s14298_s3  ;;  %p14302_p7 = scmp.lt.u32.totalorder %s14298_s3, %s16201_s19 }
  0x97   :  { %p14304_p8 = pnand %p14302_p7, %p14299_p6 }
  0x99   :  { %14307 = shalt.err (!%p14304_p8)
}
  0x9a   :  { %s14308_s20 = scalar_lea.vmem %s208_s10, 9216  ;;  %p14313_p10 = scmp.lt.s32.totalorder %s208_s10, %s208_s10 }
  0x9b   :  { %p14309_p9 = scmp.ne.s32.totalorder %s208_s10, %s14308_s20  ;;  %p14314_p11 = scmp.lt.s32.totalorder %s14308_s20, %s14308_s20 }
  0x9d   :  { %p14315_p12 = por %p14314_p11, %p14313_p10 }
  0x9f   :  { %p14316_p13 = pnand %p14315_p12, %p14309_p9 }
  0xa1   :  { %14319 = shalt.err (!%p14316_p13)
}
  0xa2   :  { %213 = dma.hbm_to_vmem [thread:$0]  %s16201_s19, 9216, %s208_s10, [#allocation23], %s14563_s9, %s14563_s9, %s14564_s6  }
  0xa3   :  { %s14569_s21 = smov [#allocation25]   ;;  %s14570_s30 = smov [#allocation2]  }
  0xa4   :  { %s235_s7 = sshll.u32 %s14569_s21, 4  ;;  %s51_s28 = sshll.u32 %s14570_s30, 4  ;;  %s236_s7 = int_to_ptr.vmem [resolvable:$true] %s235_s7  ;;  %s52_s28 = int_to_ptr.vmem [resolvable:$true] %s51_s28 }
  0xa5   :  { %s14320_s0 = scalar_lea.hbm %s16205_s23, 1152 }
  0xa6   :  { %p14321_p0 = scmp.ne.s32.totalorder %s16205_s23, %s14320_s0  ;;  %p14324_p1 = scmp.lt.u32.totalorder %s14320_s0, %s16205_s23 }
  0xa8   :  { %p14326_p2 = pnand %p14324_p1, %p14321_p0 }
  0xaa   :  { %14329 = shalt.err (!%p14326_p2)
}
  0xab   :  { %s14330_s19 = scalar_lea.vmem %s236_s7, 1152  ;;  %p14335_p4 = scmp.lt.s32.totalorder %s236_s7, %s236_s7 }
  0xac   :  { %p14331_p3 = scmp.ne.s32.totalorder %s236_s7, %s14330_s19  ;;  %p14336_p5 = scmp.lt.s32.totalorder %s14330_s19, %s14330_s19 }
  0xae   :  { %p14337_p6 = por %p14336_p5, %p14335_p4 }
  0xb0   :  { %p14338_p7 = pnand %p14337_p6, %p14331_p3 }
  0xb2   :  { %14341 = shalt.err (!%p14338_p7)
}
  0xb3   :  { %241 = dma.hbm_to_vmem [thread:$0]  %s16205_s23, 1152, %s236_s7, [#allocation26], %s14563_s9, %s14563_s9, %s14564_s6  }
  0xb4   :  { %s16242_s20 = sld [smem:[#allocation39_spill]] }
  0xba   :  { %s14342_s14 = scalar_lea.hbm %s16242_s20, 2304 }
  0xbb   :  { %p14343_p8 = scmp.ne.s32.totalorder %s16242_s20, %s14342_s14  ;;  %p14346_p9 = scmp.lt.u32.totalorder %s14342_s14, %s16242_s20 }
  0xbd   :  { %p14348_p10 = pnand %p14346_p9, %p14343_p8 }
  0xbf   :  { %14351 = shalt.err (!%p14348_p10)
}
  0xc0   :  { %s14352_s11 = scalar_lea.vmem %s52_s28, 2304  ;;  %p14357_p12 = scmp.lt.s32.totalorder %s52_s28, %s52_s28 }
  0xc1   :  { %p14353_p11 = scmp.ne.s32.totalorder %s52_s28, %s14352_s11  ;;  %p14358_p13 = scmp.lt.s32.totalorder %s14352_s11, %s14352_s11 }
  0xc3   :  { %p14359_p0 = por %p14358_p13, %p14357_p12 }
  0xc5   :  { %p14360_p1 = pnand %p14359_p0, %p14353_p11 }
  0xc7   :  { %14363 = shalt.err (!%p14360_p1)
}
  0xc8   :  { %57 = dma.hbm_to_vmem [thread:$0]  %s16242_s20, 2304, %s52_s28, [#allocation3], %s14563_s9, %s14563_s9, %s14564_s6  }
  0xc9   :  { %s14571_s0 = smov [#allocation6]   ;;  %s14572_s4 = smov [#allocation9]  }
  0xca   :  { %s76_s29 = sshll.u32 %s14571_s0, 4  ;;  %s100_s3 = sshll.u32 %s14572_s4, 4  ;;  %s77_s29 = int_to_ptr.vmem [resolvable:$true] %s76_s29  ;;  %s101_s3 = int_to_ptr.vmem [resolvable:$true] %s100_s3 }
  0xcb   :  { %s16243_s10 = sld [smem:[#allocation41_spill]] }
  0xd1   :  { %s14364_s8 = scalar_lea.hbm %s16243_s10, 16 }
  0xd2   :  { %p14365_p2 = scmp.ne.s32.totalorder %s16243_s10, %s14364_s8  ;;  %p14368_p3 = scmp.lt.u32.totalorder %s14364_s8, %s16243_s10 }
  0xd4   :  { %p14370_p4 = pnand %p14368_p3, %p14365_p2 }
  0xd6   :  { %14373 = shalt.err (!%p14370_p4)
}
  0xd7   :  { %s14374_s28 = scalar_lea.vmem %s77_s29, 16  ;;  %s14378_s20 = scalar_lea.vmem %s77_s29, 32 }
  0xd8   :  { %p14375_p5 = scmp.ne.s32.totalorder %s77_s29, %s14374_s28  ;;  %p14379_p6 = scmp.lt.s32.totalorder %s77_s29, %s77_s29 }
  0xd9   :  { %p14380_p7 = scmp.lt.s32.totalorder %s14378_s20, %s14374_s28 }
  0xdb   :  { %p14381_p8 = por %p14380_p7, %p14379_p6 }
  0xdd   :  { %p14382_p9 = pnand %p14381_p8, %p14375_p5 }
  0xdf   :  { %14385 = shalt.err (!%p14382_p9)
}
  0xe0   :  { %79 = dma.hbm_to_vmem [thread:$0]  %s16243_s10, 16, %s77_s29, [#allocation5]  }
  0xe1   :  { %s16244_s23 = sld [smem:[#allocation44_spill]] }
  0xe7   :  { %s14386_s7 = scalar_lea.hbm %s16244_s23, 16 }
  0xe8   :  { %p14387_p10 = scmp.ne.s32.totalorder %s16244_s23, %s14386_s7  ;;  %p14390_p11 = scmp.lt.u32.totalorder %s14386_s7, %s16244_s23 }
  0xea   :  { %p14392_p12 = pnand %p14390_p11, %p14387_p10 }
  0xec   :  { %14395 = shalt.err (!%p14392_p12)
}
  0xed   :  { %s14396_s8 = scalar_lea.vmem %s101_s3, 16  ;;  %s14400_s1 = scalar_lea.vmem %s101_s3, 32 }
  0xee   :  { %p14397_p13 = scmp.ne.s32.totalorder %s101_s3, %s14396_s8  ;;  %p14401_p0 = scmp.lt.s32.totalorder %s101_s3, %s101_s3 }
  0xef   :  { %p14402_p1 = scmp.lt.s32.totalorder %s14400_s1, %s14396_s8 }
  0xf1   :  { %p14403_p2 = por %p14402_p1, %p14401_p0 }
  0xf3   :  { %p14404_p3 = pnand %p14403_p2, %p14397_p13 }
  0xf5   :  { %14407 = shalt.err (!%p14404_p3)
}
  0xf6   :  { %103 = dma.hbm_to_vmem [thread:$0]  %s16244_s23, 16, %s101_s3, [#allocation8]  }
  0xf7   :  { %s14573_s25 = smov [#allocation12]   ;;  %s14574_s2 = smov [#allocation15]  }
  0xf8   :  { %s121_s14 = sshll.u32 %s14573_s25, 4  ;;  %s143_s28 = sshll.u32 %s14574_s2, 4  ;;  %s122_s14 = int_to_ptr.vmem [resolvable:$true] %s121_s14  ;;  %s144_s28 = int_to_ptr.vmem [resolvable:$true] %s143_s28 }
  0xf9   :  { %s16245_s30 = sld [smem:[#allocation46_spill]] }
  0xff   :  { %s14408_s12 = scalar_lea.hbm %s16245_s30, 1024 }
 0x100   :  { %p14409_p4 = scmp.ne.s32.totalorder %s16245_s30, %s14408_s12  ;;  %p14412_p5 = scmp.lt.u32.totalorder %s14408_s12, %s16245_s30 }
 0x102   :  { %p14414_p6 = pnand %p14412_p5, %p14409_p4 }
 0x104   :  { %14417 = shalt.err (!%p14414_p6)
}
 0x105   :  { %s14418_s3 = scalar_lea.vmem %s122_s14, 1024  ;;  %p14423_p8 = scmp.lt.s32.totalorder %s122_s14, %s122_s14 }
 0x106   :  { %p14419_p7 = scmp.ne.s32.totalorder %s122_s14, %s14418_s3  ;;  %p14424_p9 = scmp.lt.s32.totalorder %s14418_s3, %s14418_s3 }
 0x108   :  { %p14425_p10 = por %p14424_p9, %p14423_p8 }
 0x10a   :  { %p14426_p11 = pnand %p14425_p10, %p14419_p7 }
 0x10c   :  { %14429 = shalt.err (!%p14426_p11)
}
 0x10d   :  { %127 = dma.hbm_to_vmem [thread:$0]  %s16245_s30, 1024, %s122_s14, [#allocation11], %s14563_s9, %s14563_s9, %s14564_s6  }
 0x10e   :  { %s16246_s1 = sld [smem:[#allocation48_spill]] }
 0x114   :  { %s14430_s29 = scalar_lea.hbm %s16246_s1, 1024 }
 0x115   :  { %p14431_p12 = scmp.ne.s32.totalorder %s16246_s1, %s14430_s29  ;;  %p14434_p13 = scmp.lt.u32.totalorder %s14430_s29, %s16246_s1 }
 0x117   :  { %p14436_p0 = pnand %p14434_p13, %p14431_p12 }
 0x119   :  { %14439 = shalt.err (!%p14436_p0)
}
 0x11a   :  { %s14440_s21 = scalar_lea.vmem %s144_s28, 1024  ;;  %p14445_p2 = scmp.lt.s32.totalorder %s144_s28, %s144_s28 }
 0x11b   :  { %p14441_p1 = scmp.ne.s32.totalorder %s144_s28, %s14440_s21  ;;  %p14446_p3 = scmp.lt.s32.totalorder %s14440_s21, %s14440_s21 }
 0x11d   :  { %p14447_p4 = por %p14446_p3, %p14445_p2 }
 0x11f   :  { %p14448_p5 = pnand %p14447_p4, %p14441_p1 }
 0x121   :  { %14451 = shalt.err (!%p14448_p5)
}
 0x122   :  { %149 = dma.hbm_to_vmem [thread:$0]  %s16246_s1, 1024, %s144_s28, [#allocation14], %s14563_s9, %s14563_s9, %s14564_s6  }
 0x123   :  { %s14575_s12 = smov [#allocation18]   ;;  %s14576_s7 = smov [#allocation21]  }
 0x124   :  { %s165_s11 = sshll.u32 %s14575_s12, 4  ;;  %s193_s0 = sshll.u32 %s14576_s7, 4  ;;  %s166_s11 = int_to_ptr.vmem [resolvable:$true] %s165_s11  ;;  %s194_s0 = int_to_ptr.vmem [resolvable:$true] %s193_s0 }
 0x125   :  { %s14452_s23 = scalar_lea.hbm %s16195_s13, 256 }
 0x126   :  { %p14453_p6 = scmp.ne.s32.totalorder %s16195_s13, %s14452_s23  ;;  %p14456_p7 = scmp.lt.u32.totalorder %s14452_s23, %s16195_s13 }
 0x128   :  { %p14458_p8 = pnand %p14456_p7, %p14453_p6 }
 0x12a   :  { %14461 = shalt.err (!%p14458_p8)
}
 0x12b   :  { %s14462_s28 = scalar_lea.vmem %s166_s11, 256  ;;  %p14467_p10 = scmp.lt.s32.totalorder %s166_s11, %s166_s11 }
 0x12c   :  { %p14463_p9 = scmp.ne.s32.totalorder %s166_s11, %s14462_s28  ;;  %p14468_p11 = scmp.lt.s32.totalorder %s14462_s28, %s14462_s28 }
 0x12e   :  { %p14469_p12 = por %p14468_p11, %p14467_p10 }
 0x130   :  { %p14470_p13 = pnand %p14469_p12, %p14463_p9 }
 0x132   :  { %14473 = shalt.err (!%p14470_p13)
}
 0x133   :  { %171 = dma.hbm_to_vmem [thread:$0]  %s16195_s13, 256, %s166_s11, [#allocation17], %s14563_s9, %s14563_s9, %s14564_s6  }
 0x134   :  { %s14474_s20 = scalar_lea.hbm %s16199_s17, 2304 }
 0x135   :  { %p14475_p0 = scmp.ne.s32.totalorder %s16199_s17, %s14474_s20  ;;  %p14478_p1 = scmp.lt.u32.totalorder %s14474_s20, %s16199_s17 }
 0x137   :  { %p14480_p2 = pnand %p14478_p1, %p14475_p0 }
 0x139   :  { %14483 = shalt.err (!%p14480_p2)
}
 0x13a   :  { %s14484_s7 = scalar_lea.vmem %s194_s0, 2304  ;;  %p14489_p4 = scmp.lt.s32.totalorder %s194_s0, %s194_s0 }
 0x13b   :  { %p14485_p3 = scmp.ne.s32.totalorder %s194_s0, %s14484_s7  ;;  %p14490_p5 = scmp.lt.s32.totalorder %s14484_s7, %s14484_s7 }
 0x13d   :  { %p14491_p6 = por %p14490_p5, %p14489_p4 }
 0x13f   :  { %p14492_p7 = pnand %p14491_p6, %p14485_p3 }
 0x141   :  { %14495 = shalt.err (!%p14492_p7)
}
 0x142   :  { %199 = dma.hbm_to_vmem [thread:$0]  %s16199_s17, 2304, %s194_s0, [#allocation20], %s14563_s9, %s14563_s9, %s14564_s6  }
 0x143   :  { %s14577_s4 = smov [#allocation24]   ;;  %s14578_s23 = smov [#allocation27]  }
 0x144   :  { %s223_s3 = sshll.u32 %s14577_s4, 4  ;;  %s248_s5 = sshll.u32 %s14578_s23, 4  ;;  %s224_s3 = int_to_ptr.vmem [resolvable:$true] %s223_s3  ;;  %s249_s5 = int_to_ptr.vmem [resolvable:$true] %s248_s5 }
 0x145   :  { %s14496_s29 = scalar_lea.hbm %s16204_s22, 9216 }
 0x146   :  { %p14497_p8 = scmp.ne.s32.totalorder %s16204_s22, %s14496_s29  ;;  %p14500_p9 = scmp.lt.u32.totalorder %s14496_s29, %s16204_s22 }
 0x148   :  { %p14502_p10 = pnand %p14500_p9, %p14497_p8 }
 0x14a   :  { %14505 = shalt.err (!%p14502_p10)
}
 0x14b   :  { %s14506_s17 = scalar_lea.vmem %s224_s3, 9216  ;;  %p14511_p12 = scmp.lt.s32.totalorder %s224_s3, %s224_s3 }
 0x14c   :  { %p14507_p11 = scmp.ne.s32.totalorder %s224_s3, %s14506_s17  ;;  %p14512_p13 = scmp.lt.s32.totalorder %s14506_s17, %s14506_s17 }
 0x14e   :  { %p14513_p0 = por %p14512_p13, %p14511_p12 }
 0x150   :  { %p14514_p1 = pnand %p14513_p0, %p14507_p11 }
 0x152   :  { %14517 = shalt.err (!%p14514_p1)
}
 0x153   :  { %229 = dma.hbm_to_vmem [thread:$0]  %s16204_s22, 9216, %s224_s3, [#allocation23], %s14563_s9, %s14563_s9, %s14564_s6  }
 0x154   :  { %s14518_s14 = scalar_lea.hbm %s16206_s24, 16 }
 0x155   :  { %p14519_p2 = scmp.ne.s32.totalorder %s16206_s24, %s14518_s14  ;;  %p14522_p3 = scmp.lt.u32.totalorder %s14518_s14, %s16206_s24 }
 0x157   :  { %p14524_p4 = pnand %p14522_p3, %p14519_p2 }
 0x159   :  { %14527 = shalt.err (!%p14524_p4)
}
 0x15a   :  { %s14528_s11 = scalar_lea.vmem %s249_s5, 16  ;;  %s14532_s4 = scalar_lea.vmem %s249_s5, 32 }
 0x15b   :  { %p14529_p5 = scmp.ne.s32.totalorder %s249_s5, %s14528_s11  ;;  %p14533_p6 = scmp.lt.s32.totalorder %s249_s5, %s249_s5 }
 0x15c   :  { %p14534_p7 = scmp.lt.s32.totalorder %s14532_s4, %s14528_s11 }
 0x15e   :  { %p14535_p8 = por %p14534_p7, %p14533_p6 }
 0x160   :  { %p14536_p9 = pnand %p14535_p8, %p14529_p5 }
 0x162   :  { %14539 = shalt.err (!%p14536_p9)
}
 0x163   :  { %251 = dma.hbm_to_vmem [thread:$0]  %s16206_s24, 16, %s249_s5, [#allocation26]  }
 0x164   :  { %14540 = dma.done.wait [#allocation3], 2304  }
 0x165   :  { %14541 = vsyncadd [#allocation3], 4294964992 }
 0x166   :  { %14542 = dma.done.wait [#allocation5], 304  }
 0x167   :  { %14543 = vsyncadd [#allocation5], 4294966992 }
 0x168   :  { %14544 = dma.done.wait [#allocation8], 592  }
 0x169   :  { %14545 = vsyncadd [#allocation8], 4294966704 }
 0x16a   :  { %14546 = dma.done.wait [#allocation11], 1280  }
 0x16b   :  { %14547 = vsyncadd [#allocation11], 4294966016 }
 0x16c   :  { %14548 = dma.done.wait [#allocation14], 1040  }
 0x16d   :  { %14549 = vsyncadd [#allocation14], 4294966256 }
 0x16e   :  { %14550 = dma.done.wait [#allocation17], 272  }
 0x16f   :  { %14551 = vsyncadd [#allocation17], 4294967024 }
 0x170   :  { %14552 = dma.done.wait [#allocation20], 2560  }
 0x171   :  { %14553 = vsyncadd [#allocation20], 4294964736 }
 0x172   :  { %14554 = dma.done.wait [#allocation23], 18432  }
 0x173   :  { %14555 = vsyncadd [#allocation23], 4294948864 }
 0x174   :  { %14556 = dma.done.wait [#allocation26], 1168  }
 0x175   :  { %14557 = vsyncadd [#allocation26], 4294966128  ;;  %s16247_s3 = sld [smem:[#allocation37_spill]]  ;;  %v13883_v4 = vld [vmem:[#allocation2] sm:$0xff]   ;;  %v13884_v9 = vld [vmem:[#allocation2 + $0x8] sm:$0xff]   ;;  %vm514_vm0 = vcmask 1040384  }
 0x176   :  { %12124 = vmatprep.mubr.bf16.mxu1 %v13883_v4  ;;  %v13885_v10 = vld [vmem:[#allocation2 + $0x10] sm:$0xff]   ;;  %v13886_v11 = vld [vmem:[#allocation2 + $0x18] sm:$0xff]   ;;  %v13887_v12 = vld [vmem:[#allocation2 + $0x20] sm:$0xff]   ;;  %vm515_vm1 = vcmask 1041408   ;;  %v14579_v14 = vmov 65535   ;;  %vm507_vm2 = vcmask 23552  }
 0x177   :  { %v13888_v13 = vld [vmem:[#allocation2 + $0x28] sm:$0xff]   ;;  %v516_v15 = vsel %vm514_vm0, 4294967295, %v14579_v14  ;;  %v506_v16 = vld [vmem:[#allocation4 + $0x2] sm:$0x3]  ;;  %v436_v19 = vld [vmem:[#allocation4] sm:$0x3] }
 0x178   :  { %v15054_v17 = vsel %vm515_vm1, %v516_v15, 0  ;;  %v13889_v21 = vld [vmem:[#allocation2 + $0x40] sm:$0xff]   ;;  %v13890_v22 = vld [vmem:[#allocation2 + $0x48] sm:$0xff]   ;;  %v13893_v27 = vld [vmem:[#allocation2 + $0x50] sm:$0xff]   ;;  %vm14581_vm3 = vmmov 0   ;;  %vm1578_vm8 = vcmask 261120  }
 0x179   :  { %v519_v18 = vand.u32 %v15054_v17, %v506_v16  ;;  %v15058_v20 = vand.u32 %v15054_v17, %v436_v19  ;;  %v13894_v32 = vld [vmem:[#allocation2 + $0x58] sm:$0xff]   ;;  %v697_v42 = vld [vmem:[#allocation4 + $0x4] sm:$0x3]  ;;  %v829_v61 = vld [vmem:[#allocation4 + $0x6] sm:$0x3]  ;;  %s16248_s1 = sld [smem:[#allocation43_spill]] }
 0x17a   :  { %v705_v46 = vand.u32 %v697_v42, %v15054_v17  ;;  %v13891_v53 = vld [vmem:[#allocation2 + $0x30] sm:$0xff]   ;;  %v13892_v54 = vld [vmem:[#allocation2 + $0x38] sm:$0xff]   ;;  %v837_v62 = vand.u32 %v829_v61, %v15054_v17  ;;  %v13896_v19 = vld [vmem:[#allocation2 + $0x68] sm:$0xff]   ;;  %vm1680_vm9 = vcmask 130048   ;;  %vm2482_vm11 = vcmask 1043456   ;;  %s16249_s29 = sld [smem:[#allocation38_spill]] }
 0x17b   :  { %v14962_v0 = vld [vmem:[%s16247_s3] sm:$0xff]   ;;  %v14967_v1 = vld [vmem:[%s16247_s3 + $0x8] sm:$0xff]   ;;  %v14975_v2 = vld [vmem:[%s16247_s3 + $0x10] sm:$0xff]   ;;  %12148 = vmatprep.subr.bf16.mxu0 %v519_v18  ;;  %vm2478_vm12 = vcmask 64512   ;;  %s16250_s20 = sld [smem:[#allocation49_spill]] }
 0x17c   :  { %12108 = vmatprep.subr.bf16.mxu1 %v14962_v0  ;;  %v14981_v3 = vld [vmem:[%s16247_s3 + $0x18] sm:$0xff]   ;;  %v14989_v5 = vld [vmem:[%s16247_s3 + $0x20] sm:$0xff]   ;;  %v14994_v6 = vld [vmem:[%s16247_s3 + $0x28] sm:$0xff]   ;;  %12149 = vmatpush3.bf16.msra.mxu0 %v519_v18 }
 0x17d   :  { %12109 = vmatpush3.bf16.msra.mxu1 %v14962_v0  ;;  %v15001_v7 = vld [vmem:[%s16247_s3 + $0x30] sm:$0xff]   ;;  %v13882_v8 = vld [vmem:[%s16247_s3 + $0x38] sm:$0xff]   ;;  %12154 = vmatprep.subr.bf16.mxu0 %v15058_v20  ;;  %v15064_v23 = vld [vmem:[%s16247_s3] sm:$0xff]  }
 0x17e   :  { %12110 = vmatprep.subr.bf16.mxu1 %v14967_v1  ;;  %v15070_v24 = vld [vmem:[%s16247_s3 + $0x8] sm:$0xff]   ;;  %v15077_v25 = vld [vmem:[%s16247_s3 + $0x10] sm:$0xff]   ;;  %v15084_v26 = vld [vmem:[%s16247_s3 + $0x18] sm:$0xff]  }
 0x17f   :  { %v15091_v28 = vld [vmem:[%s16247_s3 + $0x20] sm:$0xff]   ;;  %v15098_v29 = vld [vmem:[%s16247_s3 + $0x28] sm:$0xff]   ;;  %v15105_v30 = vld [vmem:[%s16247_s3 + $0x30] sm:$0xff]  }
 0x180   :  { %v15112_v31 = vld [vmem:[%s16247_s3 + $0x38] sm:$0xff]   ;;  %v13895_v18 = vld [vmem:[#allocation2 + $0x60] sm:$0xff]  }
 0x181   :  { %12111 = vmatpush3.bf16.msra.mxu1 %v14967_v1  ;;  %v961_v63 = vld [vmem:[#allocation4 + $0x8] sm:$0x3] }
 0x182   :  { %12112 = vmatprep.subr.bf16.mxu1 %v14975_v2 }
 0x185   :  { %12113 = vmatpush3.bf16.msra.mxu1 %v14975_v2 }
 0x186   :  { %12114 = vmatprep.subr.bf16.mxu1 %v14981_v3 }
 0x189   :  { %12115 = vmatpush3.bf16.msra.mxu1 %v14981_v3 }
 0x18a   :  { %12116 = vmatprep.subr.bf16.mxu1 %v14989_v5 }
 0x18d   :  { %12117 = vmatpush3.bf16.msra.mxu1 %v14989_v5 }
 0x18e   :  { %12118 = vmatprep.subr.bf16.mxu1 %v14994_v6 }
 0x191   :  { %12119 = vmatpush3.bf16.msra.mxu1 %v14994_v6 }
 0x192   :  { %12120 = vmatprep.subr.bf16.mxu1 %v15001_v7 }
 0x195   :  { %12121 = vmatpush3.bf16.msra.mxu1 %v15001_v7 }
 0x196   :  { %12122 = vmatprep.subr.bf16.mxu1 %v13882_v8 }
 0x199   :  { %12123 = vmatpush3.bf16.msra.mxu1 %v13882_v8 }
 0x19a   :  { %12128 = vmatprep.subr.bf16.mxu1 %v14962_v0 }
 0x19c   :  { %12125 = vmatmul.mubr.bf16.vlgmr.msra.gmra.mrb[0].mxu1 %v13884_v9 }
 0x19d   :  { %12129 = vmatpush3.bf16.msra.mxu1 %v14962_v0  ;;  %12144 = vmatprep.mubr.bf16.mxu1 %v13885_v10 }
 0x19e   :  { %12130 = vmatprep.subr.bf16.mxu1 %v14967_v1 }
 0x1a1   :  { %12131 = vmatpush3.bf16.msra.mxu1 %v14967_v1 }
 0x1a2   :  { %12132 = vmatprep.subr.bf16.mxu1 %v14975_v2 }
 0x1a5   :  { %12133 = vmatpush3.bf16.msra.mxu1 %v14975_v2 }
 0x1a6   :  { %12134 = vmatprep.subr.bf16.mxu1 %v14981_v3 }
 0x1a9   :  { %12135 = vmatpush3.bf16.msra.mxu1 %v14981_v3 }
 0x1aa   :  { %12136 = vmatprep.subr.bf16.mxu1 %v14989_v5 }
 0x1ad   :  { %12137 = vmatpush3.bf16.msra.mxu1 %v14989_v5 }
 0x1ae   :  { %12138 = vmatprep.subr.bf16.mxu1 %v14994_v6 }
 0x1b1   :  { %12139 = vmatpush3.bf16.msra.mxu1 %v14994_v6 }
 0x1b2   :  { %12140 = vmatprep.subr.bf16.mxu1 %v15001_v7 }
 0x1b5   :  { %12141 = vmatpush3.bf16.msra.mxu1 %v15001_v7 }
 0x1b6   :  { %12142 = vmatprep.subr.bf16.mxu1 %v13882_v8 }
 0x1b9   :  { %12143 = vmatpush3.bf16.msra.mxu1 %v13882_v8 }
 0x1ba   :  { %12160 = vmatprep.subr.bf16.mxu1 %v14962_v0 }
 0x1bc   :  { %12145 = vmatmul.mubr.bf16.vlgmr.msra.gmra.mrb[4].mxu1 %v13886_v11 }
 0x1bd   :  { %12161 = vmatpush3.bf16.msra.mxu1 %v14962_v0  ;;  %12176 = vmatprep.mubr.bf16.mxu1 %v13887_v12  ;;  %v1093_v12 = vld [vmem:[#allocation4 + $0xa] sm:$0x3] }
 0x1be   :  { %12162 = vmatprep.subr.bf16.mxu1 %v14967_v1  ;;  %v1101_v16 = vand.u32 %v1093_v12, %v15054_v17 }
 0x1c1   :  { %12163 = vmatpush3.bf16.msra.mxu1 %v14967_v1 }
 0x1c2   :  { %12164 = vmatprep.subr.bf16.mxu1 %v14975_v2 }
 0x1c5   :  { %12165 = vmatpush3.bf16.msra.mxu1 %v14975_v2 }
 0x1c6   :  { %12166 = vmatprep.subr.bf16.mxu1 %v14981_v3 }
 0x1c9   :  { %12167 = vmatpush3.bf16.msra.mxu1 %v14981_v3 }
 0x1ca   :  { %12168 = vmatprep.subr.bf16.mxu1 %v14989_v5 }
 0x1cd   :  { %12169 = vmatpush3.bf16.msra.mxu1 %v14989_v5 }
 0x1ce   :  { %12170 = vmatprep.subr.bf16.mxu1 %v14994_v6 }
 0x1d1   :  { %12171 = vmatpush3.bf16.msra.mxu1 %v14994_v6 }
 0x1d2   :  { %12172 = vmatprep.subr.bf16.mxu1 %v15001_v7 }
 0x1d5   :  { %12173 = vmatpush3.bf16.msra.mxu1 %v15001_v7 }
 0x1d6   :  { %12174 = vmatprep.subr.bf16.mxu1 %v13882_v8 }
 0x1d9   :  { %12175 = vmatpush3.bf16.msra.mxu1 %v13882_v8 }
 0x1da   :  { %12212 = vmatprep.subr.bf16.mxu1 %v14962_v0 }
 0x1dc   :  { %12177 = vmatmul.mubr.bf16.vlgmr.msra.gmra.mrb[8].mxu1 %v13888_v13 }
 0x1dd   :  { %12213 = vmatpush3.bf16.msra.mxu1 %v14962_v0  ;;  %12228 = vmatprep.mubr.bf16.mxu1 %v13889_v21 }
 0x1de   :  { %12214 = vmatprep.subr.bf16.mxu1 %v14967_v1 }
 0x1e1   :  { %12215 = vmatpush3.bf16.msra.mxu1 %v14967_v1 }
 0x1e2   :  { %12216 = vmatprep.subr.bf16.mxu1 %v14975_v2 }
 0x1e5   :  { %12217 = vmatpush3.bf16.msra.mxu1 %v14975_v2 }
 0x1e6   :  { %12218 = vmatprep.subr.bf16.mxu1 %v14981_v3 }
 0x1e9   :  { %12219 = vmatpush3.bf16.msra.mxu1 %v14981_v3 }
 0x1ea   :  { %12220 = vmatprep.subr.bf16.mxu1 %v14989_v5 }
 0x1ed   :  { %12221 = vmatpush3.bf16.msra.mxu1 %v14989_v5 }
 0x1ee   :  { %12222 = vmatprep.subr.bf16.mxu1 %v14994_v6 }
 0x1f1   :  { %12223 = vmatpush3.bf16.msra.mxu1 %v14994_v6 }
 0x1f2   :  { %12224 = vmatprep.subr.bf16.mxu1 %v15001_v7 }
 0x1f5   :  { %12225 = vmatpush3.bf16.msra.mxu1 %v15001_v7  ;;  %v13897_v7 = vld [vmem:[#allocation2 + $0x70] sm:$0xff]  }
 0x1f6   :  { %12226 = vmatprep.subr.bf16.mxu1 %v13882_v8 }
 0x1f9   :  { %12227 = vmatpush3.bf16.msra.mxu1 %v13882_v8  ;;  %v13898_v8 = vld [vmem:[#allocation2 + $0x78] sm:$0xff]  }
 0x1fa   :  { %12238 = vmatprep.subr.bf16.mxu1 %v14962_v0  ;;  %v969_v0 = vand.u32 %v961_v63, %v15054_v17 }
 0x1fc   :  { %12229 = vmatmul.mubr.bf16.vlgmr.msra.gmra.mrb[12].mxu1 %v13890_v22 }
 0x1fd   :  { %12239 = vmatpush3.bf16.msra.mxu1 %v15064_v23  ;;  %12254 = vmatprep.mubr.bf16.mxu1 %v13893_v27  ;;  %v1357_v27 = vld [vmem:[#allocation4 + $0xe] sm:$0x3] }
 0x1fe   :  { %12240 = vmatprep.subr.bf16.mxu1 %v15070_v24 }
 0x201   :  { %12241 = vmatpush3.bf16.msra.mxu1 %v15070_v24 }
 0x202   :  { %12242 = vmatprep.subr.bf16.mxu1 %v15077_v25 }
 0x205   :  { %12243 = vmatpush3.bf16.msra.mxu1 %v15077_v25 }
 0x206   :  { %12244 = vmatprep.subr.bf16.mxu1 %v15084_v26 }
 0x209   :  { %12245 = vmatpush3.bf16.msra.mxu1 %v15084_v26 }
 0x20a   :  { %12246 = vmatprep.subr.bf16.mxu1 %v15091_v28 }
 0x20d   :  { %12247 = vmatpush3.bf16.msra.mxu1 %v15091_v28 }
 0x20e   :  { %12248 = vmatprep.subr.bf16.mxu1 %v15098_v29 }
 0x211   :  { %12249 = vmatpush3.bf16.msra.mxu1 %v15098_v29 }
 0x212   :  { %12250 = vmatprep.subr.bf16.mxu1 %v15105_v30 }
 0x215   :  { %12251 = vmatpush3.bf16.msra.mxu1 %v15105_v30 }
 0x216   :  { %12252 = vmatprep.subr.bf16.mxu1 %v15112_v31 }
 0x219   :  { %12253 = vmatpush3.bf16.msra.mxu1 %v15112_v31 }
 0x21a   :  { %12290 = vmatprep.subr.bf16.mxu1 %v15064_v23 }
 0x21c   :  { %12255 = vmatmul.mubr.bf16.vlgmr.msra.gmra.mrb[16].mxu1 %v13894_v32 }
 0x21d   :  { %12291 = vmatpush3.bf16.msra.mxu1 %v15064_v23  ;;  %12306 = vmatprep.mubr.bf16.mxu1 %v13897_v7 }
 0x21e   :  { %12292 = vmatprep.subr.bf16.mxu1 %v15070_v24 }
 0x221   :  { %12293 = vmatpush3.bf16.msra.mxu1 %v15070_v24 }
 0x222   :  { %12294 = vmatprep.subr.bf16.mxu1 %v15077_v25 }
 0x225   :  { %12295 = vmatpush3.bf16.msra.mxu1 %v15077_v25 }
 0x226   :  { %12296 = vmatprep.subr.bf16.mxu1 %v15084_v26 }
 0x229   :  { %12297 = vmatpush3.bf16.msra.mxu1 %v15084_v26 }
 0x22a   :  { %12298 = vmatprep.subr.bf16.mxu1 %v15091_v28 }
 0x22d   :  { %12299 = vmatpush3.bf16.msra.mxu1 %v15091_v28 }
 0x22e   :  { %12300 = vmatprep.subr.bf16.mxu1 %v15098_v29 }
 0x231   :  { %12301 = vmatpush3.bf16.msra.mxu1 %v15098_v29 }
 0x232   :  { %12302 = vmatprep.subr.bf16.mxu1 %v15105_v30 }
 0x235   :  { %12303 = vmatpush3.bf16.msra.mxu1 %v15105_v30 }
 0x236   :  { %12304 = vmatprep.subr.bf16.mxu1 %v15112_v31 }
 0x239   :  { %12305 = vmatpush3.bf16.msra.mxu1 %v15112_v31 }
 0x23c   :  { %12307 = vmatmul.mubr.bf16.vlgmr.msra.gmra.mrb[20].mxu1 %v13898_v8 }
 0x26f   :  { %v12126_v33 = vpop.f32.mrb[0].mxu1 }
 0x270   :  { %v419_v34 = vpop.f32.mrb[1].mxu1 }
 0x271   :  { %v12127_v35 = vpop.f32.mrb[2].mxu1 }
 0x272   :  { %v435_v36 = vpack.c.bf16 %v12127_v35, %v12126_v33  ;;  %v422_v37 = vpop.f32.mrb[3].mxu1  ;;  %v1365_v33 = vand.u32 %v1357_v27, %v15054_v17  ;;  %v13903_v27 = vld [vmem:[%s16248_s1 + $0x10] sm:$0xff]  }
 0x273   :  { %v434_v38 = vpack.c.bf16 %v422_v37, %v419_v34 }
 0x28f   :  { %v12146_v39 = vpop.f32.mrb[4].mxu1 }
 0x290   :  { %v488_v40 = vpop.f32.mrb[5].mxu1 }
 0x291   :  { %v12147_v41 = vpop.f32.mrb[6].mxu1 }
 0x292   :  { %v504_v43 = vpack.c.bf16 %v12147_v41, %v12146_v39  ;;  %v491_v44 = vpop.f32.mrb[7].mxu1 }
 0x293   :  { %v503_v45 = vpack.c.bf16 %v491_v44, %v488_v40  ;;  %v13899_v44 = vld [vmem:[#allocation2 + $0x80] sm:$0xff]  }
 0x295   :  { %12150 = vmatprep.mubr.msk.bf16.mxu0 %vm507_vm2, %v503_v45 }
 0x296   :  { %12151 = vmatmul.mubr.msk.bf16.vlgmr.msra.gmra.mrb[0].mxu0 %vm507_vm2, %v504_v43 }
 0x297   :  { %12156 = vmatprep.mubr.msk.bf16.mxu0 %vm507_vm2, %v434_v38  ;;  %12155 = vmatpush3.bf16.msra.mxu0 %v15058_v20  ;;  %v1225_v20 = vld [vmem:[#allocation4 + $0xc] sm:$0x3] }
 0x298   :  { %12180 = vmatprep.subr.bf16.mxu0 %v705_v46  ;;  %v1233_v21 = vand.u32 %v1225_v20, %v15054_v17  ;;  %v2170_v20 = vld [vmem:[#allocation7 + $0x18] sm:$0xf] }
 0x2a2   :  { %12157 = vmatmul.mubr.msk.bf16.vlgmr.msra.gmra.mrb[0].mxu0 %vm507_vm2, %v435_v36 }
 0x2a3   :  { %12181 = vmatpush3.bf16.msra.mxu0 %v705_v46 }
 0x2a4   :  { %12186 = vmatprep.subr.bf16.mxu0 %v15064_v23 }
 0x2af   :  { %v12178_v47 = vpop.f32.mrb[8].mxu1 }
 0x2b0   :  { %v679_v48 = vpop.f32.mrb[9].mxu1 }
 0x2b1   :  { %v12179_v49 = vpop.f32.mrb[10].mxu1 }
 0x2b2   :  { %v695_v50 = vpack.c.bf16 %v12179_v49, %v12178_v47  ;;  %v682_v51 = vpop.f32.mrb[11].mxu1 }
 0x2b3   :  { %v694_v52 = vpack.c.bf16 %v682_v51, %v679_v48 }
 0x2b5   :  { %12182 = vmatprep.mubr.msk.bf16.mxu0 %vm507_vm2, %v694_v52 }
 0x2b6   :  { %12183 = vmatmul.mubr.msk.bf16.vlgmr.msra.gmra.mrb[0].mxu0 %vm507_vm2, %v695_v50 }
 0x2b7   :  { %12187 = vmatpush3.bf16.msra.mxu0 %v15064_v23  ;;  %12202 = vmatprep.mubr.bf16.mxu0 %v13891_v53 }
 0x2b8   :  { %12188 = vmatprep.subr.bf16.mxu0 %v15070_v24 }
 0x2bb   :  { %12189 = vmatpush3.bf16.msra.mxu0 %v15070_v24 }
 0x2bc   :  { %12190 = vmatprep.subr.bf16.mxu0 %v15077_v25 }
 0x2bf   :  { %12191 = vmatpush3.bf16.msra.mxu0 %v15077_v25 }
 0x2c0   :  { %12192 = vmatprep.subr.bf16.mxu0 %v15084_v26 }
 0x2c3   :  { %12193 = vmatpush3.bf16.msra.mxu0 %v15084_v26 }
 0x2c4   :  { %12194 = vmatprep.subr.bf16.mxu0 %v15091_v28 }
 0x2c7   :  { %12195 = vmatpush3.bf16.msra.mxu0 %v15091_v28 }
 0x2c8   :  { %12196 = vmatprep.subr.bf16.mxu0 %v15098_v29 }
 0x2cb   :  { %12197 = vmatpush3.bf16.msra.mxu0 %v15098_v29 }
 0x2cc   :  { %12198 = vmatprep.subr.bf16.mxu0 %v15105_v30 }
 0x2cf   :  { %12199 = vmatpush3.bf16.msra.mxu0 %v15105_v30  ;;  %v12230_v55 = vpop.f32.mrb[12].mxu1 }
 0x2d0   :  { %12200 = vmatprep.subr.bf16.mxu0 %v15112_v31  ;;  %v943_v56 = vpop.f32.mrb[13].mxu1 }
 0x2d1   :  { %v12231_v57 = vpop.f32.mrb[14].mxu1 }
 0x2d2   :  { %v959_v58 = vpack.c.bf16 %v12231_v57, %v12230_v55  ;;  %v946_v59 = vpop.f32.mrb[15].mxu1 }
 0x2d3   :  { %12201 = vmatpush3.bf16.msra.mxu0 %v15112_v31  ;;  %v958_v60 = vpack.c.bf16 %v946_v59, %v943_v56 }
 0x2d4   :  { %12206 = vmatprep.subr.bf16.mxu0 %v837_v62 }
 0x2d6   :  { %12203 = vmatmul.mubr.bf16.vlgmr.msra.gmra.mrb[4].mxu0 %v13892_v54 }
 0x2d7   :  { %12207 = vmatpush3.bf16.msra.mxu0 %v837_v62 }
 0x2d8   :  { %12232 = vmatprep.subr.bf16.mxu0 %v969_v0 }
 0x2ef   :  { %v12256_v1 = vpop.f32.mrb[16].mxu1 }
 0x2f0   :  { %v1075_v2 = vpop.f32.mrb[17].mxu1 }
 0x2f1   :  { %v12257_v3 = vpop.f32.mrb[18].mxu1 }
 0x2f2   :  { %v1091_v4 = vpack.c.bf16 %v12257_v3, %v12256_v1  ;;  %v1078_v5 = vpop.f32.mrb[19].mxu1  ;;  %v1626_v1 = vld [vmem:[#allocation7 + $0x4] sm:$0xf] }
 0x2f3   :  { %v1090_v6 = vpack.c.bf16 %v1078_v5, %v1075_v2  ;;  %v1577_v2 = vld [vmem:[#allocation7] sm:$0xf]  ;;  %v13901_v3 = vld [vmem:[%s16248_s1 + $0x8] sm:$0xff]  }
 0x30f   :  { %v12308_v22 = vpop.f32.mrb[20].mxu1 }
 0x310   :  { %v1339_v32 = vpop.f32.mrb[21].mxu1 }
 0x311   :  { %v12309_v34 = vpop.f32.mrb[22].mxu1 }
 0x312   :  { %v1355_v35 = vpack.c.bf16 %v12309_v34, %v12308_v22  ;;  %v1342_v36 = vpop.f32.mrb[23].mxu1  ;;  %v2368_v22 = vld [vmem:[#allocation7 + $0x20] sm:$0xf] }
 0x313   :  { %v1354_v37 = vpack.c.bf16 %v1342_v36, %v1339_v32 }
 0x3a9   :  { %v12204_v9 = vpop.f32.mrb[4].mxu0 }
 0x3aa   :  { %v811_v10 = vpop.f32.mrb[5].mxu0 }
 0x3ab   :  { %v12205_v11 = vpop.f32.mrb[6].mxu0 }
 0x3ac   :  { %v827_v13 = vpack.c.bf16 %v12205_v11, %v12204_v9  ;;  %v814_v14 = vpop.f32.mrb[7].mxu0 }
 0x3ad   :  { %v826_v15 = vpack.c.bf16 %v814_v14, %v811_v10 }
 0x3af   :  { %12208 = vmatprep.mubr.msk.bf16.mxu0 %vm507_vm2, %v826_v15  ;;  %v1774_v15 = vld [vmem:[#allocation7 + $0x8] sm:$0xf] }
 0x3b0   :  { %12209 = vmatmul.mubr.msk.bf16.vlgmr.msra.gmra.mrb[0].mxu0 %vm507_vm2, %v827_v13 }
 0x3b1   :  { %12234 = vmatprep.mubr.msk.bf16.mxu0 %vm507_vm2, %v958_v60  ;;  %12233 = vmatpush3.bf16.msra.mxu0 %v969_v0 }
 0x3b2   :  { %12258 = vmatprep.subr.bf16.mxu0 %v1101_v16 }
 0x3bc   :  { %12235 = vmatmul.mubr.msk.bf16.vlgmr.msra.gmra.mrb[0].mxu0 %vm507_vm2, %v959_v58 }
 0x3bd   :  { %12259 = vmatpush3.bf16.msra.mxu0 %v1101_v16  ;;  %12260 = vmatprep.mubr.msk.bf16.mxu0 %vm507_vm2, %v1090_v6  ;;  %v13902_v6 = vld [vmem:[%s16248_s1] sm:$0xff]   ;;  %v1873_v16 = vld [vmem:[#allocation7 + $0xc] sm:$0xf] }
 0x3be   :  { %12264 = vmatprep.subr.bf16.mxu0 %v15064_v23 }
 0x3c8   :  { %12261 = vmatmul.mubr.msk.bf16.vlgmr.msra.gmra.mrb[0].mxu0 %vm507_vm2, %v1091_v4 }
 0x3c9   :  { %12265 = vmatpush3.bf16.msra.mxu0 %v15064_v23  ;;  %12280 = vmatprep.mubr.bf16.mxu0 %v13895_v18  ;;  %v1972_v18 = vld [vmem:[#allocation7 + $0x10] sm:$0xf] }
 0x3ca   :  { %12266 = vmatprep.subr.bf16.mxu0 %v15070_v24 }
 0x3cd   :  { %12267 = vmatpush3.bf16.msra.mxu0 %v15070_v24 }
 0x3ce   :  { %12268 = vmatprep.subr.bf16.mxu0 %v15077_v25 }
 0x3d1   :  { %12269 = vmatpush3.bf16.msra.mxu0 %v15077_v25 }
 0x3d2   :  { %12270 = vmatprep.subr.bf16.mxu0 %v15084_v26 }
 0x3d5   :  { %12271 = vmatpush3.bf16.msra.mxu0 %v15084_v26 }
 0x3d6   :  { %12272 = vmatprep.subr.bf16.mxu0 %v15091_v28 }
 0x3d9   :  { %12273 = vmatpush3.bf16.msra.mxu0 %v15091_v28 }
 0x3da   :  { %12274 = vmatprep.subr.bf16.mxu0 %v15098_v29 }
 0x3dd   :  { %12275 = vmatpush3.bf16.msra.mxu0 %v15098_v29 }
 0x3de   :  { %12276 = vmatprep.subr.bf16.mxu0 %v15105_v30 }
 0x3e1   :  { %12277 = vmatpush3.bf16.msra.mxu0 %v15105_v30 }
 0x3e2   :  { %12278 = vmatprep.subr.bf16.mxu0 %v15112_v31 }
 0x3e5   :  { %12279 = vmatpush3.bf16.msra.mxu0 %v15112_v31 }
 0x3e6   :  { %12284 = vmatprep.subr.bf16.mxu0 %v1233_v21 }
 0x3e8   :  { %12281 = vmatmul.mubr.bf16.vlgmr.msra.gmra.mrb[8].mxu0 %v13896_v19  ;;  %v2071_v19 = vld [vmem:[#allocation7 + $0x14] sm:$0xf] }
 0x3e9   :  { %12285 = vmatpush3.bf16.msra.mxu0 %v1233_v21  ;;  %v2269_v21 = vld [vmem:[#allocation7 + $0x1c] sm:$0xf] }
 0x3ea   :  { %12310 = vmatprep.subr.bf16.mxu0 %v1365_v33 }
 0x4bb   :  { %v12282_v38 = vpop.f32.mrb[8].mxu0 }
 0x4bc   :  { %v1207_v39 = vpop.f32.mrb[9].mxu0 }
 0x4bd   :  { %v12283_v40 = vpop.f32.mrb[10].mxu0 }
 0x4be   :  { %v1223_v41 = vpack.c.bf16 %v12283_v40, %v12282_v38  ;;  %v1210_v42 = vpop.f32.mrb[11].mxu0 }
 0x4bf   :  { %v1222_v43 = vpack.c.bf16 %v1210_v42, %v1207_v39  ;;  %v13904_v42 = vld [vmem:[%s16248_s1 + $0x18] sm:$0xff]  }
 0x4c1   :  { %12286 = vmatprep.mubr.msk.bf16.mxu0 %vm507_vm2, %v1222_v43 }
 0x4c2   :  { %12287 = vmatmul.mubr.msk.bf16.vlgmr.msra.gmra.mrb[0].mxu0 %vm507_vm2, %v1223_v41 }
 0x4c3   :  { %12311 = vmatpush3.bf16.msra.mxu0 %v1365_v33  ;;  %12312 = vmatprep.mubr.msk.bf16.mxu0 %vm507_vm2, %v1354_v37 }
 0x4c4   :  { %12316 = vmatprep.subr.bf16.mxu0 %v15064_v23 }
 0x4ce   :  { %12313 = vmatmul.mubr.msk.bf16.vlgmr.msra.gmra.mrb[0].mxu0 %vm507_vm2, %v1355_v35 }
 0x4cf   :  { %12317 = vmatpush3.bf16.msra.mxu0 %v15064_v23  ;;  %12332 = vmatprep.mubr.bf16.mxu0 %v13899_v44  ;;  %v13900_v23 = vld [vmem:[#allocation2 + $0x88] sm:$0xff]  }
 0x4d0   :  { %12318 = vmatprep.subr.bf16.mxu0 %v15070_v24 }
 0x4d3   :  { %12319 = vmatpush3.bf16.msra.mxu0 %v15070_v24  ;;  %v1489_v24 = vld [vmem:[#allocation4 + $0x10] sm:$0x3] }
 0x4d4   :  { %12320 = vmatprep.subr.bf16.mxu0 %v15077_v25 }
 0x4d7   :  { %12321 = vmatpush3.bf16.msra.mxu0 %v15077_v25  ;;  %v1497_v25 = vand.u32 %v1489_v24, %v15054_v17  ;;  %v10855_v17 = vld [vmem:[#allocation6] ss:$0 sm:$0xff] }
 0x4d8   :  { %12322 = vmatprep.subr.bf16.mxu0 %v15084_v26 }
 0x4db   :  { %12323 = vmatpush3.bf16.msra.mxu0 %v15084_v26 }
 0x4dc   :  { %12324 = vmatprep.subr.bf16.mxu0 %v15091_v28 }
 0x4df   :  { %12325 = vmatpush3.bf16.msra.mxu0 %v15091_v28 }
 0x4e0   :  { %12326 = vmatprep.subr.bf16.mxu0 %v15098_v29 }
 0x4e3   :  { %12327 = vmatpush3.bf16.msra.mxu0 %v15098_v29 }
 0x4e4   :  { %12328 = vmatprep.subr.bf16.mxu0 %v15105_v30 }
 0x4e7   :  { %12329 = vmatpush3.bf16.msra.mxu0 %v15105_v30  ;;  %v14580_v30 = vmov 0.0  }
 0x4e8   :  { %12330 = vmatprep.subr.bf16.mxu0 %v15112_v31  ;;  %12350 = vmatprep.subr.bf16.mxu1 %v14580_v30 }
 0x4e9   :  { %12354 = vmatprep.mubr.msk.bf16.mxu1 %vm14581_vm3, %v14580_v30 }
 0x4eb   :  { %12331 = vmatpush3.bf16.msra.mxu0 %v15112_v31 }
 0x4ec   :  { %12336 = vmatprep.subr.bf16.mxu0 %v1497_v25 }
 0x4ee   :  { %12333 = vmatmul.mubr.bf16.vlgmr.msra.gmra.mrb[12].mxu0 %v13900_v23 }
 0x4ef   :  { %12337 = vmatpush3.bf16.msra.mxu0 %v1497_v25 }
 0x4f0   :  { %12342 = vmatprep.subr.bf16.mxu0 %v14580_v30 }
 0x5c1   :  { %v12334_v26 = vpop.f32.mrb[12].mxu0 }
 0x5c2   :  { %v1471_v28 = vpop.f32.mrb[13].mxu0 }
 0x5c3   :  { %v12335_v45 = vpop.f32.mrb[14].mxu0 }
 0x5c4   :  { %v1487_v46 = vpack.c.bf16 %v12335_v45, %v12334_v26  ;;  %v1474_v29 = vpop.f32.mrb[15].mxu0  ;;  %v13905_v26 = vld [vmem:[%s16248_s1 + $0x20] sm:$0xff]  }
 0x5c5   :  { %v1486_v47 = vpack.c.bf16 %v1474_v29, %v1471_v28 }
 0x5c7   :  { %12338 = vmatprep.mubr.msk.bf16.mxu0 %vm507_vm2, %v1486_v47 }
 0x5c8   :  { %12339 = vmatmul.mubr.msk.bf16.vlgmr.msra.gmra.mrb[0].mxu0 %vm507_vm2, %v1487_v46 }
 0x5c9   :  { %12346 = vmatprep.mubr.msk.bf16.mxu0 %vm14581_vm3, %v14580_v30 }
 0x69b   :  { %v12340_v31 = vpop.f32.mrb[0].mxu0 }
 0x69c   :  { %v1560_v48 = vadd.f32 %v12340_v31, %v10855_v17  ;;  %v1533_v49 = vpop.f32.mrb[1].mxu0 }
 0x69d   :  { %v1558_v50 = vadd.f32 %v10855_v17, %v1533_v49  ;;  %v12341_v51 = vpop.f32.mrb[2].mxu0 }
 0x69e   :  { %v1568_v52 = vmul.f32 0.01, %v1560_v48  ;;  %v1561_v53 = vadd.f32 %v12341_v51, %v10855_v17  ;;  %v1536_v54 = vpop.f32.mrb[3].mxu0  ;;  %vm1564_vm4 = vcmp.ge.f32.partialorder %v1560_v48, 0.0 }
 0x69f   :  { %v1566_v55 = vmul.f32 0.01, %v1558_v50  ;;  %v1559_v56 = vadd.f32 %v10855_v17, %v1536_v54  ;;  %vm1562_vm5 = vcmp.ge.f32.partialorder %v1558_v50, 0.0  ;;  %v13906_v17 = vld [vmem:[%s16248_s1 + $0x28] sm:$0xff]  }
 0x6a0   :  { %vm1565_vm6 = vcmp.ge.f32.partialorder %v1561_v53, 0.0  ;;  %v1569_v57 = vmul.f32 0.01, %v1561_v53  ;;  %v1572_v59 = vsel %vm1564_vm4, %v1560_v48, %v1568_v52  ;;  %v13907_v52 = vld [vmem:[%s16248_s1 + $0x30] sm:$0xff]  }
 0x6a1   :  { %vm1563_vm7 = vcmp.ge.f32.partialorder %v1559_v56, 0.0  ;;  %v1567_v58 = vmul.f32 0.01, %v1559_v56  ;;  %v1570_v61 = vsel %vm1562_vm5, %v1558_v50, %v1566_v55 }
 0x6a2   :  { %v1573_v60 = vsel %vm1565_vm6, %v1561_v53, %v1569_v57 }
 0x6a3   :  { %v15212_v62 = vpack.c.bf16 %v1573_v60, %v1572_v59  ;;  %v1571_v63 = vsel %vm1563_vm7, %v1559_v56, %v1567_v58  ;;  %v13908_v58 = vld [vmem:[%s16248_s1 + $0x38] sm:$0xff]  }
 0x6a4   :  { %v15214_v0 = vpack.c.bf16 %v1571_v63, %v1570_v61 }
 0x6a6   :  { %12343 = vmatpush3.bf16.msra.mxu0 %v15214_v0  ;;  %12351 = vmatpush3.bf16.msra.mxu1 %v15214_v0 }
 0x6a7   :  { %12344 = vmatprep.subr.bf16.mxu0 %v14580_v30  ;;  %12352 = vmatprep.subr.bf16.mxu1 %v14580_v30 }
 0x6aa   :  { %12345 = vmatpush3.bf16.msra.mxu0 %v15212_v62  ;;  %12353 = vmatpush3.bf16.msra.mxu1 %v15212_v62 }
 0x6ab   :  { %12358 = vmatprep.subr.bf16.mxu1 %v14580_v30  ;;  %12378 = vmatprep.subr.bf16.mxu0 %v14580_v30 }
 0x6ad   :  { %12355 = vmatmul.mubr.msk.bf16.vlgmr.msra.gmra.mrb[24].mxu1 %vm1578_vm8, %v1626_v1  ;;  %12347 = vmatmul.mubr.msk.bf16.vlgmr.msra.gmra.mrb[16].mxu0 %vm1578_vm8, %v1577_v2 }
 0x6ae   :  { %12360 = vmatprep.mubr.msk.bf16.mxu1 %vm14581_vm3, %v14580_v30  ;;  %12380 = vmatprep.mubr.msk.bf16.mxu0 %vm14581_vm3, %v14580_v30 }
 0x6af   :  { %12359 = vmatpush3.bf16.msra.mxu1 %v13901_v3  ;;  %12379 = vmatpush3.bf16.msra.mxu0 %v13903_v27 }
 0x6b0   :  { %12364 = vmatprep.subr.bf16.mxu1 %v14580_v30  ;;  %12392 = vmatprep.subr.bf16.mxu0 %v14580_v30 }
 0x780   :  { %v1664_v4 = vpop.f32.mrb[24].mxu1  ;;  %v1616_v5 = vpop.f32.mrb[16].mxu0 }
 0x781   :  { %v1670_v7 = vpack.c.bf16 %v1664_v4, %v1664_v4  ;;  %v12356_v8 = vpop.f32.mrb[25].mxu1  ;;  %v12348_v9 = vpop.f32.mrb[17].mxu0  ;;  %v1622_v14 = vpack.c.bf16 %v1616_v5, %v1616_v5 }
 0x782   :  { %v1667_v10 = vpop.f32.mrb[26].mxu1  ;;  %v1619_v11 = vpop.f32.mrb[18].mxu0 }
 0x783   :  { %v12357_v12 = vpop.f32.mrb[27].mxu1  ;;  %12361 = vmatmul.mubr.msk.bf16.vlgmr.msra.gmra.mrb[28].mxu1 %vm1680_vm9, %v1670_v7  ;;  %v12349_v13 = vpop.f32.mrb[19].mxu0 }
 0x784   :  { %12365 = vmatpush3.bf16.msra.mxu1 %v13902_v6  ;;  %12366 = vmatprep.mubr.msk.bf16.mxu1 %vm14581_vm3, %v14580_v30 }
 0x785   :  { %12370 = vmatprep.subr.bf16.mxu1 %v14580_v30 }
 0x78b   :  { %12367 = vmatmul.mubr.msk.bf16.vlgmr.msra.gmra.mrb[32].mxu1 %vm1680_vm9, %v1622_v14 }
 0x78c   :  { %12371 = vmatpush3.bf16.msra.mxu1 %v15214_v0  ;;  %12374 = vmatprep.mubr.msk.bf16.mxu1 %vm14581_vm3, %v14580_v30 }
 0x78d   :  { %12372 = vmatprep.subr.bf16.mxu1 %v14580_v30 }
 0x790   :  { %12373 = vmatpush3.bf16.msra.mxu1 %v15212_v62 }
 0x791   :  { %12384 = vmatprep.subr.bf16.mxu1 %v14580_v30 }
 0x793   :  { %12375 = vmatmul.mubr.msk.bf16.vlgmr.msra.gmra.mrb[36].mxu1 %vm1578_vm8, %v1774_v15 }
 0x794   :  { %12385 = vmatpush3.bf16.msra.mxu1 %v15214_v0  ;;  %12388 = vmatprep.mubr.msk.bf16.mxu1 %vm14581_vm3, %v14580_v30 }
 0x795   :  { %12386 = vmatprep.subr.bf16.mxu1 %v14580_v30 }
 0x798   :  { %12387 = vmatpush3.bf16.msra.mxu1 %v15212_v62 }
 0x799   :  { %12398 = vmatprep.subr.bf16.mxu1 %v14580_v30 }
 0x79b   :  { %12389 = vmatmul.mubr.msk.bf16.vlgmr.msra.gmra.mrb[40].mxu1 %vm1578_vm8, %v1873_v16 }
 0x79c   :  { %12399 = vmatpush3.bf16.msra.mxu1 %v15214_v0  ;;  %12402 = vmatprep.mubr.msk.bf16.mxu1 %vm14581_vm3, %v14580_v30 }
 0x79d   :  { %12400 = vmatprep.subr.bf16.mxu1 %v14580_v30 }
 0x7a0   :  { %12401 = vmatpush3.bf16.msra.mxu1 %v15212_v62 }
 0x7a1   :  { %12412 = vmatprep.subr.bf16.mxu1 %v14580_v30 }
 0x7a3   :  { %12403 = vmatmul.mubr.msk.bf16.vlgmr.msra.gmra.mrb[44].mxu1 %vm1578_vm8, %v1972_v18 }
 0x7a4   :  { %12413 = vmatpush3.bf16.msra.mxu1 %v15214_v0  ;;  %12416 = vmatprep.mubr.msk.bf16.mxu1 %vm14581_vm3, %v14580_v30 }
 0x7a5   :  { %12414 = vmatprep.subr.bf16.mxu1 %v14580_v30 }
 0x7a8   :  { %12415 = vmatpush3.bf16.msra.mxu1 %v15212_v62 }
 0x7a9   :  { %12426 = vmatprep.subr.bf16.mxu1 %v14580_v30 }
 0x7ab   :  { %12417 = vmatmul.mubr.msk.bf16.vlgmr.msra.gmra.mrb[48].mxu1 %vm1578_vm8, %v2071_v19 }
 0x7ac   :  { %12427 = vmatpush3.bf16.msra.mxu1 %v15214_v0  ;;  %12430 = vmatprep.mubr.msk.bf16.mxu1 %vm14581_vm3, %v14580_v30 }
 0x7ad   :  { %12428 = vmatprep.subr.bf16.mxu1 %v14580_v30 }
 0x7b0   :  { %12429 = vmatpush3.bf16.msra.mxu1 %v15212_v62 }
 0x7b1   :  { %12440 = vmatprep.subr.bf16.mxu1 %v14580_v30 }
 0x7b3   :  { %12431 = vmatmul.mubr.msk.bf16.vlgmr.msra.gmra.mrb[52].mxu1 %vm1578_vm8, %v2170_v20 }
 0x7b4   :  { %12441 = vmatpush3.bf16.msra.mxu1 %v15214_v0  ;;  %12444 = vmatprep.mubr.msk.bf16.mxu1 %vm14581_vm3, %v14580_v30 }
 0x7b5   :  { %12442 = vmatprep.subr.bf16.mxu1 %v14580_v30 }
 0x7b8   :  { %12443 = vmatpush3.bf16.msra.mxu1 %v15212_v62 }
 0x7b9   :  { %12454 = vmatprep.subr.bf16.mxu1 %v14580_v30 }
 0x7bb   :  { %12445 = vmatmul.mubr.msk.bf16.vlgmr.msra.gmra.mrb[56].mxu1 %vm1578_vm8, %v2269_v21 }
 0x7bc   :  { %12455 = vmatpush3.bf16.msra.mxu1 %v15214_v0  ;;  %12458 = vmatprep.mubr.msk.bf16.mxu1 %vm14581_vm3, %v14580_v30  ;;  %v13909_v0 = vld [vmem:[%s16248_s1 + $0x40] sm:$0xff]   ;;  %s16252_s1 = sld [smem:[#allocation51_spill]] }
 0x7bd   :  { %12456 = vmatprep.subr.bf16.mxu1 %v14580_v30 }
 0x7c0   :  { %12457 = vmatpush3.bf16.msra.mxu1 %v15212_v62 }
 0x7c1   :  { %12468 = vmatprep.subr.bf16.mxu1 %v14580_v30 }
 0x7c3   :  { %12459 = vmatmul.mubr.msk.bf16.vlgmr.msra.gmra.mrb[60].mxu1 %vm1578_vm8, %v2368_v22 }
 0x7c4   :  { %12470 = vmatprep.mubr.msk.bf16.mxu1 %vm14581_vm3, %v14580_v30 }
 0x856   :  { %v1718_v32 = vpop.f32.mrb[28].mxu1 }
 0x857   :  { %v12362_v33 = vpop.f32.mrb[29].mxu1 }
 0x858   :  { %v1721_v34 = vpop.f32.mrb[30].mxu1 }
 0x859   :  { %v12363_v35 = vpop.f32.mrb[31].mxu1 }
 0x85e   :  { %v1767_v36 = vpop.f32.mrb[32].mxu1 }
 0x85f   :  { %v12368_v37 = vpop.f32.mrb[33].mxu1  ;;  %v15297_v38 = vadd.f32 %v1767_v36, %v1718_v32 }
 0x860   :  { %v1770_v39 = vpop.f32.mrb[34].mxu1 }
 0x861   :  { %v12369_v40 = vpop.f32.mrb[35].mxu1 }
 0x866   :  { %v1812_v41 = vpop.f32.mrb[36].mxu1 }
 0x867   :  { %v1818_v43 = vpack.c.bf16 %v1812_v41, %v1812_v41  ;;  %v12376_v44 = vpop.f32.mrb[37].mxu1 }
 0x868   :  { %v1815_v23 = vpop.f32.mrb[38].mxu1 }
 0x869   :  { %v12377_v24 = vpop.f32.mrb[39].mxu1  ;;  %12381 = vmatmul.mubr.msk.bf16.vlgmr.msra.gmra.mrb[20].mxu0 %vm1680_vm9, %v1818_v43 }
 0x86a   :  { %12393 = vmatpush3.bf16.msra.mxu0 %v13904_v42  ;;  %12394 = vmatprep.mubr.msk.bf16.mxu0 %vm14581_vm3, %v14580_v30 }
 0x86b   :  { %12406 = vmatprep.subr.bf16.mxu0 %v14580_v30 }
 0x86e   :  { %v1911_v25 = vpop.f32.mrb[40].mxu1 }
 0x86f   :  { %v1917_v28 = vpack.c.bf16 %v1911_v25, %v1911_v25  ;;  %v12390_v45 = vpop.f32.mrb[41].mxu1 }
 0x870   :  { %v1914_v46 = vpop.f32.mrb[42].mxu1 }
 0x871   :  { %v12391_v29 = vpop.f32.mrb[43].mxu1  ;;  %12395 = vmatmul.mubr.msk.bf16.vlgmr.msra.gmra.mrb[24].mxu0 %vm1680_vm9, %v1917_v28  ;;  %v10899_v28 = vld [vmem:[#allocation9] ss:$0 sm:$0xff] }
 0x872   :  { %12407 = vmatpush3.bf16.msra.mxu0 %v13905_v26  ;;  %12408 = vmatprep.mubr.msk.bf16.mxu0 %vm14581_vm3, %v14580_v30 }
 0x873   :  { %12420 = vmatprep.subr.bf16.mxu0 %v14580_v30 }
 0x876   :  { %v2010_v47 = vpop.f32.mrb[44].mxu1 }
 0x877   :  { %v2016_v31 = vpack.c.bf16 %v2010_v47, %v2010_v47  ;;  %v12404_v48 = vpop.f32.mrb[45].mxu1 }
 0x878   :  { %v2013_v49 = vpop.f32.mrb[46].mxu1 }
 0x879   :  { %v12405_v50 = vpop.f32.mrb[47].mxu1  ;;  %12409 = vmatmul.mubr.msk.bf16.vlgmr.msra.gmra.mrb[28].mxu0 %vm1680_vm9, %v2016_v31 }
 0x87a   :  { %12421 = vmatpush3.bf16.msra.mxu0 %v13906_v17  ;;  %12422 = vmatprep.mubr.msk.bf16.mxu0 %vm14581_vm3, %v14580_v30 }
 0x87b   :  { %12434 = vmatprep.subr.bf16.mxu0 %v14580_v30 }
 0x87e   :  { %v2109_v51 = vpop.f32.mrb[48].mxu1 }
 0x87f   :  { %v2115_v53 = vpack.c.bf16 %v2109_v51, %v2109_v51  ;;  %v12418_v54 = vpop.f32.mrb[49].mxu1 }
 0x880   :  { %v2112_v55 = vpop.f32.mrb[50].mxu1  ;;  %v13910_v54 = vld [vmem:[#allocation12 + $0x10] sm:$0xff]  }
 0x881   :  { %v12419_v56 = vpop.f32.mrb[51].mxu1  ;;  %12423 = vmatmul.mubr.msk.bf16.vlgmr.msra.gmra.mrb[32].mxu0 %vm1680_vm9, %v2115_v53  ;;  %v2536_v53 = vld [vmem:[#allocation10 + $0x4] sm:$0xf]  ;;  %v13911_v55 = vld [vmem:[#allocation12] sm:$0xff]  }
 0x882   :  { %12435 = vmatpush3.bf16.msra.mxu0 %v13907_v52  ;;  %12436 = vmatprep.mubr.msk.bf16.mxu0 %vm14581_vm3, %v14580_v30  ;;  %v2477_v52 = vld [vmem:[#allocation10] sm:$0xf]  ;;  %v13912_v56 = vld [vmem:[#allocation12 + $0x18] sm:$0xff]  }
 0x883   :  { %12448 = vmatprep.subr.bf16.mxu0 %v14580_v30 }
 0x886   :  { %v2208_v57 = vpop.f32.mrb[52].mxu1 }
 0x887   :  { %v2214_v59 = vpack.c.bf16 %v2208_v57, %v2208_v57  ;;  %v12432_v60 = vpop.f32.mrb[53].mxu1  ;;  %v13913_v57 = vld [vmem:[#allocation12 + $0x8] sm:$0xff]  }
 0x888   :  { %v2211_v61 = vpop.f32.mrb[54].mxu1  ;;  %v13914_v60 = vld [vmem:[#allocation15 + $0x10] sm:$0xff]  }
 0x889   :  { %v12433_v62 = vpop.f32.mrb[55].mxu1  ;;  %12437 = vmatmul.mubr.msk.bf16.vlgmr.msra.gmra.mrb[36].mxu0 %vm1680_vm9, %v2214_v59  ;;  %v13915_v61 = vld [vmem:[#allocation15] sm:$0xff]  }
 0x88a   :  { %12449 = vmatpush3.bf16.msra.mxu0 %v13908_v58  ;;  %12450 = vmatprep.mubr.msk.bf16.mxu0 %vm14581_vm3, %v14580_v30 }
 0x88b   :  { %12462 = vmatprep.subr.bf16.mxu0 %v14580_v30 }
 0x88e   :  { %v2307_v63 = vpop.f32.mrb[56].mxu1 }
 0x88f   :  { %v2313_v1 = vpack.c.bf16 %v2307_v63, %v2307_v63  ;;  %v12446_v2 = vpop.f32.mrb[57].mxu1 }
 0x890   :  { %v2310_v3 = vpop.f32.mrb[58].mxu1 }
 0x891   :  { %v12447_v4 = vpop.f32.mrb[59].mxu1  ;;  %12451 = vmatmul.mubr.msk.bf16.vlgmr.msra.gmra.mrb[40].mxu0 %vm1680_vm9, %v2313_v1 }
 0x892   :  { %12463 = vmatpush3.bf16.msra.mxu0 %v13909_v0  ;;  %12464 = vmatprep.mubr.msk.bf16.mxu0 %vm14581_vm3, %v14580_v30 }
 0x893   :  { %12474 = vmatprep.subr.bf16.mxu0 %v14580_v30 }
 0x896   :  { %v2406_v5 = vpop.f32.mrb[60].mxu1 }
 0x897   :  { %v2412_v6 = vpack.c.bf16 %v2406_v5, %v2406_v5  ;;  %v12460_v7 = vpop.f32.mrb[61].mxu1 }
 0x898   :  { %v2409_v8 = vpop.f32.mrb[62].mxu1  ;;  %v13917_v7 = vld [vmem:[#allocation15 + $0x8] sm:$0xff]  }
 0x899   :  { %v12461_v9 = vpop.f32.mrb[63].mxu1  ;;  %12465 = vmatmul.mubr.msk.bf16.vlgmr.msra.gmra.mrb[44].mxu0 %vm1680_vm9, %v2412_v6  ;;  %v13916_v6 = vld [vmem:[#allocation15 + $0x18] sm:$0xff]  }
 0x89a   :  { %12476 = vmatprep.mubr.msk.bf16.mxu0 %vm14581_vm3, %v14580_v30  ;;  %v2806_v8 = vld [vmem:[#allocation10 + $0x8] sm:$0xf]  ;;  %v13918_v9 = vld [vmem:[#allocation12 + $0x20] sm:$0xff]  }
 0x93c   :  { %v1865_v10 = vpop.f32.mrb[20].mxu0 }
 0x93d   :  { %v1871_v11 = vadd.f32 %v1865_v10, %v15297_v38  ;;  %v12382_v12 = vpop.f32.mrb[21].mxu0  ;;  %v13919_v10 = vld [vmem:[#allocation15 + $0x20] sm:$0xff]  }
 0x93e   :  { %v1868_v13 = vpop.f32.mrb[22].mxu0  ;;  %v13921_v12 = vld [vmem:[#allocation15 + $0x28] sm:$0xff]  }
 0x93f   :  { %v12383_v14 = vpop.f32.mrb[23].mxu0 }
 0x944   :  { %v1964_v15 = vpop.f32.mrb[24].mxu0 }
 0x945   :  { %v1970_v16 = vadd.f32 %v1964_v15, %v1871_v11  ;;  %v12396_v18 = vpop.f32.mrb[25].mxu0  ;;  %v13920_v11 = vld [vmem:[#allocation12 + $0x28] sm:$0xff]  }
 0x946   :  { %v1967_v19 = vpop.f32.mrb[26].mxu0 }
 0x947   :  { %v12397_v20 = vpop.f32.mrb[27].mxu0 }
 0x94c   :  { %v2063_v21 = vpop.f32.mrb[28].mxu0 }
 0x94d   :  { %v2069_v22 = vadd.f32 %v2063_v21, %v1970_v16  ;;  %v12410_v27 = vpop.f32.mrb[29].mxu0 }
 0x94e   :  { %v2066_v32 = vpop.f32.mrb[30].mxu0 }
 0x94f   :  { %v12411_v33 = vpop.f32.mrb[31].mxu0 }
 0x954   :  { %v2162_v34 = vpop.f32.mrb[32].mxu0 }
 0x955   :  { %v2168_v35 = vadd.f32 %v2162_v34, %v2069_v22  ;;  %v12424_v36 = vpop.f32.mrb[33].mxu0 }
 0x956   :  { %v2165_v37 = vpop.f32.mrb[34].mxu0 }
 0x957   :  { %v12425_v39 = vpop.f32.mrb[35].mxu0 }
 0x95c   :  { %v2261_v40 = vpop.f32.mrb[36].mxu0 }
 0x95d   :  { %v2267_v38 = vadd.f32 %v2261_v40, %v2168_v35  ;;  %v12438_v41 = vpop.f32.mrb[37].mxu0 }
 0x95e   :  { %v2264_v42 = vpop.f32.mrb[38].mxu0 }
 0x95f   :  { %v12439_v43 = vpop.f32.mrb[39].mxu0 }
 0x964   :  { %v2360_v44 = vpop.f32.mrb[40].mxu0 }
 0x965   :  { %v2366_v23 = vadd.f32 %v2360_v44, %v2267_v38  ;;  %v12452_v24 = vpop.f32.mrb[41].mxu0 }
 0x966   :  { %v2363_v25 = vpop.f32.mrb[42].mxu0  ;;  %v13922_v24 = vld [vmem:[#allocation12 + $0x30] sm:$0xff]  }
 0x967   :  { %v12453_v26 = vpop.f32.mrb[43].mxu0  ;;  %v13923_v25 = vld [vmem:[#allocation15 + $0x30] sm:$0xff]  }
 0x968   :  { %v13924_v26 = vld [vmem:[#allocation12 + $0x38] sm:$0xff]  }
 0x96c   :  { %v2459_v45 = vpop.f32.mrb[44].mxu0 }
 0x96d   :  { %v2465_v46 = vadd.f32 %v2459_v45, %v2366_v23  ;;  %v12466_v29 = vpop.f32.mrb[45].mxu0  ;;  %v2971_v23 = vld [vmem:[#allocation10 + $0xc] sm:$0xf] }
 0x96e   :  { %v2462_v47 = vpop.f32.mrb[46].mxu0 }
 0x96f   :  { %v2472_v17 = vadd.f32 %v10899_v28, %v2465_v46  ;;  %v12467_v31 = vpop.f32.mrb[47].mxu0  ;;  %v13925_v28 = vld [vmem:[#allocation15 + $0x38] sm:$0xff]  }
 0x971   :  { %vm2473_vm10 = vcmp.ge.f32.partialorder %v2472_v17, 0.0  ;;  %v2474_v48 = vmul.f32 0.01, %v2472_v17 }
 0x973   :  { %v2475_v49 = vsel %vm2473_vm10, %v2472_v17, %v2474_v48 }
 0x974   :  { %v2476_v50 = vpack.c.bf16 %v2475_v49, %v2475_v49 }
 0x976   :  { %v15346_v51 = vsel %vm2482_vm11, %v2476_v50, 0 }
 0x977   :  { %12469 = vmatpush3.bf16.msra.mxu1 %v15346_v51  ;;  %12475 = vmatpush3.bf16.msra.mxu0 %v15346_v51 }
 0x978   :  { %12480 = vmatprep.subr.bf16.mxu1 %v14580_v30  ;;  %12488 = vmatprep.subr.bf16.mxu0 %v14580_v30 }
 0x97a   :  { %12471 = vmatmul.mubr.msk.bf16.vlgmr.msra.gmra.mrb[64].mxu1 %vm2478_vm12, %v2477_v52  ;;  %12477 = vmatmul.mubr.msk.bf16.vlgmr.msra.gmra.mrb[48].mxu0 %vm2478_vm12, %v2536_v53 }
 0x97b   :  { %12481 = vmatpush3.bf16.msra.mxu1 %v13910_v54  ;;  %12489 = vmatpush3.bf16.msra.mxu0 %v13911_v55 }
 0x97c   :  { %12482 = vmatprep.subr.bf16.mxu1 %v14580_v30  ;;  %12490 = vmatprep.subr.bf16.mxu0 %v14580_v30 }
 0x97d   :  { %12484 = vmatprep.mubr.msk.bf16.mxu1 %vm14581_vm3, %v14580_v30  ;;  %12492 = vmatprep.mubr.msk.bf16.mxu0 %vm14581_vm3, %v14580_v30 }
 0x97f   :  { %12483 = vmatpush3.bf16.msra.mxu1 %v13912_v56  ;;  %12491 = vmatpush3.bf16.msra.mxu0 %v13913_v57 }
 0x980   :  { %12496 = vmatprep.subr.bf16.mxu1 %v14580_v30  ;;  %12504 = vmatprep.subr.bf16.mxu0 %v14580_v30 }
 0xa4d   :  { %v2520_v58 = vpop.f32.mrb[64].mxu1  ;;  %v2574_v59 = vpop.f32.mrb[48].mxu0 }
 0xa4e   :  { %v2526_v62 = vpack.c.bf16 %v2520_v58, %v2520_v58  ;;  %v2580_v63 = vpack.c.bf16 %v2574_v59, %v2574_v59  ;;  %v12478_v0 = vpop.f32.mrb[49].mxu0  ;;  %v12472_v1 = vpop.f32.mrb[65].mxu1  ;;  %v10928_v58 = vld [vmem:[#allocation13] ss:$0 sm:$0xff] }
 0xa4f   :  { %v2577_v2 = vpop.f32.mrb[50].mxu0  ;;  %v2523_v3 = vpop.f32.mrb[66].mxu1 }
 0xa50   :  { %v12479_v4 = vpop.f32.mrb[51].mxu0  ;;  %12485 = vmatmul.mubr.msk.bf16.vlgmr.msra.gmra.mrb[68].mxu1 %vm1578_vm8, %v2580_v63  ;;  %12493 = vmatmul.mubr.msk.bf16.vlgmr.msra.gmra.mrb[52].mxu0 %vm1578_vm8, %v2526_v62  ;;  %v12473_v5 = vpop.f32.mrb[67].mxu1 }
 0xa51   :  { %12497 = vmatpush3.bf16.msra.mxu1 %v13914_v60  ;;  %12505 = vmatpush3.bf16.msra.mxu0 %v13915_v61  ;;  %v10929_v60 = vld [vmem:[#allocation16] ss:$0 sm:$0xff] }
 0xa52   :  { %12498 = vmatprep.subr.bf16.mxu1 %v14580_v30  ;;  %12506 = vmatprep.subr.bf16.mxu0 %v14580_v30 }
 0xa53   :  { %12500 = vmatprep.mubr.msk.bf16.mxu1 %vm14581_vm3, %v14580_v30  ;;  %12508 = vmatprep.mubr.msk.bf16.mxu0 %vm14581_vm3, %v14580_v30 }
 0xa55   :  { %12499 = vmatpush3.bf16.msra.mxu1 %v13916_v6  ;;  %12507 = vmatpush3.bf16.msra.mxu0 %v13917_v7 }
 0xa56   :  { %12512 = vmatprep.subr.bf16.mxu1 %v14580_v30  ;;  %12518 = vmatprep.subr.bf16.mxu0 %v14580_v30 }
 0xa58   :  { %12501 = vmatmul.mubr.msk.bf16.vlgmr.msra.gmra.mrb[72].mxu1 %vm1578_vm8, %v2580_v63  ;;  %12509 = vmatmul.mubr.msk.bf16.vlgmr.msra.gmra.mrb[56].mxu0 %vm1578_vm8, %v2526_v62 }
 0xa59   :  { %12513 = vmatpush3.bf16.msra.mxu1 %v15346_v51  ;;  %12514 = vmatprep.mubr.msk.bf16.mxu1 %vm14581_vm3, %v14580_v30 }
 0xa5a   :  { %12526 = vmatprep.subr.bf16.mxu1 %v14580_v30  ;;  %12522 = vmatprep.mubr.msk.bf16.mxu0 %vm14581_vm3, %v14580_v30 }
 0xa5b   :  { %12519 = vmatpush3.bf16.msra.mxu0 %v13918_v9  ;;  %v3153_v9 = vld [vmem:[%s16249_s29] sm:$0xff] }
 0xa5c   :  { %12520 = vmatprep.subr.bf16.mxu0 %v14580_v30 }
 0xa5f   :  { %12521 = vmatpush3.bf16.msra.mxu0 %v13920_v11 }
 0xa60   :  { %12515 = vmatmul.mubr.msk.bf16.vlgmr.msra.gmra.mrb[76].mxu1 %vm2478_vm12, %v2806_v8  ;;  %12534 = vmatprep.subr.bf16.mxu0 %v14580_v30 }
 0xa61   :  { %12530 = vmatprep.mubr.msk.bf16.mxu1 %vm14581_vm3, %v14580_v30  ;;  %12527 = vmatpush3.bf16.msra.mxu1 %v13919_v10 }
 0xa62   :  { %12528 = vmatprep.subr.bf16.mxu1 %v14580_v30 }
 0xa65   :  { %12529 = vmatpush3.bf16.msra.mxu1 %v13921_v12 }
 0xa66   :  { %12540 = vmatprep.subr.bf16.mxu1 %v14580_v30 }
 0xb23   :  { %v2635_v13 = vpop.f32.mrb[68].mxu1  ;;  %v2690_v14 = vpop.f32.mrb[52].mxu0 }
 0xb24   :  { %v2691_v15 = vadd.f32 %v2690_v14, %v2635_v13  ;;  %v12486_v16 = vpop.f32.mrb[69].mxu1  ;;  %v12494_v18 = vpop.f32.mrb[53].mxu0  ;;  %v3257_v14 = vld [vmem:[#allocation19 + $0x4] sm:$0xf] }
 0xb25   :  { %v2638_v19 = vpop.f32.mrb[70].mxu1  ;;  %v2693_v20 = vpop.f32.mrb[54].mxu0  ;;  %v3161_v16 = vld [vmem:[#allocation18] sm:$0xf]  ;;  %v3211_v18 = vld [vmem:[#allocation18 + $0x4] sm:$0xf] }
 0xb26   :  { %v12487_v21 = vpop.f32.mrb[71].mxu1  ;;  %v12495_v22 = vpop.f32.mrb[55].mxu0  ;;  %v3262_v19 = vsel %vm2482_vm11, %v3257_v14, 0  ;;  %v3209_v20 = vld [vmem:[#allocation19] sm:$0xf]  ;;  %v13933_v14 = vld [vmem:[%s16198_s16 + $0x38] sm:$0xff]  }
 0xb27   :  { %v3308_v21 = vsel %vm2482_vm11, %v3209_v20, 0  ;;  %v13938_v20 = vld [vmem:[%s16198_s16 + $0x60] sm:$0xff]  }
 0xb2b   :  { %v2747_v27 = vpop.f32.mrb[72].mxu1  ;;  %v2799_v32 = vpop.f32.mrb[56].mxu0 }
 0xb2c   :  { %v2800_v33 = vadd.f32 %v2799_v32, %v2747_v27  ;;  %v12502_v34 = vpop.f32.mrb[73].mxu1  ;;  %v12510_v35 = vpop.f32.mrb[57].mxu0 }
 0xb2d   :  { %v2750_v36 = vpop.f32.mrb[74].mxu1  ;;  %v2802_v37 = vpop.f32.mrb[58].mxu0 }
 0xb2e   :  { %v12503_v39 = vpop.f32.mrb[75].mxu1  ;;  %v12511_v40 = vpop.f32.mrb[59].mxu0 }
 0xb33   :  { %v2844_v38 = vpop.f32.mrb[76].mxu1 }
 0xb34   :  { %v2850_v41 = vpack.c.bf16 %v2844_v38, %v2844_v38  ;;  %v12516_v42 = vpop.f32.mrb[77].mxu1  ;;  %v3351_v38 = vld [vmem:[#allocation18 + $0x8] sm:$0xf] }
 0xb35   :  { %v2847_v43 = vpop.f32.mrb[78].mxu1  ;;  %v3397_v42 = vld [vmem:[#allocation19 + $0x8] sm:$0xf] }
 0xb36   :  { %v12517_v44 = vpop.f32.mrb[79].mxu1  ;;  %12523 = vmatmul.mubr.msk.bf16.vlgmr.msra.gmra.mrb[60].mxu0 %vm1578_vm8, %v2850_v41  ;;  %12531 = vmatmul.mubr.msk.bf16.vlgmr.msra.gmra.mrb[80].mxu1 %vm1578_vm8, %v2850_v41  ;;  %v3446_v41 = vld [vmem:[#allocation18 + $0xc] sm:$0xf]  ;;  %v3402_v43 = vsel %vm2482_vm11, %v3397_v42, 0 }
 0xb37   :  { %12535 = vmatpush3.bf16.msra.mxu0 %v15346_v51  ;;  %12536 = vmatprep.mubr.msk.bf16.mxu0 %vm14581_vm3, %v14580_v30 }
 0xb38   :  { %12548 = vmatprep.subr.bf16.mxu0 %v14580_v30  ;;  %12544 = vmatprep.mubr.msk.bf16.mxu1 %vm14581_vm3, %v14580_v30 }
 0xb39   :  { %12541 = vmatpush3.bf16.msra.mxu1 %v13922_v24 }
 0xb3a   :  { %12542 = vmatprep.subr.bf16.mxu1 %v14580_v30 }
 0xb3d   :  { %12543 = vmatpush3.bf16.msra.mxu1 %v13924_v26 }
 0xb3e   :  { %12537 = vmatmul.mubr.msk.bf16.vlgmr.msra.gmra.mrb[64].mxu0 %vm2478_vm12, %v2971_v23  ;;  %12556 = vmatprep.subr.bf16.mxu1 %v14580_v30 }
 0xb3f   :  { %12552 = vmatprep.mubr.msk.bf16.mxu0 %vm14581_vm3, %v14580_v30  ;;  %12549 = vmatpush3.bf16.msra.mxu0 %v13923_v25 }
 0xb40   :  { %12550 = vmatprep.subr.bf16.mxu0 %v14580_v30 }
 0xb43   :  { %12551 = vmatpush3.bf16.msra.mxu0 %v13925_v28 }
 0xb44   :  { %12562 = vmatprep.subr.bf16.mxu0 %v14580_v30 }
 0xc09   :  { %v2905_v45 = vpop.f32.mrb[60].mxu0  ;;  %v2963_v46 = vpop.f32.mrb[80].mxu1 }
 0xc0a   :  { %v2911_v29 = vadd.f32 %v2905_v45, %v2691_v15  ;;  %v12524_v47 = vpop.f32.mrb[61].mxu0  ;;  %v12532_v17 = vpop.f32.mrb[81].mxu1  ;;  %v2969_v31 = vadd.f32 %v2963_v46, %v2800_v33 }
 0xc0b   :  { %v2908_v48 = vpop.f32.mrb[62].mxu0  ;;  %v2966_v49 = vpop.f32.mrb[82].mxu1  ;;  %v3492_v47 = vld [vmem:[#allocation19 + $0xc] sm:$0xf] }
 0xc0c   :  { %v12525_v50 = vpop.f32.mrb[63].mxu0  ;;  %v12533_v51 = vpop.f32.mrb[83].mxu1  ;;  %v3497_v49 = vsel %vm2482_vm11, %v3492_v47, 0 }
 0xc11   :  { %v3009_v52 = vpop.f32.mrb[64].mxu0 }
 0xc12   :  { %v3015_v53 = vpack.c.bf16 %v3009_v52, %v3009_v52  ;;  %v12538_v54 = vpop.f32.mrb[65].mxu0 }
 0xc13   :  { %v3012_v55 = vpop.f32.mrb[66].mxu0 }
 0xc14   :  { %v12539_v56 = vpop.f32.mrb[67].mxu0  ;;  %12545 = vmatmul.mubr.msk.bf16.vlgmr.msra.gmra.mrb[84].mxu1 %vm1578_vm8, %v3015_v53  ;;  %12553 = vmatmul.mubr.msk.bf16.vlgmr.msra.gmra.mrb[68].mxu0 %vm1578_vm8, %v3015_v53 }
 0xc15   :  { %12558 = vmatprep.mubr.msk.bf16.mxu1 %vm14581_vm3, %v14580_v30  ;;  %12564 = vmatprep.mubr.msk.bf16.mxu0 %vm14581_vm3, %v14580_v30 }
 0xce7   :  { %v3070_v57 = vpop.f32.mrb[84].mxu1  ;;  %v3128_v59 = vpop.f32.mrb[68].mxu0 }
 0xce8   :  { %v3076_v61 = vadd.f32 %v3070_v57, %v2911_v29  ;;  %v3134_v62 = vadd.f32 %v3128_v59, %v2969_v31  ;;  %v12546_v63 = vpop.f32.mrb[85].mxu1  ;;  %v12554_v0 = vpop.f32.mrb[69].mxu0  ;;  %v13926_v57 = vld [vmem:[%s16198_s16 + $0x10] sm:$0xff]  }
 0xce9   :  { %v3073_v1 = vpop.f32.mrb[86].mxu1  ;;  %v3131_v2 = vpop.f32.mrb[70].mxu0  ;;  %v3159_v63 = vld [vmem:[%s16197_s15] sm:$0xff] }
 0xcea   :  { %v3142_v3 = vadd.f32 %v10928_v58, %v3076_v61  ;;  %v3150_v4 = vadd.f32 %v10929_v60, %v3134_v62  ;;  %v12547_v5 = vpop.f32.mrb[87].mxu1  ;;  %v12555_v6 = vpop.f32.mrb[71].mxu0  ;;  %v13930_v58 = vld [vmem:[%s16198_s16] sm:$0xff]  }
 0xcec   :  { %3151 = vst.msk [vmem:[%s16208_s26] sm:$0xff] %vm2478_vm12, %v3142_v3  ;;  %3152 = vst.msk [vmem:[%s16209_s27] sm:$0xff] %vm2478_vm12, %v3150_v4  ;;  %v3154_v7 = vmul.f32 0.5, %v3150_v4  ;;  %s16251_s27 = sld [smem:[#allocation50_spill]] }
 0xcee   :  { %v3155_v8 = vmul.f32 1.442695, %v3154_v7  ;;  %v13944_v7 = vld [vmem:[#allocation21 + $0x10] sm:$0xff]  }
 0xcf0   :  { %14124 = vpow2.f32 %v3155_v8 }
 0xcfa   :  { %v14125_v10 = vpop.eup %14124 }
 0xcfb   :  { %v3157_v11 = vmul.f32 %v14125_v10, %v3153_v9  ;;  %v13927_v9 = vld [vmem:[%s16198_s16 + $0x18] sm:$0xff]   ;;  %v13931_v10 = vld [vmem:[%s16198_s16 + $0x8] sm:$0xff]  }
 0xcfd   :  { %v3158_v12 = vadd.f32 %v3157_v11, %v3142_v3  ;;  %v13928_v11 = vld [vmem:[%s16198_s16 + $0x20] sm:$0xff]  }
 0xcff   :  { %v3160_v13 = vpack.c.bf16 %v3158_v12, %v3158_v12  ;;  %v13929_v12 = vld [vmem:[%s16198_s16 + $0x28] sm:$0xff]  }
 0xd01   :  { %v3166_v15 = vsel %vm2482_vm11, %v3160_v13, 0  ;;  %v13932_v13 = vld [vmem:[%s16198_s16 + $0x30] sm:$0xff]  }
 0xd02   :  { %12557 = vmatpush3.bf16.msra.mxu1 %v3166_v15  ;;  %12563 = vmatpush3.bf16.msra.mxu0 %v3166_v15 }
 0xd03   :  { %12568 = vmatprep.subr.bf16.mxu1 %v14580_v30  ;;  %12574 = vmatprep.subr.bf16.mxu0 %v14580_v30 }
 0xd05   :  { %12559 = vmatmul.mubr.msk.bf16.vlgmr.msra.gmra.mrb[88].mxu1 %vm2478_vm12, %v3161_v16  ;;  %12565 = vmatmul.mubr.msk.bf16.vlgmr.msra.gmra.mrb[72].mxu0 %vm2478_vm12, %v3211_v18  ;;  %v13935_v16 = vld [vmem:[%s16198_s16 + $0x48] sm:$0xff]   ;;  %v13936_v18 = vld [vmem:[%s16198_s16 + $0x50] sm:$0xff]  }
 0xd06   :  { %12569 = vmatpush3.bf16.msra.mxu1 %v3262_v19  ;;  %12570 = vmatprep.mubr.msk.bf16.mxu1 %vm14581_vm3, %v14580_v30  ;;  %v13937_v19 = vld [vmem:[%s16198_s16 + $0x58] sm:$0xff]  }
 0xd07   :  { %12576 = vmatprep.mubr.msk.bf16.mxu0 %vm14581_vm3, %v14580_v30  ;;  %12580 = vmatprep.subr.bf16.mxu1 %v14580_v30 }
 0xd08   :  { %12575 = vmatpush3.bf16.msra.mxu0 %v3308_v21  ;;  %v13939_v21 = vld [vmem:[%s16198_s16 + $0x68] sm:$0xff]  }
 0xd09   :  { %12586 = vmatprep.subr.bf16.mxu0 %v14580_v30 }
 0xdd8   :  { %v3202_v22 = vpop.f32.mrb[88].mxu1  ;;  %v3249_v27 = vpop.f32.mrb[72].mxu0 }
 0xdd9   :  { %v3208_v32 = vpack.c.bf16 %v3202_v22, %v3202_v22  ;;  %v3255_v33 = vpack.c.bf16 %v3249_v27, %v3249_v27  ;;  %v12566_v34 = vpop.f32.mrb[73].mxu0  ;;  %v12560_v35 = vpop.f32.mrb[89].mxu1  ;;  %v13940_v22 = vld [vmem:[%s16198_s16 + $0x70] sm:$0xff]   ;;  %v13941_v27 = vld [vmem:[%s16198_s16 + $0x78] sm:$0xff]  }
 0xdda   :  { %v3252_v36 = vpop.f32.mrb[74].mxu0  ;;  %v3205_v37 = vpop.f32.mrb[90].mxu1  ;;  %v13945_v34 = vld [vmem:[#allocation21 + $0x18] sm:$0xff]   ;;  %v13946_v35 = vld [vmem:[#allocation21] sm:$0xff]  }
 0xddb   :  { %v12567_v39 = vpop.f32.mrb[75].mxu0  ;;  %12571 = vmatmul.mubr.msk.bf16.vlgmr.msra.gmra.mrb[92].mxu1 %vm2478_vm12, %v3255_v33  ;;  %12577 = vmatmul.mubr.msk.bf16.vlgmr.msra.gmra.mrb[76].mxu0 %vm2478_vm12, %v3208_v32  ;;  %v12561_v40 = vpop.f32.mrb[91].mxu1  ;;  %v13942_v32 = vld [vmem:[%s16198_s16 + $0x80] sm:$0xff]   ;;  %v13943_v33 = vld [vmem:[%s16198_s16 + $0x88] sm:$0xff]  }
 0xddc   :  { %12581 = vmatpush3.bf16.msra.mxu1 %v3166_v15  ;;  %12582 = vmatprep.mubr.msk.bf16.mxu1 %vm14581_vm3, %v14580_v30 }
 0xddd   :  { %12592 = vmatprep.subr.bf16.mxu1 %v14580_v30  ;;  %12588 = vmatprep.mubr.msk.bf16.mxu0 %vm14581_vm3, %v14580_v30 }
 0xdde   :  { %12587 = vmatpush3.bf16.msra.mxu0 %v3402_v43 }
 0xddf   :  { %12598 = vmatprep.subr.bf16.mxu0 %v14580_v30 }
 0xde3   :  { %12583 = vmatmul.mubr.msk.bf16.vlgmr.msra.gmra.mrb[96].mxu1 %vm2478_vm12, %v3351_v38 }
 0xde4   :  { %12593 = vmatpush3.bf16.msra.mxu1 %v3166_v15  ;;  %12594 = vmatprep.mubr.msk.bf16.mxu1 %vm14581_vm3, %v14580_v30  ;;  %v13934_v15 = vld [vmem:[%s16198_s16 + $0x40] sm:$0xff]  }
 0xdeb   :  { %12595 = vmatmul.mubr.msk.bf16.vlgmr.msra.gmra.mrb[100].mxu1 %vm2478_vm12, %v3446_v41 }
 0xdec   :  { %12606 = vmatprep.mubr.msk.bf16.mxu1 %vm2478_vm12, %v13930_v58 }
 0xeae   :  { %v3298_v44 = vpop.f32.mrb[92].mxu1  ;;  %v3344_v23 = vpop.f32.mrb[76].mxu0 }
 0xeaf   :  { %v3345_v24 = vadd.f32 %v3344_v23, %v3298_v44  ;;  %v12572_v25 = vpop.f32.mrb[93].mxu1  ;;  %v12578_v26 = vpop.f32.mrb[77].mxu0 }
 0xeb0   :  { %v3301_v28 = vpop.f32.mrb[94].mxu1  ;;  %v3347_v45 = vpop.f32.mrb[78].mxu0  ;;  %v13947_v26 = vld [vmem:[#allocation21 + $0x8] sm:$0xff]  }
 0xeb1   :  { %v12573_v46 = vpop.f32.mrb[95].mxu1  ;;  %v12579_v29 = vpop.f32.mrb[79].mxu0  ;;  %v13948_v45 = vld [vmem:[#allocation21 + $0x20] sm:$0xff]  }
 0xeb6   :  { %v3389_v17 = vpop.f32.mrb[96].mxu1 }
 0xeb7   :  { %v3395_v31 = vpack.c.bf16 %v3389_v17, %v3389_v17  ;;  %v12584_v48 = vpop.f32.mrb[97].mxu1 }
 0xeb8   :  { %v3392_v50 = vpop.f32.mrb[98].mxu1 }
 0xeb9   :  { %v12585_v51 = vpop.f32.mrb[99].mxu1  ;;  %12589 = vmatmul.mubr.msk.bf16.vlgmr.msra.gmra.mrb[80].mxu0 %vm2478_vm12, %v3395_v31 }
 0xeba   :  { %12599 = vmatpush3.bf16.msra.mxu0 %v3497_v49  ;;  %12600 = vmatprep.mubr.msk.bf16.mxu0 %vm14581_vm3, %v14580_v30  ;;  %v13949_v49 = vld [vmem:[#allocation21 + $0x28] sm:$0xff]  }
 0xebe   :  { %v3484_v52 = vpop.f32.mrb[100].mxu1 }
 0xebf   :  { %v3490_v53 = vpack.c.bf16 %v3484_v52, %v3484_v52  ;;  %v12596_v54 = vpop.f32.mrb[101].mxu1 }
 0xec0   :  { %v3487_v55 = vpop.f32.mrb[102].mxu1 }
 0xec1   :  { %v12597_v56 = vpop.f32.mrb[103].mxu1  ;;  %12601 = vmatmul.mubr.msk.bf16.vlgmr.msra.gmra.mrb[84].mxu0 %vm2478_vm12, %v3490_v53  ;;  %v13950_v55 = vld [vmem:[#allocation21 + $0x30] sm:$0xff]  }
 0xec2   :  { %12612 = vmatprep.mubr.msk.bf16.mxu0 %vm2478_vm12, %v13926_v57 }
 0xf8c   :  { %v3438_v30 = vpop.f32.mrb[80].mxu0 }
 0xf8d   :  { %v3444_v59 = vadd.f32 %v3438_v30, %v3345_v24  ;;  %v12590_v60 = vpop.f32.mrb[81].mxu0 }
 0xf8e   :  { %v3441_v61 = vpop.f32.mrb[82].mxu0 }
 0xf8f   :  { %v12591_v62 = vpop.f32.mrb[83].mxu0  ;;  %v13951_v61 = vld [vmem:[#allocation21 + $0x38] sm:$0xff]  }
 0xf94   :  { %v3533_v0 = vpop.f32.mrb[84].mxu0 }
 0xf95   :  { %v3539_v1 = vadd.f32 %v3533_v0, %v3444_v59  ;;  %v12602_v2 = vpop.f32.mrb[85].mxu0 }
 0xf96   :  { %v3536_v3 = vpop.f32.mrb[86].mxu0 }
 0xf97   :  { %v3540_v4 = vadd.f32 %v3539_v1, %v3159_v63  ;;  %v12603_v5 = vpop.f32.mrb[87].mxu0  ;;  %v13952_v63 = vld [vmem:[#allocation21 + $0x40] sm:$0xff]  }
 0xf99   :  { %v3542_v6 = vpack.c.bf16 %v3540_v4, %v3540_v4 }
 0xf9b   :  { %13842 = vmatprep.subr.msk.bf16.mxu1 %vm2482_vm11, %v3542_v6  ;;  %13843 = vmatprep.subr.msk.bf16.mxu0 %vm2482_vm11, %v3542_v6  ;;  %v3564_v8 = vsel %vm2482_vm11, %v3542_v6, 0 }
 0xf9c   :  { %12605 = vmatpush3.bf16.msra.mxu1 %v3564_v8  ;;  %12611 = vmatpush3.bf16.msra.mxu0 %v3564_v8 }
 0xf9d   :  { %13844 = vmatprep.subr.msk.bf16.mxu0 %vm2482_vm11, %v3542_v6  ;;  %12616 = vmatprep.subr.bf16.mxu1 %v13944_v7 }
 0xf9f   :  { %12613 = vmatmul.mubr.msk.bf16.vlgmr.msra.gmra.mrb[88].mxu0 %vm2478_vm12, %v13927_v9  ;;  %12607 = vmatmul.mubr.msk.bf16.vlgmr.msra.gmra.mrb[104].mxu1 %vm2478_vm12, %v13931_v10 }
 0xfa0   :  { %12633 = vmatpush3.bf16.msra.mxu0 %v3564_v8  ;;  %12634 = vmatprep.mubr.msk.bf16.mxu0 %vm2478_vm12, %v13928_v11 }
 0xfa1   :  { %13845 = vmatprep.subr.msk.bf16.mxu0 %vm2482_vm11, %v3542_v6  ;;  %12617 = vmatpush3.bf16.msra.mxu1 %v13944_v7 }
 0xfa2   :  { %12618 = vmatprep.subr.bf16.mxu1 %v13945_v34 }
 0xfa5   :  { %12619 = vmatpush3.bf16.msra.mxu1 %v13945_v34 }
 0xfa6   :  { %12624 = vmatprep.subr.bf16.mxu1 %v13946_v35 }
 0xfa7   :  { %12635 = vmatmul.mubr.msk.bf16.vlgmr.msra.gmra.mrb[92].mxu0 %vm2478_vm12, %v13929_v12  ;;  %v13954_v12 = vld [vmem:[#allocation21 + $0x50] sm:$0xff]  }
 0xfa8   :  { %12647 = vmatpush3.bf16.msra.mxu0 %v3564_v8  ;;  %12648 = vmatprep.mubr.msk.bf16.mxu0 %vm2478_vm12, %v13932_v13 }
 0xfa9   :  { %13846 = vmatprep.subr.msk.bf16.mxu0 %vm2482_vm11, %v3542_v6 }
 0xfaf   :  { %12649 = vmatmul.mubr.msk.bf16.vlgmr.msra.gmra.mrb[96].mxu0 %vm2478_vm12, %v13933_v14 }
 0xfb0   :  { %12661 = vmatpush3.bf16.msra.mxu0 %v3564_v8  ;;  %12662 = vmatprep.mubr.msk.bf16.mxu0 %vm2478_vm12, %v13934_v15 }
 0xfb1   :  { %13847 = vmatprep.subr.msk.bf16.mxu0 %vm2482_vm11, %v3542_v6 }
 0xfb7   :  { %12663 = vmatmul.mubr.msk.bf16.vlgmr.msra.gmra.mrb[100].mxu0 %vm2478_vm12, %v13935_v16 }
 0xfb8   :  { %12675 = vmatpush3.bf16.msra.mxu0 %v3564_v8  ;;  %12676 = vmatprep.mubr.msk.bf16.mxu0 %vm2478_vm12, %v13936_v18 }
 0xfb9   :  { %13848 = vmatprep.subr.msk.bf16.mxu0 %vm2482_vm11, %v3542_v6 }
 0xfbf   :  { %12677 = vmatmul.mubr.msk.bf16.vlgmr.msra.gmra.mrb[104].mxu0 %vm2478_vm12, %v13937_v19 }
 0xfc0   :  { %12689 = vmatpush3.bf16.msra.mxu0 %v3564_v8  ;;  %12690 = vmatprep.mubr.msk.bf16.mxu0 %vm2478_vm12, %v13938_v20  ;;  %v13955_v20 = vld [vmem:[#allocation21 + $0x58] sm:$0xff]  }
 0xfc1   :  { %13849 = vmatprep.subr.msk.bf16.mxu0 %vm2482_vm11, %v3542_v6 }
 0xfc7   :  { %12691 = vmatmul.mubr.msk.bf16.vlgmr.msra.gmra.mrb[108].mxu0 %vm2478_vm12, %v13939_v21 }
 0xfc8   :  { %12703 = vmatpush3.bf16.msra.mxu0 %v3564_v8  ;;  %12704 = vmatprep.mubr.msk.bf16.mxu0 %vm2478_vm12, %v13940_v22  ;;  %v13956_v22 = vld [vmem:[#allocation21 + $0x60] sm:$0xff]  }
 0xfc9   :  { %13850 = vmatprep.subr.msk.bf16.mxu0 %vm2482_vm11, %v3542_v6  ;;  %v13953_v6 = vld [vmem:[#allocation21 + $0x48] sm:$0xff]  }
 0xfcf   :  { %12705 = vmatmul.mubr.msk.bf16.vlgmr.msra.gmra.mrb[112].mxu0 %vm2478_vm12, %v13941_v27 }
 0xfd0   :  { %12717 = vmatpush3.bf16.msra.mxu0 %v3564_v8  ;;  %12718 = vmatprep.mubr.msk.bf16.mxu0 %vm2478_vm12, %v13942_v32 }
 0xfd7   :  { %12719 = vmatmul.mubr.msk.bf16.vlgmr.msra.gmra.mrb[116].mxu0 %vm2478_vm12, %v13943_v33 }
0x1072   :  { %v12614_v36 = vpop.f32.mrb[88].mxu0  ;;  %v12608_v37 = vpop.f32.mrb[104].mxu1 }
0x1073   :  { %v3676_v39 = vpop.f32.mrb[89].mxu0  ;;  %v3600_v40 = vpop.f32.mrb[105].mxu1 }
0x1074   :  { %v12615_v38 = vpop.f32.mrb[90].mxu0  ;;  %v12609_v41 = vpop.f32.mrb[106].mxu1 }
0x1075   :  { %v3692_v42 = vpack.c.bf16 %v12615_v38, %v12614_v36  ;;  %v3679_v43 = vpop.f32.mrb[91].mxu0  ;;  %v3616_v44 = vpack.c.bf16 %v12609_v41, %v12608_v37  ;;  %v3603_v23 = vpop.f32.mrb[107].mxu1  ;;  %v13957_v36 = vld [vmem:[#allocation21 + $0x68] sm:$0xff]   ;;  %v13958_v37 = vld [vmem:[#allocation21 + $0x70] sm:$0xff]  }
0x1076   :  { %v3691_v24 = vpack.c.bf16 %v3679_v43, %v3676_v39  ;;  %v3615_v25 = vpack.c.bf16 %v3603_v23, %v3600_v40  ;;  %v13959_v39 = vld [vmem:[#allocation21 + $0x78] sm:$0xff]   ;;  %v13960_v40 = vld [vmem:[#allocation21 + $0x80] sm:$0xff]   ;;  %v13961_v38 = vld [vmem:[#allocation21 + $0x88] sm:$0xff]  }
0x1077   :  { %v13962_v41 = vld [vmem:[#allocation22 + $0x40] sm:$0xff]   ;;  %v11042_v43 = vld [vmem:[%s16200_s18] ss:$0 sm:$0xff] }
0x1078   :  { %12620 = vmatprep.mubr.msk.bf16.mxu1 %vm1578_vm8, %v3691_v24 }
0x1079   :  { %12621 = vmatmul.mubr.msk.bf16.vlgmr.msra.gmra.mrb[108].mxu1 %vm1578_vm8, %v3692_v42  ;;  %v13970_v42 = vld [vmem:[#allocation22] sm:$0xff]  }
0x107a   :  { %12625 = vmatpush3.bf16.msra.mxu1 %v13946_v35  ;;  %12628 = vmatprep.mubr.msk.bf16.mxu1 %vm1578_vm8, %v3615_v25  ;;  %v12636_v28 = vpop.f32.mrb[92].mxu0 }
0x107b   :  { %12626 = vmatprep.subr.bf16.mxu1 %v13947_v26  ;;  %v3887_v46 = vpop.f32.mrb[93].mxu0  ;;  %12734 = vmatprep.mubr.msk.bf16.mxu0 %vm1578_vm8, %v13970_v42  ;;  %v14006_v42 = vld [vmem:[#allocation22 + $0x160] sm:$0xff]  }
0x107c   :  { %v12637_v29 = vpop.f32.mrb[94].mxu0 }
0x107d   :  { %v3903_v47 = vpack.c.bf16 %v12637_v29, %v12636_v28  ;;  %v3890_v17 = vpop.f32.mrb[95].mxu0 }
0x107e   :  { %12627 = vmatpush3.bf16.msra.mxu1 %v13947_v26  ;;  %v3902_v31 = vpack.c.bf16 %v3890_v17, %v3887_v46 }
0x107f   :  { %12638 = vmatprep.subr.bf16.mxu1 %v13948_v45 }
0x1082   :  { %v12650_v48 = vpop.f32.mrb[96].mxu0 }
0x1083   :  { %v4035_v50 = vpop.f32.mrb[97].mxu0 }
0x1084   :  { %v12651_v51 = vpop.f32.mrb[98].mxu0 }
0x1085   :  { %12629 = vmatmul.mubr.msk.bf16.vlgmr.msra.gmra.mrb[108].mxu1 %vm1578_vm8, %v3616_v44  ;;  %v4051_v52 = vpack.c.bf16 %v12651_v51, %v12650_v48  ;;  %v4038_v53 = vpop.f32.mrb[99].mxu0 }
0x1086   :  { %12639 = vmatpush3.bf16.msra.mxu1 %v13948_v45  ;;  %12642 = vmatprep.mubr.msk.bf16.mxu1 %vm1578_vm8, %v3902_v31  ;;  %v4050_v54 = vpack.c.bf16 %v4038_v53, %v4035_v50 }
0x1087   :  { %12640 = vmatprep.subr.bf16.mxu1 %v13949_v49 }
0x108a   :  { %12641 = vmatpush3.bf16.msra.mxu1 %v13949_v49  ;;  %v12664_v56 = vpop.f32.mrb[100].mxu0 }
0x108b   :  { %12652 = vmatprep.subr.bf16.mxu1 %v13950_v55  ;;  %v4183_v57 = vpop.f32.mrb[101].mxu0 }
0x108c   :  { %v12665_v58 = vpop.f32.mrb[102].mxu0 }
0x108d   :  { %v4199_v30 = vpack.c.bf16 %v12665_v58, %v12664_v56  ;;  %v4186_v59 = vpop.f32.mrb[103].mxu0  ;;  %v13964_v56 = vld [vmem:[#allocation22 + $0x50] sm:$0xff]   ;;  %v13965_v58 = vld [vmem:[#allocation22 + $0x58] sm:$0xff]  }
0x108e   :  { %v4198_v60 = vpack.c.bf16 %v4186_v59, %v4183_v57  ;;  %v13974_v57 = vld [vmem:[#allocation22 + $0x10] sm:$0xff]   ;;  %v13966_v59 = vld [vmem:[#allocation22 + $0x60] sm:$0xff]  }
0x1091   :  { %12643 = vmatmul.mubr.msk.bf16.vlgmr.msra.gmra.mrb[108].mxu1 %vm1578_vm8, %v3903_v47 }
0x1092   :  { %12653 = vmatpush3.bf16.msra.mxu1 %v13950_v55  ;;  %12656 = vmatprep.mubr.msk.bf16.mxu1 %vm1578_vm8, %v4050_v54  ;;  %v12678_v62 = vpop.f32.mrb[104].mxu0  ;;  %v13963_v54 = vld [vmem:[#allocation22 + $0x48] sm:$0xff]  }
0x1093   :  { %12654 = vmatprep.subr.bf16.mxu1 %v13951_v61  ;;  %v4331_v0 = vpop.f32.mrb[105].mxu0  ;;  %v13972_v55 = vld [vmem:[#allocation22 + $0x8] sm:$0xff]  }
0x1094   :  { %v12679_v1 = vpop.f32.mrb[106].mxu0 }
0x1095   :  { %v4347_v2 = vpack.c.bf16 %v12679_v1, %v12678_v62  ;;  %v4334_v3 = vpop.f32.mrb[107].mxu0  ;;  %v13980_v62 = vld [vmem:[#allocation22 + $0x28] sm:$0xff]   ;;  %v13969_v1 = vld [vmem:[#allocation22 + $0x78] sm:$0xff]  }
0x1096   :  { %12655 = vmatpush3.bf16.msra.mxu1 %v13951_v61  ;;  %v4346_v4 = vpack.c.bf16 %v4334_v3, %v4331_v0  ;;  %v13967_v61 = vld [vmem:[#allocation22 + $0x68] sm:$0xff]   ;;  %v13982_v0 = vld [vmem:[#allocation22 + $0x30] sm:$0xff]   ;;  %v13971_v3 = vld [vmem:[#allocation22 + $0x80] sm:$0xff]  }
0x1097   :  { %12666 = vmatprep.subr.bf16.mxu1 %v13952_v63 }
0x109a   :  { %v12692_v5 = vpop.f32.mrb[108].mxu0 }
0x109b   :  { %v4479_v7 = vpop.f32.mrb[109].mxu0 }
0x109c   :  { %v12693_v8 = vpop.f32.mrb[110].mxu0 }
0x109d   :  { %12657 = vmatmul.mubr.msk.bf16.vlgmr.msra.gmra.mrb[108].mxu1 %vm1578_vm8, %v4051_v52  ;;  %v4495_v9 = vpack.c.bf16 %v12693_v8, %v12692_v5  ;;  %v4482_v10 = vpop.f32.mrb[111].mxu0  ;;  %v13975_v5 = vld [vmem:[#allocation22 + $0x90] sm:$0xff]   ;;  %v13981_v8 = vld [vmem:[#allocation22 + $0xa8] sm:$0xff]  }
0x109e   :  { %12667 = vmatpush3.bf16.msra.mxu1 %v13952_v63  ;;  %12670 = vmatprep.mubr.msk.bf16.mxu1 %vm1578_vm8, %v4198_v60  ;;  %v4494_v11 = vpack.c.bf16 %v4482_v10, %v4479_v7  ;;  %v13978_v60 = vld [vmem:[#allocation22 + $0x20] sm:$0xff]   ;;  %v13968_v63 = vld [vmem:[#allocation22 + $0x70] sm:$0xff]   ;;  %v13985_v10 = vld [vmem:[#allocation22 + $0xb8] sm:$0xff]  }
0x109f   :  { %12668 = vmatprep.subr.bf16.mxu1 %v13953_v6  ;;  %v13979_v7 = vld [vmem:[#allocation22 + $0xa0] sm:$0xff]  }
0x10a2   :  { %12669 = vmatpush3.bf16.msra.mxu1 %v13953_v6  ;;  %v12706_v13 = vpop.f32.mrb[112].mxu0  ;;  %v13977_v6 = vld [vmem:[#allocation22 + $0x98] sm:$0xff]  }
0x10a3   :  { %12680 = vmatprep.subr.bf16.mxu1 %v13954_v12  ;;  %v4627_v14 = vpop.f32.mrb[113].mxu0 }
0x10a4   :  { %v12707_v15 = vpop.f32.mrb[114].mxu0 }
0x10a5   :  { %v4643_v16 = vpack.c.bf16 %v12707_v15, %v12706_v13  ;;  %v4630_v18 = vpop.f32.mrb[115].mxu0  ;;  %v13987_v13 = vld [vmem:[#allocation22 + $0xc8] sm:$0xff]   ;;  %v13989_v15 = vld [vmem:[#allocation22 + $0xd8] sm:$0xff]  }
0x10a6   :  { %v4642_v19 = vpack.c.bf16 %v4630_v18, %v4627_v14  ;;  %v13988_v14 = vld [vmem:[#allocation22 + $0xd0] sm:$0xff]   ;;  %v13991_v18 = vld [vmem:[#allocation22 + $0xe8] sm:$0xff]  }
0x10a9   :  { %12671 = vmatmul.mubr.msk.bf16.vlgmr.msra.gmra.mrb[108].mxu1 %vm1578_vm8, %v4199_v30  ;;  %v13976_v30 = vld [vmem:[#allocation22 + $0x18] sm:$0xff]  }
0x10aa   :  { %12681 = vmatpush3.bf16.msra.mxu1 %v13954_v12  ;;  %12684 = vmatprep.mubr.msk.bf16.mxu1 %vm1578_vm8, %v4346_v4  ;;  %v12720_v21 = vpop.f32.mrb[116].mxu0  ;;  %v13973_v4 = vld [vmem:[#allocation22 + $0x88] sm:$0xff]   ;;  %v14018_v12 = vld [vmem:[%s16250_s20 + $0x8] sm:$0xff]  }
0x10ab   :  { %12682 = vmatprep.subr.bf16.mxu1 %v13955_v20  ;;  %v4775_v27 = vpop.f32.mrb[117].mxu0 }
0x10ac   :  { %v12721_v32 = vpop.f32.mrb[118].mxu0 }
0x10ad   :  { %v4791_v33 = vpack.c.bf16 %v12721_v32, %v12720_v21  ;;  %v4778_v34 = vpop.f32.mrb[119].mxu0  ;;  %v13994_v21 = vld [vmem:[#allocation22 + $0x100] sm:$0xff]   ;;  %v15620_v32 = vld [vmem:[%s16250_s20] sm:$0xff]  }
0x10ae   :  { %12683 = vmatpush3.bf16.msra.mxu1 %v13955_v20  ;;  %v4790_v35 = vpack.c.bf16 %v4778_v34, %v4775_v27  ;;  %v13993_v20 = vld [vmem:[#allocation22 + $0xf8] sm:$0xff]   ;;  %v13996_v27 = vld [vmem:[#allocation22 + $0x110] sm:$0xff]   ;;  %v13998_v34 = vld [vmem:[#allocation22 + $0x120] sm:$0xff]  }
0x10af   :  { %12694 = vmatprep.subr.bf16.mxu1 %v13956_v22 }
0x10b5   :  { %12685 = vmatmul.mubr.msk.bf16.vlgmr.msra.gmra.mrb[108].mxu1 %vm1578_vm8, %v4347_v2  ;;  %v13984_v2 = vld [vmem:[#allocation22 + $0x38] sm:$0xff]  }
0x10b6   :  { %12695 = vmatpush3.bf16.msra.mxu1 %v13956_v22  ;;  %12698 = vmatprep.mubr.msk.bf16.mxu1 %vm1578_vm8, %v4494_v11  ;;  %v13986_v11 = vld [vmem:[#allocation22 + $0xc0] sm:$0xff]   ;;  %v13995_v22 = vld [vmem:[#allocation22 + $0x108] sm:$0xff]  }
0x10b7   :  { %12696 = vmatprep.subr.bf16.mxu1 %v13957_v36 }
0x10ba   :  { %12697 = vmatpush3.bf16.msra.mxu1 %v13957_v36  ;;  %v14000_v36 = vld [vmem:[#allocation22 + $0x130] sm:$0xff]  }
0x10bb   :  { %12708 = vmatprep.subr.bf16.mxu1 %v13958_v37 }
0x10c1   :  { %12699 = vmatmul.mubr.msk.bf16.vlgmr.msra.gmra.mrb[108].mxu1 %vm1578_vm8, %v4495_v9  ;;  %v13983_v9 = vld [vmem:[#allocation22 + $0xb0] sm:$0xff]  }
0x10c2   :  { %12709 = vmatpush3.bf16.msra.mxu1 %v13958_v37  ;;  %12712 = vmatprep.mubr.msk.bf16.mxu1 %vm1578_vm8, %v4642_v19  ;;  %v13992_v19 = vld [vmem:[#allocation22 + $0xf0] sm:$0xff]   ;;  %v14001_v37 = vld [vmem:[#allocation22 + $0x138] sm:$0xff]  }
0x10c3   :  { %12710 = vmatprep.subr.bf16.mxu1 %v13959_v39 }
0x10c6   :  { %12711 = vmatpush3.bf16.msra.mxu1 %v13959_v39  ;;  %v14002_v39 = vld [vmem:[#allocation22 + $0x140] sm:$0xff]  }
0x10c7   :  { %12722 = vmatprep.subr.bf16.mxu1 %v13960_v40 }
0x10cd   :  { %12713 = vmatmul.mubr.msk.bf16.vlgmr.msra.gmra.mrb[108].mxu1 %vm1578_vm8, %v4643_v16  ;;  %v13990_v16 = vld [vmem:[#allocation22 + $0xe0] sm:$0xff]  }
0x10ce   :  { %12723 = vmatpush3.bf16.msra.mxu1 %v13960_v40  ;;  %12726 = vmatprep.mubr.msk.bf16.mxu1 %vm1578_vm8, %v4790_v35  ;;  %v13999_v35 = vld [vmem:[#allocation22 + $0x128] sm:$0xff]  }
0x10cf   :  { %12724 = vmatprep.subr.bf16.mxu1 %v13961_v38  ;;  %v14003_v40 = vld [vmem:[#allocation22 + $0x148] sm:$0xff]  }
0x10d2   :  { %12725 = vmatpush3.bf16.msra.mxu1 %v13961_v38  ;;  %v14004_v38 = vld [vmem:[#allocation22 + $0x150] sm:$0xff]  }
0x10d9   :  { %12727 = vmatmul.mubr.msk.bf16.vlgmr.msra.gmra.mrb[108].mxu1 %vm1578_vm8, %v4791_v33  ;;  %v13997_v33 = vld [vmem:[#allocation22 + $0x118] sm:$0xff]  }
0x10da   :  { %12754 = vmatprep.mubr.msk.bf16.mxu1 %vm1578_vm8, %v13962_v41  ;;  %v14005_v41 = vld [vmem:[#allocation22 + $0x158] sm:$0xff]  }
0x11ac   :  { %v12728_v44 = vpop.f32.mrb[108].mxu1 }
0x11ad   :  { %v4876_v23 = vadd.f32 %v12728_v44, %v11042_v43  ;;  %v4849_v24 = vpop.f32.mrb[109].mxu1  ;;  %v14008_v44 = vld [vmem:[#allocation22 + $0x170] sm:$0xff]  }
0x11ae   :  { %v4874_v25 = vadd.f32 %v11042_v43, %v4849_v24  ;;  %v12729_v26 = vpop.f32.mrb[110].mxu1  ;;  %v14010_v24 = vld [vmem:[#allocation22 + $0x180] sm:$0xff]  }
0x11af   :  { %v4884_v28 = vmul.f32 0.01, %v4876_v23  ;;  %v4877_v45 = vadd.f32 %v12729_v26, %v11042_v43  ;;  %v4852_v46 = vpop.f32.mrb[111].mxu1  ;;  %vm4880_vm13 = vcmp.ge.f32.partialorder %v4876_v23, 0.0  ;;  %v14012_v26 = vld [vmem:[#allocation22 + $0x190] sm:$0xff]  }
0x11b0   :  { %v4882_v29 = vmul.f32 0.01, %v4874_v25  ;;  %v4875_v47 = vadd.f32 %v11042_v43, %v4852_v46  ;;  %vm4878_vm14 = vcmp.ge.f32.partialorder %v4874_v25, 0.0  ;;  %v14007_v43 = vld [vmem:[#allocation22 + $0x168] sm:$0xff]  }
0x11b1   :  { %vm4881_vm15 = vcmp.ge.f32.partialorder %v4877_v45, 0.0  ;;  %v4885_v17 = vmul.f32 0.01, %v4877_v45  ;;  %v4888_v48 = vsel %vm4880_vm13, %v4876_v23, %v4884_v28  ;;  %v14009_v23 = vld [vmem:[#allocation22 + $0x178] sm:$0xff]   ;;  %v14015_v46 = vld [vmem:[#allocation22 + $0x1a8] sm:$0xff]  }
0x11b2   :  { %vm4879_vm0 = vcmp.ge.f32.partialorder %v4875_v47, 0.0  ;;  %v4883_v31 = vmul.f32 0.01, %v4875_v47  ;;  %v4886_v50 = vsel %vm4878_vm14, %v4874_v25, %v4882_v29  ;;  %v14011_v25 = vld [vmem:[#allocation22 + $0x188] sm:$0xff]   ;;  %v14013_v28 = vld [vmem:[#allocation22 + $0x198] sm:$0xff]   ;;  %v14016_v29 = vld [vmem:[#allocation22 + $0x1b0] sm:$0xff]  }
0x11b3   :  { %v4889_v49 = vsel %vm4881_vm15, %v4877_v45, %v4885_v17  ;;  %v14014_v45 = vld [vmem:[#allocation22 + $0x1a0] sm:$0xff]  }
0x11b4   :  { %v15558_v51 = vpack.c.bf16 %v4889_v49, %v4888_v48  ;;  %v4887_v52 = vsel %vm4879_vm0, %v4875_v47, %v4883_v31  ;;  %v14017_v47 = vld [vmem:[#allocation22 + $0x1b8] sm:$0xff]   ;;  %v14019_v17 = vld [vmem:[#allocation22 + $0x1c0] sm:$0xff]   ;;  %v14020_v31 = vld [vmem:[#allocation22 + $0x1c8] sm:$0xff]  }
0x11b5   :  { %v15560_v53 = vpack.c.bf16 %v4887_v52, %v4886_v50  ;;  %v14022_v48 = vld [vmem:[#allocation22 + $0x1d0] sm:$0xff]   ;;  %v14023_v49 = vld [vmem:[#allocation22 + $0x1d8] sm:$0xff]   ;;  %v14024_v50 = vld [vmem:[#allocation22 + $0x1e0] sm:$0xff]  }
0x11b6   :  { %v14025_v52 = vld [vmem:[#allocation22 + $0x1e8] sm:$0xff]  }
0x11b7   :  { %12730 = vmatprep.subr.bf16.mxu0 %v15560_v53  ;;  %12750 = vmatprep.subr.bf16.mxu1 %v15560_v53 }
0x11b8   :  { %12731 = vmatpush3.bf16.msra.mxu0 %v15560_v53  ;;  %12751 = vmatpush3.bf16.msra.mxu1 %v15560_v53 }
0x11b9   :  { %12732 = vmatprep.subr.bf16.mxu0 %v15558_v51  ;;  %12752 = vmatprep.subr.bf16.mxu1 %v15558_v51 }
0x11bc   :  { %12733 = vmatpush3.bf16.msra.mxu0 %v15558_v51  ;;  %12753 = vmatpush3.bf16.msra.mxu1 %v15558_v51 }
0x11bd   :  { %12806 = vmatprep.subr.bf16.mxu1 %v15560_v53  ;;  %12770 = vmatprep.subr.bf16.mxu0 %v14018_v12 }
0x11bf   :  { %12755 = vmatmul.mubr.msk.bf16.vlgmr.msra.gmra.mrb[112].mxu1 %vm1578_vm8, %v13963_v54  ;;  %12735 = vmatmul.mubr.msk.bf16.vlgmr.msra.gmra.mrb[120].mxu0 %vm1578_vm8, %v13972_v55  ;;  %v14026_v54 = vld [vmem:[#allocation22 + $0x1f0] sm:$0xff]  }
0x11c0   :  { %12807 = vmatpush3.bf16.msra.mxu1 %v15560_v53  ;;  %12758 = vmatprep.mubr.msk.bf16.mxu1 %vm1578_vm8, %v13964_v56 }
0x11c1   :  { %12808 = vmatprep.subr.bf16.mxu1 %v15558_v51  ;;  %12738 = vmatprep.mubr.msk.bf16.mxu0 %vm1578_vm8, %v13974_v57 }
0x11c2   :  { %12771 = vmatpush3.bf16.msra.mxu0 %v14018_v12 }
0x11c3   :  { %12788 = vmatprep.subr.bf16.mxu0 %v15620_v32 }
0x11c4   :  { %12809 = vmatpush3.bf16.msra.mxu1 %v15558_v51 }
0x11c5   :  { %12844 = vmatprep.subr.bf16.mxu1 %v15560_v53 }
0x11c7   :  { %12759 = vmatmul.mubr.msk.bf16.gmra.mrb[116].mxu1 %vm1578_vm8, %v13965_v58  ;;  %12739 = vmatmul.mubr.msk.bf16.gmra.mrb[124].mxu0 %vm1578_vm8, %v13976_v30  ;;  %v14027_v58 = vld [vmem:[#allocation22 + $0x1f8] sm:$0xff]  }
0x11c8   :  { %12762 = vmatprep.mubr.msk.bf16.mxu1 %vm1578_vm8, %v13966_v59  ;;  %12742 = vmatprep.mubr.msk.bf16.mxu0 %vm1578_vm8, %v13978_v60  ;;  %v14029_v59 = vld [vmem:[#allocation22 + $0x200] sm:$0xff]  }
0x11cf   :  { %12763 = vmatmul.mubr.msk.bf16.gmra.mrb[120].mxu1 %vm1578_vm8, %v13967_v61  ;;  %12743 = vmatmul.mubr.msk.bf16.gmra.mrb[128].mxu0 %vm1578_vm8, %v13980_v62 }
0x11d0   :  { %12766 = vmatprep.mubr.msk.bf16.mxu1 %vm1578_vm8, %v13968_v63  ;;  %12746 = vmatprep.mubr.msk.bf16.mxu0 %vm1578_vm8, %v13982_v0 }
0x11d7   :  { %12767 = vmatmul.mubr.msk.bf16.gmra.mrb[124].mxu1 %vm1578_vm8, %v13969_v1  ;;  %12747 = vmatmul.mubr.msk.bf16.gmra.mrb[132].mxu0 %vm1578_vm8, %v13984_v2  ;;  %v15684_v2 = vld [vmem:[%s16250_s20 + $0x10] sm:$0xff]  }
0x11d8   :  { %12810 = vmatprep.mubr.msk.bf16.mxu1 %vm1578_vm8, %v13971_v3 }
0x11df   :  { %12811 = vmatmul.mubr.msk.bf16.vlgmr.msra.gmra.mrb[128].mxu1 %vm1578_vm8, %v13973_v4 }
0x11e0   :  { %12845 = vmatpush3.bf16.msra.mxu1 %v15560_v53  ;;  %12814 = vmatprep.mubr.msk.bf16.mxu1 %vm1578_vm8, %v13975_v5 }
0x11e1   :  { %12846 = vmatprep.subr.bf16.mxu1 %v15558_v51 }
0x11e4   :  { %12847 = vmatpush3.bf16.msra.mxu1 %v15558_v51 }
0x11e5   :  { %12882 = vmatprep.subr.bf16.mxu1 %v15560_v53 }
0x11e7   :  { %12815 = vmatmul.mubr.msk.bf16.gmra.mrb[132].mxu1 %vm1578_vm8, %v13977_v6 }
0x11e8   :  { %12818 = vmatprep.mubr.msk.bf16.mxu1 %vm1578_vm8, %v13979_v7  ;;  %v14030_v7 = vld [vmem:[#allocation22 + $0x208] sm:$0xff]  }
0x11ef   :  { %12819 = vmatmul.mubr.msk.bf16.gmra.mrb[136].mxu1 %vm1578_vm8, %v13981_v8 }
0x11f0   :  { %12822 = vmatprep.mubr.msk.bf16.mxu1 %vm1578_vm8, %v13983_v9 }
0x11f7   :  { %12823 = vmatmul.mubr.msk.bf16.gmra.mrb[140].mxu1 %vm1578_vm8, %v13985_v10  ;;  %v14031_v10 = vld [vmem:[#allocation22 + $0x210] sm:$0xff]  }
0x11f8   :  { %12848 = vmatprep.mubr.msk.bf16.mxu1 %vm1578_vm8, %v13986_v11 }
0x11ff   :  { %12849 = vmatmul.mubr.msk.bf16.vlgmr.msra.gmra.mrb[144].mxu1 %vm1578_vm8, %v13987_v13 }
0x1200   :  { %12883 = vmatpush3.bf16.msra.mxu1 %v15560_v53  ;;  %12852 = vmatprep.mubr.msk.bf16.mxu1 %vm1578_vm8, %v13988_v14 }
0x1201   :  { %12884 = vmatprep.subr.bf16.mxu1 %v15558_v51 }
0x1204   :  { %12885 = vmatpush3.bf16.msra.mxu1 %v15558_v51 }
0x1205   :  { %12920 = vmatprep.subr.bf16.mxu1 %v15560_v53 }
0x1207   :  { %12853 = vmatmul.mubr.msk.bf16.gmra.mrb[148].mxu1 %vm1578_vm8, %v13989_v15 }
0x1208   :  { %12856 = vmatprep.mubr.msk.bf16.mxu1 %vm1578_vm8, %v13990_v16 }
0x120f   :  { %12857 = vmatmul.mubr.msk.bf16.gmra.mrb[152].mxu1 %vm1578_vm8, %v13991_v18 }
0x1210   :  { %12860 = vmatprep.mubr.msk.bf16.mxu1 %vm1578_vm8, %v13992_v19 }
0x1217   :  { %12861 = vmatmul.mubr.msk.bf16.gmra.mrb[156].mxu1 %vm1578_vm8, %v13993_v20 }
0x1218   :  { %12886 = vmatprep.mubr.msk.bf16.mxu1 %vm1578_vm8, %v13994_v21 }
0x121f   :  { %12887 = vmatmul.mubr.msk.bf16.vlgmr.msra.gmra.mrb[160].mxu1 %vm1578_vm8, %v13995_v22  ;;  %v14032_v22 = vld [vmem:[#allocation22 + $0x218] sm:$0xff]  }
0x1220   :  { %12921 = vmatpush3.bf16.msra.mxu1 %v15560_v53  ;;  %12890 = vmatprep.mubr.msk.bf16.mxu1 %vm1578_vm8, %v13996_v27 }
0x1221   :  { %12922 = vmatprep.subr.bf16.mxu1 %v15558_v51 }
0x1224   :  { %12923 = vmatpush3.bf16.msra.mxu1 %v15558_v51 }
0x1225   :  { %12958 = vmatprep.subr.bf16.mxu1 %v15560_v53 }
0x1227   :  { %12891 = vmatmul.mubr.msk.bf16.gmra.mrb[164].mxu1 %vm1578_vm8, %v13997_v33  ;;  %v14033_v33 = vld [vmem:[#allocation22 + $0x220] sm:$0xff]  }
0x1228   :  { %12894 = vmatprep.mubr.msk.bf16.mxu1 %vm1578_vm8, %v13998_v34 }
0x122f   :  { %12895 = vmatmul.mubr.msk.bf16.gmra.mrb[168].mxu1 %vm1578_vm8, %v13999_v35 }
0x1230   :  { %12898 = vmatprep.mubr.msk.bf16.mxu1 %vm1578_vm8, %v14000_v36 }
0x1237   :  { %12899 = vmatmul.mubr.msk.bf16.gmra.mrb[172].mxu1 %vm1578_vm8, %v14001_v37 }
0x1238   :  { %12924 = vmatprep.mubr.msk.bf16.mxu1 %vm1578_vm8, %v14002_v39 }
0x123f   :  { %12925 = vmatmul.mubr.msk.bf16.vlgmr.msra.gmra.mrb[176].mxu1 %vm1578_vm8, %v14003_v40 }
0x1240   :  { %12959 = vmatpush3.bf16.msra.mxu1 %v15560_v53  ;;  %12928 = vmatprep.mubr.msk.bf16.mxu1 %vm1578_vm8, %v14004_v38 }
0x1241   :  { %12960 = vmatprep.subr.bf16.mxu1 %v15558_v51 }
0x1244   :  { %12961 = vmatpush3.bf16.msra.mxu1 %v15558_v51 }
0x1245   :  { %12996 = vmatprep.subr.bf16.mxu1 %v15560_v53 }
0x1247   :  { %12929 = vmatmul.mubr.msk.bf16.gmra.mrb[180].mxu1 %vm1578_vm8, %v14005_v41 }
0x1248   :  { %12932 = vmatprep.mubr.msk.bf16.mxu1 %vm1578_vm8, %v14006_v42 }
0x124f   :  { %12933 = vmatmul.mubr.msk.bf16.gmra.mrb[184].mxu1 %vm1578_vm8, %v14007_v43 }
0x1250   :  { %12936 = vmatprep.mubr.msk.bf16.mxu1 %vm1578_vm8, %v14008_v44  ;;  %v14034_v44 = vld [vmem:[#allocation22 + $0x228] sm:$0xff]  }
0x1257   :  { %12937 = vmatmul.mubr.msk.bf16.gmra.mrb[188].mxu1 %vm1578_vm8, %v14009_v23 }
0x1258   :  { %12962 = vmatprep.mubr.msk.bf16.mxu1 %vm1578_vm8, %v14010_v24 }
0x125f   :  { %12963 = vmatmul.mubr.msk.bf16.vlgmr.msra.gmra.mrb[192].mxu1 %vm1578_vm8, %v14011_v25  ;;  %v14035_v25 = vld [vmem:[#allocation22 + $0x230] sm:$0xff]  }
0x1260   :  { %12997 = vmatpush3.bf16.msra.mxu1 %v15560_v53  ;;  %12966 = vmatprep.mubr.msk.bf16.mxu1 %vm1578_vm8, %v14012_v26 }
0x1261   :  { %12998 = vmatprep.subr.bf16.mxu1 %v15558_v51 }
0x1264   :  { %12999 = vmatpush3.bf16.msra.mxu1 %v15558_v51 }
0x1265   :  { %13034 = vmatprep.subr.bf16.mxu1 %v15560_v53 }
0x1267   :  { %12967 = vmatmul.mubr.msk.bf16.gmra.mrb[196].mxu1 %vm1578_vm8, %v14013_v28 }
0x1268   :  { %12970 = vmatprep.mubr.msk.bf16.mxu1 %vm1578_vm8, %v14014_v45 }
0x126f   :  { %12971 = vmatmul.mubr.msk.bf16.gmra.mrb[200].mxu1 %vm1578_vm8, %v14015_v46 }
0x1270   :  { %12974 = vmatprep.mubr.msk.bf16.mxu1 %vm1578_vm8, %v14016_v29 }
0x1277   :  { %12975 = vmatmul.mubr.msk.bf16.gmra.mrb[204].mxu1 %vm1578_vm8, %v14017_v47 }
0x1278   :  { %13000 = vmatprep.mubr.msk.bf16.mxu1 %vm1578_vm8, %v14019_v17 }
0x127f   :  { %13001 = vmatmul.mubr.msk.bf16.vlgmr.msra.gmra.mrb[208].mxu1 %vm1578_vm8, %v14020_v31 }
0x1280   :  { %13035 = vmatpush3.bf16.msra.mxu1 %v15560_v53  ;;  %13004 = vmatprep.mubr.msk.bf16.mxu1 %vm1578_vm8, %v14022_v48  ;;  %v14036_v48 = vld [vmem:[#allocation22 + $0x238] sm:$0xff]  }
0x1281   :  { %13036 = vmatprep.subr.bf16.mxu1 %v15558_v51 }
0x1284   :  { %13037 = vmatpush3.bf16.msra.mxu1 %v15558_v51 }
0x1287   :  { %13005 = vmatmul.mubr.msk.bf16.gmra.mrb[212].mxu1 %vm1578_vm8, %v14023_v49 }
0x1288   :  { %13008 = vmatprep.mubr.msk.bf16.mxu1 %vm1578_vm8, %v14024_v50 }
0x128f   :  { %13009 = vmatmul.mubr.msk.bf16.gmra.mrb[216].mxu1 %vm1578_vm8, %v14025_v52 }
0x1290   :  { %13012 = vmatprep.mubr.msk.bf16.mxu1 %vm1578_vm8, %v14026_v54 }
0x1292   :  { %v12756_v55 = vpop.f32.mrb[112].mxu1  ;;  %v15668_v53 = vpop.f32.mrb[120].mxu0 }
0x1293   :  { %v5195_v56 = vpop.f32.mrb[113].mxu1  ;;  %v15670_v57 = vpop.f32.mrb[121].mxu0 }
0x1294   :  { %v12757_v30 = vpop.f32.mrb[114].mxu1  ;;  %v15672_v51 = vpop.f32.mrb[122].mxu0 }
0x1295   :  { %v5259_v60 = vpack.c.bf16 %v12757_v30, %v12756_v55  ;;  %v5198_v61 = vpop.f32.mrb[115].mxu1  ;;  %v5071_v62 = vpack.c.bf16 %v15672_v51, %v15668_v53  ;;  %v15676_v63 = vpop.f32.mrb[123].mxu0  ;;  %v14037_v55 = vld [vmem:[%s16250_s20 + $0x18] sm:$0xff]  }
0x1296   :  { %v5258_v0 = vpack.c.bf16 %v5198_v61, %v5195_v56  ;;  %v5070_v1 = vpack.c.bf16 %v15676_v63, %v15670_v57 }
0x1297   :  { %13013 = vmatmul.mubr.msk.bf16.gmra.mrb[220].mxu1 %vm1578_vm8, %v14027_v58 }
0x1298   :  { %12772 = vmatprep.mubr.msk.bf16.mxu0 %vm1680_vm9, %v5258_v0  ;;  %13038 = vmatprep.mubr.msk.bf16.mxu1 %vm1578_vm8, %v14029_v59 }
0x1299   :  { %12773 = vmatmul.mubr.msk.bf16.vlgmr.msra.gmra.mrb[136].mxu0 %vm1680_vm9, %v5259_v60 }
0x129a   :  { %v12760_v3 = vpop.f32.mrb[116].mxu1  ;;  %12789 = vmatpush3.bf16.msra.mxu0 %v15620_v32  ;;  %v15690_v4 = vpop.f32.mrb[124].mxu0 }
0x129b   :  { %v5211_v5 = vpop.f32.mrb[117].mxu1  ;;  %v15692_v6 = vpop.f32.mrb[125].mxu0  ;;  %12826 = vmatprep.subr.bf16.mxu0 %v15684_v2 }
0x129c   :  { %v12761_v8 = vpop.f32.mrb[118].mxu1  ;;  %v15695_v9 = vpop.f32.mrb[126].mxu0 }
0x129d   :  { %v5261_v11 = vpack.c.bf16 %v12761_v8, %v12760_v3  ;;  %v5214_v12 = vpop.f32.mrb[119].mxu1  ;;  %v5073_v13 = vpack.c.bf16 %v15695_v9, %v15690_v4  ;;  %v5026_v14 = vpop.f32.mrb[127].mxu0 }
0x129e   :  { %v5260_v15 = vpack.c.bf16 %v5214_v12, %v5211_v5  ;;  %v5072_v16 = vpack.c.bf16 %v5026_v14, %v15692_v6 }
0x129f   :  { %13039 = vmatmul.mubr.msk.bf16.vlgmr.msra.gmra.mrb[224].mxu1 %vm1578_vm8, %v14030_v7 }
0x12a0   :  { %12776 = vmatprep.mubr.msk.bf16.mxu0 %vm1680_vm9, %v5260_v15  ;;  %13042 = vmatprep.mubr.msk.bf16.mxu1 %vm1578_vm8, %v14031_v10 }
0x12a1   :  { %12777 = vmatmul.mubr.msk.bf16.gmra.mrb[140].mxu0 %vm1680_vm9, %v5261_v11 }
0x12a2   :  { %v12764_v18 = vpop.f32.mrb[120].mxu1  ;;  %v15704_v19 = vpop.f32.mrb[128].mxu0 }
0x12a3   :  { %v5227_v20 = vpop.f32.mrb[121].mxu1  ;;  %v5039_v21 = vpop.f32.mrb[129].mxu0 }
0x12a4   :  { %v12765_v27 = vpop.f32.mrb[122].mxu1  ;;  %v12745_v32 = vpop.f32.mrb[130].mxu0 }
0x12a5   :  { %v5263_v34 = vpack.c.bf16 %v12765_v27, %v12764_v18  ;;  %v5230_v35 = vpop.f32.mrb[123].mxu1  ;;  %v5075_v36 = vpack.c.bf16 %v12745_v32, %v15704_v19  ;;  %v5042_v37 = vpop.f32.mrb[131].mxu0 }
0x12a6   :  { %v5262_v39 = vpack.c.bf16 %v5230_v35, %v5227_v20  ;;  %v5074_v40 = vpack.c.bf16 %v5042_v37, %v5039_v21 }
0x12a7   :  { %13043 = vmatmul.mubr.msk.bf16.gmra.mrb[228].mxu1 %vm1578_vm8, %v14032_v22 }
0x12a8   :  { %12780 = vmatprep.mubr.msk.bf16.mxu0 %vm1680_vm9, %v5262_v39  ;;  %13046 = vmatprep.mubr.msk.bf16.mxu1 %vm1578_vm8, %v14033_v33 }
0x12a9   :  { %12781 = vmatmul.mubr.msk.bf16.gmra.mrb[144].mxu0 %vm1680_vm9, %v5263_v34 }
0x12aa   :  { %v12768_v38 = vpop.f32.mrb[124].mxu1  ;;  %v12748_v41 = vpop.f32.mrb[132].mxu0 }
0x12ab   :  { %v5243_v42 = vpop.f32.mrb[125].mxu1  ;;  %v5055_v43 = vpop.f32.mrb[133].mxu0 }
0x12ac   :  { %v12769_v23 = vpop.f32.mrb[126].mxu1  ;;  %v12749_v24 = vpop.f32.mrb[134].mxu0 }
0x12ad   :  { %v5265_v26 = vpack.c.bf16 %v12769_v23, %v12768_v38  ;;  %v5246_v28 = vpop.f32.mrb[127].mxu1  ;;  %v5077_v45 = vpack.c.bf16 %v12749_v24, %v12748_v41  ;;  %v5058_v46 = vpop.f32.mrb[135].mxu0 }
0x12ae   :  { %v5264_v29 = vpack.c.bf16 %v5246_v28, %v5243_v42  ;;  %v5076_v47 = vpack.c.bf16 %v5058_v46, %v5055_v43 }
0x12af   :  { %13047 = vmatmul.mubr.msk.bf16.gmra.mrb[232].mxu1 %vm1578_vm8, %v14034_v44 }
0x12b0   :  { %12784 = vmatprep.mubr.msk.bf16.mxu0 %vm1680_vm9, %v5264_v29  ;;  %13050 = vmatprep.mubr.msk.bf16.mxu1 %vm1578_vm8, %v14035_v25  ;;  %v14039_v25 = vld [vmem:[%s16250_s20 + $0x28] sm:$0xff]  }
0x12b1   :  { %12785 = vmatmul.mubr.msk.bf16.gmra.mrb[148].mxu0 %vm1680_vm9, %v5265_v26 }
0x12b2   :  { %12790 = vmatprep.mubr.msk.bf16.mxu0 %vm1680_vm9, %v5070_v1  ;;  %v12812_v17 = vpop.f32.mrb[128].mxu1 }
0x12b3   :  { %v5638_v31 = vpop.f32.mrb[129].mxu1 }
0x12b4   :  { %v12813_v49 = vpop.f32.mrb[130].mxu1 }
0x12b5   :  { %v5702_v50 = vpack.c.bf16 %v12813_v49, %v12812_v17  ;;  %v5641_v52 = vpop.f32.mrb[131].mxu1 }
0x12b6   :  { %v5701_v54 = vpack.c.bf16 %v5641_v52, %v5638_v31 }
0x12b7   :  { %13051 = vmatmul.mubr.msk.bf16.gmra.mrb[236].mxu1 %vm1578_vm8, %v14036_v48 }
0x12b9   :  { %12791 = vmatmul.mubr.msk.bf16.vlgmr.msra.gmra.mrb[136].mxu0 %vm1680_vm9, %v5071_v62 }
0x12ba   :  { %12827 = vmatpush3.bf16.msra.mxu0 %v15684_v2  ;;  %12794 = vmatprep.mubr.msk.bf16.mxu0 %vm1680_vm9, %v5072_v16  ;;  %v12816_v56 = vpop.f32.mrb[132].mxu1 }
0x12bb   :  { %v5654_v57 = vpop.f32.mrb[133].mxu1  ;;  %12864 = vmatprep.subr.bf16.mxu0 %v14037_v55 }
0x12bc   :  { %v12817_v58 = vpop.f32.mrb[134].mxu1 }
0x12bd   :  { %v5704_v30 = vpack.c.bf16 %v12817_v58, %v12816_v56  ;;  %v5657_v59 = vpop.f32.mrb[135].mxu1 }
0x12be   :  { %v5703_v60 = vpack.c.bf16 %v5657_v59, %v5654_v57 }
0x12c1   :  { %12795 = vmatmul.mubr.msk.bf16.gmra.mrb[140].mxu0 %vm1680_vm9, %v5073_v13  ;;  %v14038_v13 = vld [vmem:[%s16250_s20 + $0x20] sm:$0xff]  }
0x12c2   :  { %12798 = vmatprep.mubr.msk.bf16.mxu0 %vm1680_vm9, %v5074_v40  ;;  %v12820_v53 = vpop.f32.mrb[136].mxu1 }
0x12c3   :  { %v5670_v51 = vpop.f32.mrb[137].mxu1 }
0x12c4   :  { %v12821_v61 = vpop.f32.mrb[138].mxu1 }
0x12c5   :  { %v5706_v62 = vpack.c.bf16 %v12821_v61, %v12820_v53  ;;  %v5673_v63 = vpop.f32.mrb[139].mxu1 }
0x12c6   :  { %v5705_v0 = vpack.c.bf16 %v5673_v63, %v5670_v51  ;;  %v14040_v63 = vld [vmem:[%s16250_s20 + $0x30] sm:$0xff]  }
0x12c9   :  { %12799 = vmatmul.mubr.msk.bf16.gmra.mrb[144].mxu0 %vm1680_vm9, %v5075_v36 }
0x12ca   :  { %12802 = vmatprep.mubr.msk.bf16.mxu0 %vm1680_vm9, %v5076_v47  ;;  %v12824_v1 = vpop.f32.mrb[140].mxu1 }
0x12cb   :  { %v5686_v2 = vpop.f32.mrb[141].mxu1 }
0x12cc   :  { %v12825_v3 = vpop.f32.mrb[142].mxu1 }
0x12cd   :  { %v5708_v5 = vpack.c.bf16 %v12825_v3, %v12824_v1  ;;  %v5689_v6 = vpop.f32.mrb[143].mxu1 }
0x12ce   :  { %v5707_v4 = vpack.c.bf16 %v5689_v6, %v5686_v2 }
0x12d1   :  { %12803 = vmatmul.mubr.msk.bf16.gmra.mrb[148].mxu0 %vm1680_vm9, %v5077_v45 }
0x12d2   :  { %12828 = vmatprep.mubr.msk.bf16.mxu0 %vm1680_vm9, %v5701_v54  ;;  %v12850_v7 = vpop.f32.mrb[144].mxu1 }
0x12d3   :  { %v5970_v8 = vpop.f32.mrb[145].mxu1 }
0x12d4   :  { %v12851_v9 = vpop.f32.mrb[146].mxu1 }
0x12d5   :  { %v6034_v10 = vpack.c.bf16 %v12851_v9, %v12850_v7  ;;  %v5973_v11 = vpop.f32.mrb[147].mxu1 }
0x12d6   :  { %v6033_v12 = vpack.c.bf16 %v5973_v11, %v5970_v8 }
0x12d9   :  { %12829 = vmatmul.mubr.msk.bf16.vlgmr.msra.gmra.mrb[136].mxu0 %vm1680_vm9, %v5702_v50 }
0x12da   :  { %12865 = vmatpush3.bf16.msra.mxu0 %v14037_v55  ;;  %12832 = vmatprep.mubr.msk.bf16.mxu0 %vm1680_vm9, %v5703_v60  ;;  %v12854_v14 = vpop.f32.mrb[148].mxu1 }
0x12db   :  { %v5986_v15 = vpop.f32.mrb[149].mxu1  ;;  %12902 = vmatprep.subr.bf16.mxu0 %v14038_v13 }
0x12dc   :  { %v12855_v16 = vpop.f32.mrb[150].mxu1 }
0x12dd   :  { %v6036_v18 = vpack.c.bf16 %v12855_v16, %v12854_v14  ;;  %v5989_v19 = vpop.f32.mrb[151].mxu1 }
0x12de   :  { %v6035_v20 = vpack.c.bf16 %v5989_v19, %v5986_v15 }
0x12e1   :  { %12833 = vmatmul.mubr.msk.bf16.gmra.mrb[140].mxu0 %vm1680_vm9, %v5704_v30 }
0x12e2   :  { %12836 = vmatprep.mubr.msk.bf16.mxu0 %vm1680_vm9, %v5705_v0  ;;  %v12858_v21 = vpop.f32.mrb[152].mxu1 }
0x12e3   :  { %v6002_v22 = vpop.f32.mrb[153].mxu1 }
0x12e4   :  { %v12859_v27 = vpop.f32.mrb[154].mxu1 }
0x12e5   :  { %v6038_v32 = vpack.c.bf16 %v12859_v27, %v12858_v21  ;;  %v6005_v33 = vpop.f32.mrb[155].mxu1 }
0x12e6   :  { %v6037_v34 = vpack.c.bf16 %v6005_v33, %v6002_v22  ;;  %v14041_v33 = vld [vmem:[%s16250_s20 + $0x38] sm:$0xff]  }
0x12e9   :  { %12837 = vmatmul.mubr.msk.bf16.gmra.mrb[144].mxu0 %vm1680_vm9, %v5706_v62 }
0x12ea   :  { %12840 = vmatprep.mubr.msk.bf16.mxu0 %vm1680_vm9, %v5707_v4  ;;  %v12862_v35 = vpop.f32.mrb[156].mxu1 }
0x12eb   :  { %v6018_v36 = vpop.f32.mrb[157].mxu1 }
0x12ec   :  { %v12863_v37 = vpop.f32.mrb[158].mxu1 }
0x12ed   :  { %v6040_v39 = vpack.c.bf16 %v12863_v37, %v12862_v35  ;;  %v6021_v40 = vpop.f32.mrb[159].mxu1 }
0x12ee   :  { %v6039_v38 = vpack.c.bf16 %v6021_v40, %v6018_v36 }
0x12f1   :  { %12841 = vmatmul.mubr.msk.bf16.gmra.mrb[148].mxu0 %vm1680_vm9, %v5708_v5 }
0x12f2   :  { %12866 = vmatprep.mubr.msk.bf16.mxu0 %vm1680_vm9, %v6033_v12  ;;  %v12888_v41 = vpop.f32.mrb[160].mxu1 }
0x12f3   :  { %v6302_v42 = vpop.f32.mrb[161].mxu1 }
0x12f4   :  { %v12889_v43 = vpop.f32.mrb[162].mxu1 }
0x12f5   :  { %v6366_v44 = vpack.c.bf16 %v12889_v43, %v12888_v41  ;;  %v6305_v23 = vpop.f32.mrb[163].mxu1 }
0x12f6   :  { %v6365_v24 = vpack.c.bf16 %v6305_v23, %v6302_v42 }
0x12f9   :  { %12867 = vmatmul.mubr.msk.bf16.vlgmr.msra.gmra.mrb[136].mxu0 %vm1680_vm9, %v6034_v10 }
0x12fa   :  { %12903 = vmatpush3.bf16.msra.mxu0 %v14038_v13  ;;  %12870 = vmatprep.mubr.msk.bf16.mxu0 %vm1680_vm9, %v6035_v20  ;;  %v12892_v26 = vpop.f32.mrb[164].mxu1 }
0x12fb   :  { %v6318_v28 = vpop.f32.mrb[165].mxu1  ;;  %12940 = vmatprep.subr.bf16.mxu0 %v14039_v25 }
0x12fc   :  { %v12893_v45 = vpop.f32.mrb[166].mxu1 }
0x12fd   :  { %v6368_v46 = vpack.c.bf16 %v12893_v45, %v12892_v26  ;;  %v6321_v29 = vpop.f32.mrb[167].mxu1 }
0x12fe   :  { %v6367_v47 = vpack.c.bf16 %v6321_v29, %v6318_v28 }
0x1301   :  { %12871 = vmatmul.mubr.msk.bf16.gmra.mrb[140].mxu0 %vm1680_vm9, %v6036_v18 }
0x1302   :  { %12874 = vmatprep.mubr.msk.bf16.mxu0 %vm1680_vm9, %v6037_v34  ;;  %v12896_v17 = vpop.f32.mrb[168].mxu1 }
0x1303   :  { %v6334_v31 = vpop.f32.mrb[169].mxu1 }
0x1304   :  { %v12897_v48 = vpop.f32.mrb[170].mxu1 }
0x1305   :  { %v6370_v49 = vpack.c.bf16 %v12897_v48, %v12896_v17  ;;  %v6337_v50 = vpop.f32.mrb[171].mxu1 }
0x1306   :  { %v6369_v52 = vpack.c.bf16 %v6337_v50, %v6334_v31  ;;  %v14042_v50 = vld [vmem:[%s16250_s20 + $0x40] sm:$0xff]  }
0x1309   :  { %12875 = vmatmul.mubr.msk.bf16.gmra.mrb[144].mxu0 %vm1680_vm9, %v6038_v32 }
0x130a   :  { %12878 = vmatprep.mubr.msk.bf16.mxu0 %vm1680_vm9, %v6039_v38  ;;  %v12900_v54 = vpop.f32.mrb[172].mxu1 }
0x130b   :  { %v6350_v55 = vpop.f32.mrb[173].mxu1 }
0x130c   :  { %v12901_v56 = vpop.f32.mrb[174].mxu1 }
0x130d   :  { %v6372_v57 = vpack.c.bf16 %v12901_v56, %v12900_v54  ;;  %v6353_v58 = vpop.f32.mrb[175].mxu1 }
0x130e   :  { %v6371_v30 = vpack.c.bf16 %v6353_v58, %v6350_v55 }
0x1311   :  { %12879 = vmatmul.mubr.msk.bf16.gmra.mrb[148].mxu0 %vm1680_vm9, %v6040_v39 }
0x1312   :  { %12904 = vmatprep.mubr.msk.bf16.mxu0 %vm1680_vm9, %v6365_v24  ;;  %v12926_v59 = vpop.f32.mrb[176].mxu1 }
0x1313   :  { %v6634_v60 = vpop.f32.mrb[177].mxu1 }
0x1314   :  { %v12927_v53 = vpop.f32.mrb[178].mxu1 }
0x1315   :  { %v6698_v51 = vpack.c.bf16 %v12927_v53, %v12926_v59  ;;  %v6637_v61 = vpop.f32.mrb[179].mxu1 }
0x1316   :  { %v6697_v62 = vpack.c.bf16 %v6637_v61, %v6634_v60 }
0x1319   :  { %12905 = vmatmul.mubr.msk.bf16.vlgmr.msra.gmra.mrb[136].mxu0 %vm1680_vm9, %v6366_v44 }
0x131a   :  { %12941 = vmatpush3.bf16.msra.mxu0 %v14039_v25  ;;  %12908 = vmatprep.mubr.msk.bf16.mxu0 %vm1680_vm9, %v6367_v47  ;;  %v12930_v0 = vpop.f32.mrb[180].mxu1 }
0x131b   :  { %v6650_v1 = vpop.f32.mrb[181].mxu1  ;;  %12978 = vmatprep.subr.bf16.mxu0 %v14040_v63 }
0x131c   :  { %v12931_v2 = vpop.f32.mrb[182].mxu1 }
0x131d   :  { %v6700_v3 = vpack.c.bf16 %v12931_v2, %v12930_v0  ;;  %v6653_v5 = vpop.f32.mrb[183].mxu1 }
0x131e   :  { %v6699_v6 = vpack.c.bf16 %v6653_v5, %v6650_v1 }
0x1321   :  { %12909 = vmatmul.mubr.msk.bf16.gmra.mrb[140].mxu0 %vm1680_vm9, %v6368_v46 }
0x1322   :  { %12912 = vmatprep.mubr.msk.bf16.mxu0 %vm1680_vm9, %v6369_v52  ;;  %v12934_v4 = vpop.f32.mrb[184].mxu1 }
0x1323   :  { %v6666_v7 = vpop.f32.mrb[185].mxu1 }
0x1324   :  { %v12935_v8 = vpop.f32.mrb[186].mxu1 }
0x1325   :  { %v6702_v9 = vpack.c.bf16 %v12935_v8, %v12934_v4  ;;  %v6669_v10 = vpop.f32.mrb[187].mxu1 }
0x1326   :  { %v6701_v11 = vpack.c.bf16 %v6669_v10, %v6666_v7 }
0x1329   :  { %12913 = vmatmul.mubr.msk.bf16.gmra.mrb[144].mxu0 %vm1680_vm9, %v6370_v49 }
0x132a   :  { %12916 = vmatprep.mubr.msk.bf16.mxu0 %vm1680_vm9, %v6371_v30  ;;  %v12938_v12 = vpop.f32.mrb[188].mxu1 }
0x132b   :  { %v6682_v13 = vpop.f32.mrb[189].mxu1 }
0x132c   :  { %v12939_v14 = vpop.f32.mrb[190].mxu1 }
0x132d   :  { %v6704_v15 = vpack.c.bf16 %v12939_v14, %v12938_v12  ;;  %v6685_v16 = vpop.f32.mrb[191].mxu1 }
0x132e   :  { %v6703_v18 = vpack.c.bf16 %v6685_v16, %v6682_v13 }
0x1331   :  { %12917 = vmatmul.mubr.msk.bf16.gmra.mrb[148].mxu0 %vm1680_vm9, %v6372_v57 }
0x1332   :  { %12942 = vmatprep.mubr.msk.bf16.mxu0 %vm1680_vm9, %v6697_v62  ;;  %v12964_v19 = vpop.f32.mrb[192].mxu1 }
0x1333   :  { %v6966_v20 = vpop.f32.mrb[193].mxu1 }
0x1334   :  { %v12965_v21 = vpop.f32.mrb[194].mxu1 }
0x1335   :  { %v7030_v22 = vpack.c.bf16 %v12965_v21, %v12964_v19  ;;  %v6969_v27 = vpop.f32.mrb[195].mxu1 }
0x1336   :  { %v7029_v32 = vpack.c.bf16 %v6969_v27, %v6966_v20 }
0x1339   :  { %12943 = vmatmul.mubr.msk.bf16.vlgmr.msra.gmra.mrb[136].mxu0 %vm1680_vm9, %v6698_v51 }
0x133a   :  { %12979 = vmatpush3.bf16.msra.mxu0 %v14040_v63  ;;  %12946 = vmatprep.mubr.msk.bf16.mxu0 %vm1680_vm9, %v6699_v6  ;;  %v12968_v34 = vpop.f32.mrb[196].mxu1 }
0x133b   :  { %v6982_v35 = vpop.f32.mrb[197].mxu1  ;;  %13016 = vmatprep.subr.bf16.mxu0 %v14041_v33 }
0x133c   :  { %v12969_v36 = vpop.f32.mrb[198].mxu1 }
0x133d   :  { %v7032_v37 = vpack.c.bf16 %v12969_v36, %v12968_v34  ;;  %v6985_v39 = vpop.f32.mrb[199].mxu1 }
0x133e   :  { %v7031_v40 = vpack.c.bf16 %v6985_v39, %v6982_v35  ;;  %v15808_v39 = vld [vmem:[%s16251_s27] ss:$0 sm:$0xff] }
0x1341   :  { %12947 = vmatmul.mubr.msk.bf16.gmra.mrb[140].mxu0 %vm1680_vm9, %v6700_v3 }
0x1342   :  { %12950 = vmatprep.mubr.msk.bf16.mxu0 %vm1680_vm9, %v6701_v11  ;;  %v12972_v38 = vpop.f32.mrb[200].mxu1 }
0x1343   :  { %v6998_v41 = vpop.f32.mrb[201].mxu1 }
0x1344   :  { %v12973_v42 = vpop.f32.mrb[202].mxu1 }
0x1345   :  { %v7034_v43 = vpack.c.bf16 %v12973_v42, %v12972_v38  ;;  %v7001_v44 = vpop.f32.mrb[203].mxu1 }
0x1346   :  { %v7033_v23 = vpack.c.bf16 %v7001_v44, %v6998_v41 }
0x1349   :  { %12951 = vmatmul.mubr.msk.bf16.gmra.mrb[144].mxu0 %vm1680_vm9, %v6702_v9 }
0x134a   :  { %12954 = vmatprep.mubr.msk.bf16.mxu0 %vm1680_vm9, %v6703_v18  ;;  %v12976_v24 = vpop.f32.mrb[204].mxu1 }
0x134b   :  { %v7014_v25 = vpop.f32.mrb[205].mxu1 }
0x134c   :  { %v12977_v26 = vpop.f32.mrb[206].mxu1 }
0x134d   :  { %v7036_v28 = vpack.c.bf16 %v12977_v26, %v12976_v24  ;;  %v7017_v45 = vpop.f32.mrb[207].mxu1 }
0x134e   :  { %v7035_v46 = vpack.c.bf16 %v7017_v45, %v7014_v25 }
0x1351   :  { %12955 = vmatmul.mubr.msk.bf16.gmra.mrb[148].mxu0 %vm1680_vm9, %v6704_v15 }
0x1352   :  { %12980 = vmatprep.mubr.msk.bf16.mxu0 %vm1680_vm9, %v7029_v32  ;;  %v13002_v29 = vpop.f32.mrb[208].mxu1 }
0x1353   :  { %v7298_v47 = vpop.f32.mrb[209].mxu1 }
0x1354   :  { %v13003_v17 = vpop.f32.mrb[210].mxu1 }
0x1355   :  { %v7362_v31 = vpack.c.bf16 %v13003_v17, %v13002_v29  ;;  %v7301_v48 = vpop.f32.mrb[211].mxu1 }
0x1356   :  { %v7361_v49 = vpack.c.bf16 %v7301_v48, %v7298_v47 }
0x1359   :  { %12981 = vmatmul.mubr.msk.bf16.vlgmr.msra.gmra.mrb[136].mxu0 %vm1680_vm9, %v7030_v22 }
0x135a   :  { %13017 = vmatpush3.bf16.msra.mxu0 %v14041_v33  ;;  %12984 = vmatprep.mubr.msk.bf16.mxu0 %vm1680_vm9, %v7031_v40  ;;  %v13006_v52 = vpop.f32.mrb[212].mxu1 }
0x135b   :  { %v7314_v54 = vpop.f32.mrb[213].mxu1  ;;  %13054 = vmatprep.subr.bf16.mxu0 %v14042_v50 }
0x135c   :  { %v13007_v55 = vpop.f32.mrb[214].mxu1 }
0x135d   :  { %v7364_v56 = vpack.c.bf16 %v13007_v55, %v13006_v52  ;;  %v7317_v57 = vpop.f32.mrb[215].mxu1 }
0x135e   :  { %v7363_v58 = vpack.c.bf16 %v7317_v57, %v7314_v54 }
0x1361   :  { %12985 = vmatmul.mubr.msk.bf16.gmra.mrb[140].mxu0 %vm1680_vm9, %v7032_v37  ;;  %v14043_v37 = vld [vmem:[#allocation24] sm:$0xff]  }
0x1362   :  { %12988 = vmatprep.mubr.msk.bf16.mxu0 %vm1680_vm9, %v7033_v23  ;;  %v13010_v30 = vpop.f32.mrb[216].mxu1  ;;  %13088 = vmatprep.mubr.bf16.mxu1 %v14043_v37 }
0x1363   :  { %v7330_v59 = vpop.f32.mrb[217].mxu1 }
0x1364   :  { %v13011_v60 = vpop.f32.mrb[218].mxu1 }
0x1365   :  { %v7366_v53 = vpack.c.bf16 %v13011_v60, %v13010_v30  ;;  %v7333_v51 = vpop.f32.mrb[219].mxu1 }
0x1366   :  { %v7365_v61 = vpack.c.bf16 %v7333_v51, %v7330_v59 }
0x1369   :  { %12989 = vmatmul.mubr.msk.bf16.gmra.mrb[144].mxu0 %vm1680_vm9, %v7034_v43 }
0x136a   :  { %12992 = vmatprep.mubr.msk.bf16.mxu0 %vm1680_vm9, %v7035_v46  ;;  %v13014_v62 = vpop.f32.mrb[220].mxu1 }
0x136b   :  { %v7346_v63 = vpop.f32.mrb[221].mxu1 }
0x136c   :  { %v13015_v0 = vpop.f32.mrb[222].mxu1 }
0x136d   :  { %v7368_v1 = vpack.c.bf16 %v13015_v0, %v13014_v62  ;;  %v7349_v2 = vpop.f32.mrb[223].mxu1 }
0x136e   :  { %v7367_v3 = vpack.c.bf16 %v7349_v2, %v7346_v63 }
0x1371   :  { %12993 = vmatmul.mubr.msk.bf16.gmra.mrb[148].mxu0 %vm1680_vm9, %v7036_v28 }
0x1372   :  { %13018 = vmatprep.mubr.msk.bf16.mxu0 %vm1680_vm9, %v7361_v49  ;;  %v13040_v5 = vpop.f32.mrb[224].mxu1 }
0x1373   :  { %v7630_v6 = vpop.f32.mrb[225].mxu1 }
0x1374   :  { %v13041_v4 = vpop.f32.mrb[226].mxu1 }
0x1375   :  { %v7694_v7 = vpack.c.bf16 %v13041_v4, %v13040_v5  ;;  %v7633_v8 = vpop.f32.mrb[227].mxu1 }
0x1376   :  { %v7693_v9 = vpack.c.bf16 %v7633_v8, %v7630_v6 }
0x1379   :  { %13019 = vmatmul.mubr.msk.bf16.vlgmr.msra.gmra.mrb[136].mxu0 %vm1680_vm9, %v7362_v31 }
0x137a   :  { %13055 = vmatpush3.bf16.msra.mxu0 %v14042_v50  ;;  %13022 = vmatprep.mubr.msk.bf16.mxu0 %vm1680_vm9, %v7363_v58  ;;  %v13044_v10 = vpop.f32.mrb[228].mxu1 }
0x137b   :  { %v7646_v11 = vpop.f32.mrb[229].mxu1 }
0x137c   :  { %v13045_v12 = vpop.f32.mrb[230].mxu1 }
0x137d   :  { %v7696_v13 = vpack.c.bf16 %v13045_v12, %v13044_v10  ;;  %v7649_v14 = vpop.f32.mrb[231].mxu1 }
0x137e   :  { %v7695_v15 = vpack.c.bf16 %v7649_v14, %v7646_v11 }
0x1381   :  { %13023 = vmatmul.mubr.msk.bf16.gmra.mrb[140].mxu0 %vm1680_vm9, %v7364_v56 }
0x1382   :  { %13026 = vmatprep.mubr.msk.bf16.mxu0 %vm1680_vm9, %v7365_v61  ;;  %v13048_v16 = vpop.f32.mrb[232].mxu1 }
0x1383   :  { %v7662_v18 = vpop.f32.mrb[233].mxu1 }
0x1384   :  { %v13049_v19 = vpop.f32.mrb[234].mxu1 }
0x1385   :  { %v7698_v20 = vpack.c.bf16 %v13049_v19, %v13048_v16  ;;  %v7665_v21 = vpop.f32.mrb[235].mxu1 }
0x1386   :  { %v7697_v22 = vpack.c.bf16 %v7665_v21, %v7662_v18 }
0x1389   :  { %13027 = vmatmul.mubr.msk.bf16.gmra.mrb[144].mxu0 %vm1680_vm9, %v7366_v53 }
0x138a   :  { %13030 = vmatprep.mubr.msk.bf16.mxu0 %vm1680_vm9, %v7367_v3  ;;  %v13052_v27 = vpop.f32.mrb[236].mxu1 }
0x138b   :  { %v7678_v32 = vpop.f32.mrb[237].mxu1 }
0x138c   :  { %v13053_v33 = vpop.f32.mrb[238].mxu1 }
0x138d   :  { %v7700_v34 = vpack.c.bf16 %v13053_v33, %v13052_v27  ;;  %v7681_v35 = vpop.f32.mrb[239].mxu1 }
0x138e   :  { %v7699_v36 = vpack.c.bf16 %v7681_v35, %v7678_v32 }
0x1391   :  { %13031 = vmatmul.mubr.msk.bf16.gmra.mrb[148].mxu0 %vm1680_vm9, %v7368_v1 }
0x1392   :  { %13056 = vmatprep.mubr.msk.bf16.mxu0 %vm1680_vm9, %v7693_v9 }
0x1399   :  { %13057 = vmatmul.mubr.msk.bf16.vlgmr.msra.gmra.mrb[136].mxu0 %vm1680_vm9, %v7694_v7 }
0x139a   :  { %13060 = vmatprep.mubr.msk.bf16.mxu0 %vm1680_vm9, %v7695_v15 }
0x13a1   :  { %13061 = vmatmul.mubr.msk.bf16.gmra.mrb[140].mxu0 %vm1680_vm9, %v7696_v13 }
0x13a2   :  { %13064 = vmatprep.mubr.msk.bf16.mxu0 %vm1680_vm9, %v7697_v22 }
0x13a9   :  { %13065 = vmatmul.mubr.msk.bf16.gmra.mrb[144].mxu0 %vm1680_vm9, %v7698_v20 }
0x13aa   :  { %13068 = vmatprep.mubr.msk.bf16.mxu0 %vm1680_vm9, %v7699_v36 }
0x13b1   :  { %13069 = vmatmul.mubr.msk.bf16.gmra.mrb[148].mxu0 %vm1680_vm9, %v7700_v34 }
0x146c   :  { %v13058_v40 = vpop.f32.mrb[136].mxu0 }
0x146d   :  { %v7855_v38 = vadd.f32 %v13058_v40, %v15808_v39  ;;  %v7768_v41 = vpop.f32.mrb[137].mxu0 }
0x146e   :  { %v7853_v42 = vadd.f32 %v15808_v39, %v7768_v41  ;;  %v13059_v43 = vpop.f32.mrb[138].mxu0 }
0x146f   :  { %v7887_v44 = vmul.f32 0.01, %v7855_v38  ;;  %v7856_v23 = vadd.f32 %v13059_v43, %v15808_v39  ;;  %v7771_v24 = vpop.f32.mrb[139].mxu0  ;;  %vm7871_vm1 = vcmp.ge.f32.partialorder %v7855_v38, 0.0 }
0x1470   :  { %v7885_v25 = vmul.f32 0.01, %v7853_v42  ;;  %v7854_v26 = vadd.f32 %v15808_v39, %v7771_v24  ;;  %vm7869_vm2 = vcmp.ge.f32.partialorder %v7853_v42, 0.0 }
0x1471   :  { %vm7872_vm3 = vcmp.ge.f32.partialorder %v7856_v23, 0.0  ;;  %v7888_v28 = vmul.f32 0.01, %v7856_v23  ;;  %v7903_v46 = vsel %vm7871_vm1, %v7855_v38, %v7887_v44 }
0x1472   :  { %vm7870_vm4 = vcmp.ge.f32.partialorder %v7854_v26, 0.0  ;;  %v7886_v45 = vmul.f32 0.01, %v7854_v26  ;;  %v7901_v47 = vsel %vm7869_vm2, %v7853_v42, %v7885_v25 }
0x1473   :  { %v7904_v29 = vsel %vm7872_vm3, %v7856_v23, %v7888_v28  ;;  %v14046_v28 = vld [vmem:[#allocation24 + $0x18] sm:$0xff]  }
0x1474   :  { %v15814_v17 = vpack.c.bf16 %v7904_v29, %v7903_v46  ;;  %v7902_v31 = vsel %vm7870_vm4, %v7854_v26, %v7886_v45  ;;  %v13062_v48 = vpop.f32.mrb[140].mxu0  ;;  %v14045_v26 = vld [vmem:[#allocation24 + $0x10] sm:$0xff]   ;;  %v14047_v45 = vld [vmem:[#allocation24 + $0x20] sm:$0xff]   ;;  %v14048_v46 = vld [vmem:[#allocation24 + $0x28] sm:$0xff]  }
0x1475   :  { %v15816_v49 = vpack.c.bf16 %v7902_v31, %v7901_v47  ;;  %v7859_v50 = vadd.f32 %v13062_v48, %v15808_v39  ;;  %v7784_v52 = vpop.f32.mrb[141].mxu0  ;;  %v14049_v29 = vld [vmem:[#allocation24 + $0x30] sm:$0xff]   ;;  %v14050_v47 = vld [vmem:[#allocation24 + $0x38] sm:$0xff]   ;;  %v14051_v31 = vld [vmem:[#allocation24 + $0x40] sm:$0xff]  }
0x1476   :  { %v7857_v54 = vadd.f32 %v15808_v39, %v7784_v52  ;;  %v13063_v55 = vpop.f32.mrb[142].mxu0  ;;  %v14052_v48 = vld [vmem:[#allocation24 + $0x48] sm:$0xff]   ;;  %v14054_v52 = vld [vmem:[#allocation24 + $0x58] sm:$0xff]  }
0x1477   :  { %v7891_v56 = vmul.f32 0.01, %v7859_v50  ;;  %v7860_v57 = vadd.f32 %v13063_v55, %v15808_v39  ;;  %v7787_v58 = vpop.f32.mrb[143].mxu0  ;;  %13072 = vmatprep.subr.bf16.mxu1 %v15816_v49  ;;  %vm7875_vm5 = vcmp.ge.f32.partialorder %v7859_v50, 0.0  ;;  %v14056_v55 = vld [vmem:[#allocation24 + $0x68] sm:$0xff]  }
0x1478   :  { %v7889_v30 = vmul.f32 0.01, %v7857_v54  ;;  %v7858_v59 = vadd.f32 %v15808_v39, %v7787_v58  ;;  %13073 = vmatpush3.bf16.msra.mxu1 %v15816_v49  ;;  %vm7873_vm6 = vcmp.ge.f32.partialorder %v7857_v54, 0.0  ;;  %v14059_v58 = vld [vmem:[#allocation24 + $0x80] sm:$0xff]  }
0x1479   :  { %vm7876_vm7 = vcmp.ge.f32.partialorder %v7860_v57, 0.0  ;;  %v7892_v60 = vmul.f32 0.01, %v7860_v57  ;;  %13074 = vmatprep.subr.bf16.mxu1 %v15814_v17  ;;  %v7907_v51 = vsel %vm7875_vm5, %v7859_v50, %v7891_v56  ;;  %v14053_v50 = vld [vmem:[#allocation24 + $0x50] sm:$0xff]  }
0x147a   :  { %vm7874_vm8 = vcmp.ge.f32.partialorder %v7858_v59, 0.0  ;;  %v7890_v53 = vmul.f32 0.01, %v7858_v59  ;;  %v7905_v62 = vsel %vm7873_vm6, %v7857_v54, %v7889_v30  ;;  %v14055_v54 = vld [vmem:[#allocation24 + $0x60] sm:$0xff]   ;;  %v14057_v56 = vld [vmem:[#allocation24 + $0x70] sm:$0xff]   ;;  %v14060_v30 = vld [vmem:[#allocation24 + $0x88] sm:$0xff]  }
0x147b   :  { %v7908_v61 = vsel %vm7876_vm7, %v7860_v57, %v7892_v60  ;;  %v14058_v57 = vld [vmem:[#allocation24 + $0x78] sm:$0xff]  }
0x147c   :  { %v15825_v63 = vpack.c.bf16 %v7908_v61, %v7907_v51  ;;  %v7906_v0 = vsel %vm7874_vm8, %v7858_v59, %v7890_v53  ;;  %v13066_v1 = vpop.f32.mrb[144].mxu0  ;;  %13075 = vmatpush3.bf16.msra.mxu1 %v15814_v17  ;;  %v14061_v59 = vld [vmem:[#allocation24 + $0x90] sm:$0xff]   ;;  %v14062_v60 = vld [vmem:[#allocation24 + $0x98] sm:$0xff]   ;;  %v14063_v53 = vld [vmem:[#allocation24 + $0xa0] sm:$0xff]  }
0x147d   :  { %v15828_v2 = vpack.c.bf16 %v7906_v0, %v7905_v62  ;;  %v7863_v3 = vadd.f32 %v13066_v1, %v15808_v39  ;;  %v7800_v5 = vpop.f32.mrb[145].mxu0  ;;  %v14064_v51 = vld [vmem:[#allocation24 + $0xa8] sm:$0xff]   ;;  %v14065_v61 = vld [vmem:[#allocation24 + $0xb0] sm:$0xff]   ;;  %v14066_v62 = vld [vmem:[#allocation24 + $0xb8] sm:$0xff]  }
0x147e   :  { %v7861_v6 = vadd.f32 %v15808_v39, %v7800_v5  ;;  %v13067_v4 = vpop.f32.mrb[146].mxu0  ;;  %v14067_v0 = vld [vmem:[#allocation24 + $0xc0] sm:$0xff]   ;;  %v14068_v1 = vld [vmem:[#allocation24 + $0xc8] sm:$0xff]  }
0x147f   :  { %v7895_v7 = vmul.f32 0.01, %v7863_v3  ;;  %v7864_v8 = vadd.f32 %v13067_v4, %v15808_v39  ;;  %v7803_v9 = vpop.f32.mrb[147].mxu0  ;;  %13076 = vmatprep.subr.bf16.mxu1 %v15828_v2  ;;  %vm7879_vm10 = vcmp.ge.f32.partialorder %v7863_v3, 0.0  ;;  %v14099_v5 = vld [vmem:[#allocation25 + $0x8] sm:$0xff]   ;;  %v14071_v4 = vld [vmem:[#allocation24 + $0xe0] sm:$0xff]  }
0x1480   :  { %v7893_v10 = vmul.f32 0.01, %v7861_v6  ;;  %v7862_v11 = vadd.f32 %v15808_v39, %v7803_v9  ;;  %13077 = vmatpush3.bf16.msra.mxu1 %v15828_v2  ;;  %vm7877_vm11 = vcmp.ge.f32.partialorder %v7861_v6, 0.0  ;;  %13136 = vmatprep.subr.bf16.mxu0 %v14099_v5  ;;  %v14074_v9 = vld [vmem:[#allocation24 + $0xf8] sm:$0xff]  }
0x1481   :  { %vm7880_vm12 = vcmp.ge.f32.partialorder %v7864_v8, 0.0  ;;  %v7896_v12 = vmul.f32 0.01, %v7864_v8  ;;  %13078 = vmatprep.subr.bf16.mxu1 %v15825_v63  ;;  %v7911_v14 = vsel %vm7879_vm10, %v7863_v3, %v7895_v7  ;;  %v14069_v3 = vld [vmem:[#allocation24 + $0xd0] sm:$0xff]   ;;  %13137 = vmatpush3.bf16.msra.mxu0 %v14099_v5  ;;  %v14072_v7 = vld [vmem:[#allocation24 + $0xe8] sm:$0xff]  }
0x1482   :  { %vm7878_vm13 = vcmp.ge.f32.partialorder %v7862_v11, 0.0  ;;  %v7894_v13 = vmul.f32 0.01, %v7862_v11  ;;  %v7909_v16 = vsel %vm7877_vm11, %v7861_v6, %v7893_v10  ;;  %v14070_v6 = vld [vmem:[#allocation24 + $0xd8] sm:$0xff]   ;;  %v14075_v10 = vld [vmem:[#allocation24 + $0x100] sm:$0xff]   ;;  %v14107_v5 = vld [vmem:[#allocation24 + $0x1f0] sm:$0xff]  }
0x1483   :  { %v7912_v15 = vsel %vm7880_vm12, %v7864_v8, %v7896_v12  ;;  %v14073_v8 = vld [vmem:[#allocation24 + $0xf0] sm:$0xff]  }
0x1484   :  { %v15837_v18 = vpack.c.bf16 %v7912_v15, %v7911_v14  ;;  %v7910_v19 = vsel %vm7878_vm13, %v7862_v11, %v7894_v13  ;;  %v13070_v20 = vpop.f32.mrb[148].mxu0  ;;  %13079 = vmatpush3.bf16.msra.mxu1 %v15825_v63  ;;  %v14076_v11 = vld [vmem:[#allocation24 + $0x108] sm:$0xff]   ;;  %v14077_v12 = vld [vmem:[#allocation24 + $0x110] sm:$0xff]   ;;  %v15923_v13 = vld [vmem:[#allocation25] sm:$0xff]  }
0x1485   :  { %v15840_v21 = vpack.c.bf16 %v7910_v19, %v7909_v16  ;;  %v7867_v22 = vadd.f32 %v13070_v20, %v15808_v39  ;;  %v7816_v27 = vpop.f32.mrb[149].mxu0  ;;  %13154 = vmatprep.subr.bf16.mxu0 %v15923_v13  ;;  %v14078_v14 = vld [vmem:[#allocation24 + $0x118] sm:$0xff]   ;;  %v14079_v15 = vld [vmem:[#allocation24 + $0x120] sm:$0xff]   ;;  %v14080_v16 = vld [vmem:[#allocation24 + $0x128] sm:$0xff]  }
0x1486   :  { %v7865_v32 = vadd.f32 %v15808_v39, %v7816_v27  ;;  %v13071_v33 = vpop.f32.mrb[150].mxu0  ;;  %v14081_v19 = vld [vmem:[#allocation24 + $0x130] sm:$0xff]   ;;  %v14082_v20 = vld [vmem:[#allocation24 + $0x138] sm:$0xff]   ;;  %v14084_v27 = vld [vmem:[#allocation24 + $0x148] sm:$0xff]  }
0x1487   :  { %v7899_v34 = vmul.f32 0.01, %v7867_v22  ;;  %v7868_v35 = vadd.f32 %v13071_v33, %v15808_v39  ;;  %v7819_v36 = vpop.f32.mrb[151].mxu0  ;;  %13080 = vmatprep.subr.bf16.mxu1 %v15840_v21  ;;  %vm7883_vm14 = vcmp.ge.f32.partialorder %v7867_v22, 0.0  ;;  %v14086_v33 = vld [vmem:[#allocation24 + $0x158] sm:$0xff]  }
0x1488   :  { %v7897_v37 = vmul.f32 0.01, %v7865_v32  ;;  %v7866_v40 = vadd.f32 %v15808_v39, %v7819_v36  ;;  %13081 = vmatpush3.bf16.msra.mxu1 %v15840_v21  ;;  %vm7881_vm15 = vcmp.ge.f32.partialorder %v7865_v32, 0.0  ;;  %v14044_v39 = vld [vmem:[#allocation24 + $0x8] sm:$0xff]   ;;  %v14089_v36 = vld [vmem:[#allocation24 + $0x170] sm:$0xff]  }
0x1489   :  { %vm7884_vm0 = vcmp.ge.f32.partialorder %v7868_v35, 0.0  ;;  %v7900_v38 = vmul.f32 0.01, %v7868_v35  ;;  %13082 = vmatprep.subr.bf16.mxu1 %v15837_v18  ;;  %v7915_v42 = vsel %vm7883_vm14, %v7867_v22, %v7899_v34  ;;  %v14083_v22 = vld [vmem:[#allocation24 + $0x140] sm:$0xff]  }
0x148a   :  { %vm7882_vm1 = vcmp.ge.f32.partialorder %v7866_v40, 0.0  ;;  %v7898_v41 = vmul.f32 0.01, %v7866_v40  ;;  %v7913_v44 = vsel %vm7881_vm15, %v7865_v32, %v7897_v37  ;;  %v14085_v32 = vld [vmem:[#allocation24 + $0x150] sm:$0xff]   ;;  %v14087_v34 = vld [vmem:[#allocation24 + $0x160] sm:$0xff]   ;;  %v14090_v37 = vld [vmem:[#allocation24 + $0x178] sm:$0xff]  }
0x148b   :  { %v7916_v43 = vsel %vm7884_vm0, %v7868_v35, %v7900_v38  ;;  %v14088_v35 = vld [vmem:[#allocation24 + $0x168] sm:$0xff]  }
0x148c   :  { %v15849_v23 = vpack.c.bf16 %v7916_v43, %v7915_v42  ;;  %v7914_v24 = vsel %vm7882_vm1, %v7866_v40, %v7898_v41  ;;  %13083 = vmatpush3.bf16.msra.mxu1 %v15837_v18  ;;  %v14091_v40 = vld [vmem:[#allocation24 + $0x180] sm:$0xff]   ;;  %v14092_v38 = vld [vmem:[#allocation24 + $0x188] sm:$0xff]   ;;  %v14093_v41 = vld [vmem:[#allocation24 + $0x190] sm:$0xff]  }
0x148d   :  { %v15852_v25 = vpack.c.bf16 %v7914_v24, %v7913_v44  ;;  %v14094_v42 = vld [vmem:[#allocation24 + $0x198] sm:$0xff]   ;;  %v14095_v43 = vld [vmem:[#allocation24 + $0x1a0] sm:$0xff]   ;;  %v14096_v44 = vld [vmem:[#allocation24 + $0x1a8] sm:$0xff]  }
0x148e   :  { %v14097_v24 = vld [vmem:[#allocation24 + $0x1b0] sm:$0xff]  }
0x148f   :  { %13084 = vmatprep.subr.bf16.mxu1 %v15852_v25 }
0x1490   :  { %13085 = vmatpush3.bf16.msra.mxu1 %v15852_v25 }
0x1491   :  { %13086 = vmatprep.subr.bf16.mxu1 %v15849_v23 }
0x1494   :  { %13087 = vmatpush3.bf16.msra.mxu1 %v15849_v23 }
0x1495   :  { %13104 = vmatprep.subr.bf16.mxu1 %v15816_v49 }
0x1497   :  { %13089 = vmatmul.mubr.bf16.vlgmr.msra.gmra.mrb[240].mxu1 %v14044_v39 }
0x1498   :  { %13105 = vmatpush3.bf16.msra.mxu1 %v15816_v49  ;;  %13092 = vmatprep.mubr.bf16.mxu1 %v14045_v26 }
0x1499   :  { %13106 = vmatprep.subr.bf16.mxu1 %v15814_v17 }
0x149c   :  { %13107 = vmatpush3.bf16.msra.mxu1 %v15814_v17 }
0x149d   :  { %13108 = vmatprep.subr.bf16.mxu1 %v15828_v2 }
0x149f   :  { %13093 = vmatmul.mubr.bf16.gmra.mrb[244].mxu1 %v14046_v28  ;;  %v14098_v28 = vld [vmem:[#allocation24 + $0x1b8] sm:$0xff]  }
0x14a0   :  { %13109 = vmatpush3.bf16.msra.mxu1 %v15828_v2  ;;  %13096 = vmatprep.mubr.bf16.mxu1 %v14047_v45 }
0x14a1   :  { %13110 = vmatprep.subr.bf16.mxu1 %v15825_v63 }
0x14a4   :  { %13111 = vmatpush3.bf16.msra.mxu1 %v15825_v63 }
0x14a5   :  { %13112 = vmatprep.subr.bf16.mxu1 %v15840_v21 }
0x14a7   :  { %13097 = vmatmul.mubr.bf16.gmra.mrb[248].mxu1 %v14048_v46  ;;  %v14100_v46 = vld [vmem:[#allocation24 + $0x1c0] sm:$0xff]  }
0x14a8   :  { %13113 = vmatpush3.bf16.msra.mxu1 %v15840_v21  ;;  %13100 = vmatprep.mubr.bf16.mxu1 %v14049_v29 }
0x14a9   :  { %13114 = vmatprep.subr.bf16.mxu1 %v15837_v18 }
0x14ac   :  { %13115 = vmatpush3.bf16.msra.mxu1 %v15837_v18 }
0x14ad   :  { %13116 = vmatprep.subr.bf16.mxu1 %v15852_v25 }
0x14af   :  { %13101 = vmatmul.mubr.bf16.gmra.mrb[252].mxu1 %v14050_v47 }
0x14b0   :  { %13117 = vmatpush3.bf16.msra.mxu1 %v15852_v25  ;;  %13120 = vmatprep.mubr.bf16.mxu1 %v14051_v31 }
0x14b1   :  { %13118 = vmatprep.subr.bf16.mxu1 %v15849_v23 }
0x14b4   :  { %13119 = vmatpush3.bf16.msra.mxu1 %v15849_v23 }
0x14b5   :  { %13172 = vmatprep.subr.bf16.mxu1 %v15816_v49 }
0x14b7   :  { %13121 = vmatmul.mubr.bf16.vlgmr.msra.gmra.mrb[0].mxu1 %v14052_v48 }
0x14b8   :  { %13173 = vmatpush3.bf16.msra.mxu1 %v15816_v49  ;;  %13124 = vmatprep.mubr.bf16.mxu1 %v14053_v50 }
0x14b9   :  { %13174 = vmatprep.subr.bf16.mxu1 %v15814_v17 }
0x14bc   :  { %13175 = vmatpush3.bf16.msra.mxu1 %v15814_v17 }
0x14bd   :  { %13176 = vmatprep.subr.bf16.mxu1 %v15828_v2 }
0x14bf   :  { %13125 = vmatmul.mubr.bf16.gmra.mrb[4].mxu1 %v14054_v52  ;;  %v14101_v52 = vld [vmem:[#allocation24 + $0x1c8] sm:$0xff]  }
0x14c0   :  { %13177 = vmatpush3.bf16.msra.mxu1 %v15828_v2  ;;  %13128 = vmatprep.mubr.bf16.mxu1 %v14055_v54 }
0x14c1   :  { %13178 = vmatprep.subr.bf16.mxu1 %v15825_v63 }
0x14c4   :  { %13179 = vmatpush3.bf16.msra.mxu1 %v15825_v63 }
0x14c5   :  { %13180 = vmatprep.subr.bf16.mxu1 %v15840_v21 }
0x14c7   :  { %13129 = vmatmul.mubr.bf16.gmra.mrb[8].mxu1 %v14056_v55  ;;  %v14103_v55 = vld [vmem:[#allocation24 + $0x1d0] sm:$0xff]  }
0x14c8   :  { %13181 = vmatpush3.bf16.msra.mxu1 %v15840_v21  ;;  %13132 = vmatprep.mubr.bf16.mxu1 %v14057_v56 }
0x14c9   :  { %13182 = vmatprep.subr.bf16.mxu1 %v15837_v18 }
0x14cc   :  { %13183 = vmatpush3.bf16.msra.mxu1 %v15837_v18 }
0x14cd   :  { %13184 = vmatprep.subr.bf16.mxu1 %v15852_v25 }
0x14cf   :  { %13133 = vmatmul.mubr.bf16.gmra.mrb[12].mxu1 %v14058_v57 }
0x14d0   :  { %13185 = vmatpush3.bf16.msra.mxu1 %v15852_v25  ;;  %13188 = vmatprep.mubr.bf16.mxu1 %v14059_v58 }
0x14d1   :  { %13186 = vmatprep.subr.bf16.mxu1 %v15849_v23 }
0x14d4   :  { %13187 = vmatpush3.bf16.msra.mxu1 %v15849_v23 }
0x14d5   :  { %13222 = vmatprep.subr.bf16.mxu1 %v15816_v49 }
0x14d7   :  { %13189 = vmatmul.mubr.bf16.vlgmr.msra.gmra.mrb[16].mxu1 %v14060_v30 }
0x14d8   :  { %13223 = vmatpush3.bf16.msra.mxu1 %v15816_v49  ;;  %13192 = vmatprep.mubr.bf16.mxu1 %v14061_v59 }
0x14d9   :  { %13224 = vmatprep.subr.bf16.mxu1 %v15814_v17 }
0x14dc   :  { %13225 = vmatpush3.bf16.msra.mxu1 %v15814_v17 }
0x14dd   :  { %13226 = vmatprep.subr.bf16.mxu1 %v15828_v2 }
0x14df   :  { %13193 = vmatmul.mubr.bf16.gmra.mrb[20].mxu1 %v14062_v60  ;;  %v14104_v60 = vld [vmem:[#allocation24 + $0x1d8] sm:$0xff]  }
0x14e0   :  { %13227 = vmatpush3.bf16.msra.mxu1 %v15828_v2  ;;  %13196 = vmatprep.mubr.bf16.mxu1 %v14063_v53 }
0x14e1   :  { %13228 = vmatprep.subr.bf16.mxu1 %v15825_v63 }
0x14e4   :  { %13229 = vmatpush3.bf16.msra.mxu1 %v15825_v63 }
0x14e5   :  { %13230 = vmatprep.subr.bf16.mxu1 %v15840_v21 }
0x14e7   :  { %13197 = vmatmul.mubr.bf16.gmra.mrb[24].mxu1 %v14064_v51  ;;  %v14105_v51 = vld [vmem:[#allocation24 + $0x1e0] sm:$0xff]  }
0x14e8   :  { %13231 = vmatpush3.bf16.msra.mxu1 %v15840_v21  ;;  %13200 = vmatprep.mubr.bf16.mxu1 %v14065_v61 }
0x14e9   :  { %13232 = vmatprep.subr.bf16.mxu1 %v15837_v18 }
0x14ec   :  { %13233 = vmatpush3.bf16.msra.mxu1 %v15837_v18 }
0x14ed   :  { %13234 = vmatprep.subr.bf16.mxu1 %v15852_v25 }
0x14ef   :  { %13201 = vmatmul.mubr.bf16.gmra.mrb[28].mxu1 %v14066_v62 }
0x14f0   :  { %13235 = vmatpush3.bf16.msra.mxu1 %v15852_v25  ;;  %13238 = vmatprep.mubr.bf16.mxu1 %v14067_v0 }
0x14f1   :  { %13236 = vmatprep.subr.bf16.mxu1 %v15849_v23 }
0x14f4   :  { %13237 = vmatpush3.bf16.msra.mxu1 %v15849_v23 }
0x14f5   :  { %13272 = vmatprep.subr.bf16.mxu1 %v15816_v49 }
0x14f7   :  { %13239 = vmatmul.mubr.bf16.vlgmr.msra.gmra.mrb[32].mxu1 %v14068_v1  ;;  %v14106_v1 = vld [vmem:[#allocation24 + $0x1e8] sm:$0xff]  }
0x14f8   :  { %13273 = vmatpush3.bf16.msra.mxu1 %v15816_v49  ;;  %13242 = vmatprep.mubr.bf16.mxu1 %v14069_v3 }
0x14f9   :  { %13274 = vmatprep.subr.bf16.mxu1 %v15814_v17 }
0x14fc   :  { %13275 = vmatpush3.bf16.msra.mxu1 %v15814_v17 }
0x14fd   :  { %13276 = vmatprep.subr.bf16.mxu1 %v15828_v2 }
0x14ff   :  { %13243 = vmatmul.mubr.bf16.gmra.mrb[36].mxu1 %v14070_v6 }
0x1500   :  { %13277 = vmatpush3.bf16.msra.mxu1 %v15828_v2  ;;  %13246 = vmatprep.mubr.bf16.mxu1 %v14071_v4 }
0x1501   :  { %13278 = vmatprep.subr.bf16.mxu1 %v15825_v63 }
0x1504   :  { %13279 = vmatpush3.bf16.msra.mxu1 %v15825_v63 }
0x1505   :  { %13280 = vmatprep.subr.bf16.mxu1 %v15840_v21 }
0x1507   :  { %13247 = vmatmul.mubr.bf16.gmra.mrb[40].mxu1 %v14072_v7 }
0x1508   :  { %13281 = vmatpush3.bf16.msra.mxu1 %v15840_v21  ;;  %13250 = vmatprep.mubr.bf16.mxu1 %v14073_v8  ;;  %v14108_v8 = vld [vmem:[#allocation24 + $0x1f8] sm:$0xff]  }
0x1509   :  { %13282 = vmatprep.subr.bf16.mxu1 %v15837_v18 }
0x150c   :  { %13283 = vmatpush3.bf16.msra.mxu1 %v15837_v18 }
0x150d   :  { %13284 = vmatprep.subr.bf16.mxu1 %v15852_v25 }
0x150f   :  { %13251 = vmatmul.mubr.bf16.gmra.mrb[44].mxu1 %v14074_v9 }
0x1510   :  { %13285 = vmatpush3.bf16.msra.mxu1 %v15852_v25  ;;  %13288 = vmatprep.mubr.bf16.mxu1 %v14075_v10 }
0x1511   :  { %13286 = vmatprep.subr.bf16.mxu1 %v15849_v23 }
0x1514   :  { %13287 = vmatpush3.bf16.msra.mxu1 %v15849_v23 }
0x1515   :  { %13322 = vmatprep.subr.bf16.mxu1 %v15816_v49 }
0x1517   :  { %13289 = vmatmul.mubr.bf16.vlgmr.msra.gmra.mrb[48].mxu1 %v14076_v11 }
0x1518   :  { %13323 = vmatpush3.bf16.msra.mxu1 %v15816_v49  ;;  %13292 = vmatprep.mubr.bf16.mxu1 %v14077_v12 }
0x1519   :  { %13324 = vmatprep.subr.bf16.mxu1 %v15814_v17 }
0x151c   :  { %13325 = vmatpush3.bf16.msra.mxu1 %v15814_v17 }
0x151d   :  { %13326 = vmatprep.subr.bf16.mxu1 %v15828_v2 }
0x151f   :  { %13293 = vmatmul.mubr.bf16.gmra.mrb[52].mxu1 %v14078_v14  ;;  %v14110_v14 = vld [vmem:[#allocation24 + $0x200] sm:$0xff]  }
0x1520   :  { %13327 = vmatpush3.bf16.msra.mxu1 %v15828_v2  ;;  %13296 = vmatprep.mubr.bf16.mxu1 %v14079_v15  ;;  %v14109_v15 = vld [vmem:[#allocation25 + $0x10] sm:$0xff]  }
0x1521   :  { %13328 = vmatprep.subr.bf16.mxu1 %v15825_v63 }
0x1524   :  { %13329 = vmatpush3.bf16.msra.mxu1 %v15825_v63 }
0x1525   :  { %13330 = vmatprep.subr.bf16.mxu1 %v15840_v21 }
0x1527   :  { %13297 = vmatmul.mubr.bf16.gmra.mrb[56].mxu1 %v14080_v16  ;;  %v14111_v16 = vld [vmem:[#allocation24 + $0x208] sm:$0xff]  }
0x1528   :  { %13331 = vmatpush3.bf16.msra.mxu1 %v15840_v21  ;;  %13300 = vmatprep.mubr.bf16.mxu1 %v14081_v19 }
0x1529   :  { %13332 = vmatprep.subr.bf16.mxu1 %v15837_v18 }
0x152c   :  { %13333 = vmatpush3.bf16.msra.mxu1 %v15837_v18 }
0x152d   :  { %13334 = vmatprep.subr.bf16.mxu1 %v15852_v25 }
0x152f   :  { %13301 = vmatmul.mubr.bf16.gmra.mrb[60].mxu1 %v14082_v20  ;;  %v14112_v20 = vld [vmem:[#allocation24 + $0x210] sm:$0xff]  }
0x1530   :  { %13335 = vmatpush3.bf16.msra.mxu1 %v15852_v25  ;;  %13338 = vmatprep.mubr.bf16.mxu1 %v14083_v22 }
0x1531   :  { %13336 = vmatprep.subr.bf16.mxu1 %v15849_v23 }
0x1534   :  { %13337 = vmatpush3.bf16.msra.mxu1 %v15849_v23 }
0x1535   :  { %13372 = vmatprep.subr.bf16.mxu1 %v15816_v49 }
0x1537   :  { %13339 = vmatmul.mubr.bf16.vlgmr.msra.gmra.mrb[64].mxu1 %v14084_v27 }
0x1538   :  { %13373 = vmatpush3.bf16.msra.mxu1 %v15816_v49  ;;  %13342 = vmatprep.mubr.bf16.mxu1 %v14085_v32 }
0x1539   :  { %13374 = vmatprep.subr.bf16.mxu1 %v15814_v17 }
0x153c   :  { %13375 = vmatpush3.bf16.msra.mxu1 %v15814_v17 }
0x153d   :  { %13376 = vmatprep.subr.bf16.mxu1 %v15828_v2 }
0x153f   :  { %13343 = vmatmul.mubr.bf16.gmra.mrb[68].mxu1 %v14086_v33 }
0x1540   :  { %13377 = vmatpush3.bf16.msra.mxu1 %v15828_v2  ;;  %13346 = vmatprep.mubr.bf16.mxu1 %v14087_v34 }
0x1541   :  { %13378 = vmatprep.subr.bf16.mxu1 %v15825_v63 }
0x1544   :  { %13379 = vmatpush3.bf16.msra.mxu1 %v15825_v63 }
0x1545   :  { %13380 = vmatprep.subr.bf16.mxu1 %v15840_v21 }
0x1547   :  { %13347 = vmatmul.mubr.bf16.gmra.mrb[72].mxu1 %v14088_v35  ;;  %v14114_v35 = vld [vmem:[#allocation24 + $0x220] sm:$0xff]  }
0x1548   :  { %13381 = vmatpush3.bf16.msra.mxu1 %v15840_v21  ;;  %13350 = vmatprep.mubr.bf16.mxu1 %v14089_v36 }
0x1549   :  { %13382 = vmatprep.subr.bf16.mxu1 %v15837_v18 }
0x154c   :  { %13383 = vmatpush3.bf16.msra.mxu1 %v15837_v18 }
0x154d   :  { %13384 = vmatprep.subr.bf16.mxu1 %v15852_v25 }
0x154f   :  { %13351 = vmatmul.mubr.bf16.gmra.mrb[76].mxu1 %v14090_v37 }
0x1550   :  { %13385 = vmatpush3.bf16.msra.mxu1 %v15852_v25  ;;  %13388 = vmatprep.mubr.bf16.mxu1 %v14091_v40 }
0x1551   :  { %13386 = vmatprep.subr.bf16.mxu1 %v15849_v23 }
0x1554   :  { %13387 = vmatpush3.bf16.msra.mxu1 %v15849_v23 }
0x1555   :  { %13422 = vmatprep.subr.bf16.mxu1 %v15816_v49 }
0x1557   :  { %13389 = vmatmul.mubr.bf16.vlgmr.msra.gmra.mrb[80].mxu1 %v14092_v38 }
0x1558   :  { %13423 = vmatpush3.bf16.msra.mxu1 %v15816_v49  ;;  %13392 = vmatprep.mubr.bf16.mxu1 %v14093_v41  ;;  %v14115_v41 = vld [vmem:[#allocation24 + $0x228] sm:$0xff]  }
0x1559   :  { %13424 = vmatprep.subr.bf16.mxu1 %v15814_v17 }
0x155c   :  { %13425 = vmatpush3.bf16.msra.mxu1 %v15814_v17 }
0x155d   :  { %13426 = vmatprep.subr.bf16.mxu1 %v15828_v2 }
0x155f   :  { %13393 = vmatmul.mubr.bf16.gmra.mrb[84].mxu1 %v14094_v42 }
0x1560   :  { %13427 = vmatpush3.bf16.msra.mxu1 %v15828_v2  ;;  %13396 = vmatprep.mubr.bf16.mxu1 %v14095_v43  ;;  %v14116_v43 = vld [vmem:[#allocation24 + $0x230] sm:$0xff]  }
0x1561   :  { %13428 = vmatprep.subr.bf16.mxu1 %v15825_v63 }
0x1564   :  { %13429 = vmatpush3.bf16.msra.mxu1 %v15825_v63 }
0x1565   :  { %13430 = vmatprep.subr.bf16.mxu1 %v15840_v21 }
0x1567   :  { %13397 = vmatmul.mubr.bf16.gmra.mrb[88].mxu1 %v14096_v44 }
0x1568   :  { %13431 = vmatpush3.bf16.msra.mxu1 %v15840_v21  ;;  %13400 = vmatprep.mubr.bf16.mxu1 %v14097_v24 }
0x1569   :  { %13432 = vmatprep.subr.bf16.mxu1 %v15837_v18 }
0x156a   :  { %v15968_v39 = vpop.f32.mrb[240].mxu1 }
0x156b   :  { %v15970_v26 = vpop.f32.mrb[241].mxu1 }
0x156c   :  { %13433 = vmatpush3.bf16.msra.mxu1 %v15837_v18  ;;  %v15973_v45 = vpop.f32.mrb[242].mxu1 }
0x156d   :  { %13434 = vmatprep.subr.bf16.mxu1 %v15852_v25  ;;  %v8088_v29 = vpack.c.bf16 %v15973_v45, %v15968_v39  ;;  %v15978_v47 = vpop.f32.mrb[243].mxu1 }
0x156e   :  { %v8087_v31 = vpack.c.bf16 %v15978_v47, %v15970_v26 }
0x156f   :  { %13401 = vmatmul.mubr.bf16.gmra.mrb[92].mxu1 %v14098_v28 }
0x1570   :  { %13435 = vmatpush3.bf16.msra.mxu1 %v15852_v25  ;;  %13438 = vmatprep.mubr.bf16.mxu1 %v14100_v46 }
0x1571   :  { %13436 = vmatprep.subr.bf16.mxu1 %v15849_v23 }
0x1572   :  { %v15984_v48 = vpop.f32.mrb[244].mxu1 }
0x1573   :  { %v15986_v50 = vpop.f32.mrb[245].mxu1 }
0x1574   :  { %13437 = vmatpush3.bf16.msra.mxu1 %v15849_v23  ;;  %v15989_v54 = vpop.f32.mrb[246].mxu1 }
0x1575   :  { %13472 = vmatprep.subr.bf16.mxu1 %v15816_v49  ;;  %v8090_v56 = vpack.c.bf16 %v15989_v54, %v15984_v48  ;;  %v15994_v57 = vpop.f32.mrb[247].mxu1 }
0x1576   :  { %v8089_v58 = vpack.c.bf16 %v15994_v57, %v15986_v50 }
0x1577   :  { %13439 = vmatmul.mubr.bf16.vlgmr.msra.gmra.mrb[96].mxu1 %v14101_v52 }
0x1578   :  { %13473 = vmatpush3.bf16.msra.mxu1 %v15816_v49  ;;  %13442 = vmatprep.mubr.bf16.mxu1 %v14103_v55  ;;  %v14117_v55 = vld [vmem:[#allocation24 + $0x238] sm:$0xff]  }
0x1579   :  { %13474 = vmatprep.subr.bf16.mxu1 %v15814_v17 }
0x157a   :  { %v16000_v30 = vpop.f32.mrb[248].mxu1 }
0x157b   :  { %v16002_v59 = vpop.f32.mrb[249].mxu1 }
0x157c   :  { %13475 = vmatpush3.bf16.msra.mxu1 %v15814_v17  ;;  %v16005_v53 = vpop.f32.mrb[250].mxu1 }
0x157d   :  { %13476 = vmatprep.subr.bf16.mxu1 %v15828_v2  ;;  %v8092_v61 = vpack.c.bf16 %v16005_v53, %v16000_v30  ;;  %v16010_v62 = vpop.f32.mrb[251].mxu1 }
0x157e   :  { %v8091_v49 = vpack.c.bf16 %v16010_v62, %v16002_v59 }
0x157f   :  { %13443 = vmatmul.mubr.bf16.gmra.mrb[100].mxu1 %v14104_v60 }
0x1580   :  { %13477 = vmatpush3.bf16.msra.mxu1 %v15828_v2  ;;  %13446 = vmatprep.mubr.bf16.mxu1 %v14105_v51 }
0x1581   :  { %13478 = vmatprep.subr.bf16.mxu1 %v15825_v63 }
0x1582   :  { %v16016_v17 = vpop.f32.mrb[252].mxu1 }
0x1583   :  { %v16018_v0 = vpop.f32.mrb[253].mxu1 }
0x1584   :  { %13479 = vmatpush3.bf16.msra.mxu1 %v15825_v63  ;;  %v16021_v3 = vpop.f32.mrb[254].mxu1 }
0x1585   :  { %13480 = vmatprep.subr.bf16.mxu1 %v15840_v21  ;;  %v8094_v6 = vpack.c.bf16 %v16021_v3, %v16016_v17  ;;  %v16026_v4 = vpop.f32.mrb[255].mxu1 }
0x1586   :  { %v8093_v2 = vpack.c.bf16 %v16026_v4, %v16018_v0 }
0x1587   :  { %13447 = vmatmul.mubr.bf16.gmra.mrb[104].mxu1 %v14106_v1 }
0x1588   :  { %13481 = vmatpush3.bf16.msra.mxu1 %v15840_v21  ;;  %13450 = vmatprep.mubr.bf16.mxu1 %v14107_v5 }
0x1589   :  { %13482 = vmatprep.subr.bf16.mxu1 %v15837_v18 }
0x158a   :  { %v13122_v63 = vpop.f32.mrb[0].mxu1 }
0x158b   :  { %v8196_v7 = vpop.f32.mrb[1].mxu1 }
0x158c   :  { %v13123_v9 = vpop.f32.mrb[2].mxu1  ;;  %13483 = vmatpush3.bf16.msra.mxu1 %v15837_v18 }
0x158d   :  { %v8260_v10 = vpack.c.bf16 %v13123_v9, %v13122_v63  ;;  %v8199_v11 = vpop.f32.mrb[3].mxu1  ;;  %13484 = vmatprep.subr.bf16.mxu1 %v15852_v25  ;;  %v14118_v63 = vld [vmem:[#allocation25 + $0x18] sm:$0xff]  }
0x158e   :  { %v8259_v12 = vpack.c.bf16 %v8199_v11, %v8196_v7 }
0x158f   :  { %13451 = vmatmul.mubr.bf16.gmra.mrb[108].mxu1 %v14108_v8 }
0x1590   :  { %13138 = vmatprep.mubr.msk.bf16.mxu0 %vm1680_vm9, %v8259_v12  ;;  %13485 = vmatpush3.bf16.msra.mxu1 %v15852_v25 }
0x1591   :  { %13139 = vmatmul.mubr.msk.bf16.vlgmr.msra.gmra.mrb[152].mxu0 %vm1680_vm9, %v8260_v10  ;;  %13486 = vmatprep.subr.bf16.mxu1 %v15849_v23 }
0x1592   :  { %v13126_v21 = vpop.f32.mrb[4].mxu1  ;;  %13155 = vmatpush3.bf16.msra.mxu0 %v15923_v13  ;;  %13488 = vmatprep.mubr.bf16.mxu1 %v14110_v14  ;;  %v14113_v13 = vld [vmem:[#allocation24 + $0x218] sm:$0xff]  }
0x1593   :  { %v8212_v18 = vpop.f32.mrb[5].mxu1  ;;  %13204 = vmatprep.subr.bf16.mxu0 %v14109_v15 }
0x1594   :  { %v13127_v19 = vpop.f32.mrb[6].mxu1  ;;  %13487 = vmatpush3.bf16.msra.mxu1 %v15849_v23 }
0x1595   :  { %v8262_v22 = vpack.c.bf16 %v13127_v19, %v13126_v21  ;;  %v8215_v27 = vpop.f32.mrb[7].mxu1 }
0x1596   :  { %v8261_v32 = vpack.c.bf16 %v8215_v27, %v8212_v18 }
0x1597   :  { %13489 = vmatmul.mubr.bf16.vlgmr.msra.gmra.mrb[112].mxu1 %v14111_v16 }
0x1598   :  { %13142 = vmatprep.mubr.msk.bf16.mxu0 %vm1680_vm9, %v8261_v32  ;;  %13492 = vmatprep.mubr.bf16.mxu1 %v14112_v20 }
0x1599   :  { %13143 = vmatmul.mubr.msk.bf16.gmra.mrb[156].mxu0 %vm1680_vm9, %v8262_v22 }
0x159a   :  { %v13130_v25 = vpop.f32.mrb[8].mxu1 }
0x159b   :  { %v8228_v33 = vpop.f32.mrb[9].mxu1 }
0x159c   :  { %v13131_v34 = vpop.f32.mrb[10].mxu1 }
0x159d   :  { %v8264_v36 = vpack.c.bf16 %v13131_v34, %v13130_v25  ;;  %v8231_v37 = vpop.f32.mrb[11].mxu1 }
0x159e   :  { %v8263_v40 = vpack.c.bf16 %v8231_v37, %v8228_v33 }
0x159f   :  { %13493 = vmatmul.mubr.bf16.gmra.mrb[116].mxu1 %v14113_v13 }
0x15a0   :  { %13146 = vmatprep.mubr.msk.bf16.mxu0 %vm1680_vm9, %v8263_v40  ;;  %13496 = vmatprep.mubr.bf16.mxu1 %v14114_v35 }
0x15a1   :  { %13147 = vmatmul.mubr.msk.bf16.gmra.mrb[160].mxu0 %vm1680_vm9, %v8264_v36 }
0x15a2   :  { %v13134_v23 = vpop.f32.mrb[12].mxu1 }
0x15a3   :  { %v8244_v38 = vpop.f32.mrb[13].mxu1 }
0x15a4   :  { %v13135_v42 = vpop.f32.mrb[14].mxu1 }
0x15a5   :  { %v8266_v44 = vpack.c.bf16 %v13135_v42, %v13134_v23  ;;  %v8247_v24 = vpop.f32.mrb[15].mxu1 }
0x15a6   :  { %v8265_v28 = vpack.c.bf16 %v8247_v24, %v8244_v38  ;;  %v14120_v38 = vld [vmem:[#allocation25 + $0x28] sm:$0xff]  }
0x15a7   :  { %13497 = vmatmul.mubr.bf16.gmra.mrb[120].mxu1 %v14115_v41 }
0x15a8   :  { %13150 = vmatprep.mubr.msk.bf16.mxu0 %vm1680_vm9, %v8265_v28  ;;  %13500 = vmatprep.mubr.bf16.mxu1 %v14116_v43 }
0x15a9   :  { %13151 = vmatmul.mubr.msk.bf16.gmra.mrb[164].mxu0 %vm1680_vm9, %v8266_v44 }
0x15aa   :  { %13156 = vmatprep.mubr.msk.bf16.mxu0 %vm1680_vm9, %v8087_v31  ;;  %v13190_v46 = vpop.f32.mrb[16].mxu1 }
0x15ab   :  { %v8623_v52 = vpop.f32.mrb[17].mxu1 }
0x15ac   :  { %v13191_v60 = vpop.f32.mrb[18].mxu1 }
0x15ad   :  { %v8687_v51 = vpack.c.bf16 %v13191_v60, %v13190_v46  ;;  %v8626_v1 = vpop.f32.mrb[19].mxu1 }
0x15ae   :  { %v8686_v5 = vpack.c.bf16 %v8626_v1, %v8623_v52 }
0x15af   :  { %13501 = vmatmul.mubr.bf16.gmra.mrb[124].mxu1 %v14117_v55 }
0x15b1   :  { %13157 = vmatmul.mubr.msk.bf16.vlgmr.msra.gmra.mrb[152].mxu0 %vm1680_vm9, %v8088_v29 }
0x15b2   :  { %13160 = vmatprep.mubr.msk.bf16.mxu0 %vm1680_vm9, %v8089_v58  ;;  %13205 = vmatpush3.bf16.msra.mxu0 %v14109_v15  ;;  %v13194_v26 = vpop.f32.mrb[20].mxu1 }
0x15b3   :  { %v8639_v47 = vpop.f32.mrb[21].mxu1  ;;  %13254 = vmatprep.subr.bf16.mxu0 %v14118_v63 }
0x15b4   :  { %v13195_v31 = vpop.f32.mrb[22].mxu1 }
0x15b5   :  { %v8689_v7 = vpack.c.bf16 %v13195_v31, %v13194_v26  ;;  %v8642_v8 = vpop.f32.mrb[23].mxu1 }
0x15b6   :  { %v8688_v9 = vpack.c.bf16 %v8642_v8, %v8639_v47 }
0x15b9   :  { %13161 = vmatmul.mubr.msk.bf16.gmra.mrb[156].mxu0 %vm1680_vm9, %v8090_v56 }
0x15ba   :  { %13164 = vmatprep.mubr.msk.bf16.mxu0 %vm1680_vm9, %v8091_v49  ;;  %v13198_v39 = vpop.f32.mrb[24].mxu1 }
0x15bb   :  { %v8655_v45 = vpop.f32.mrb[25].mxu1 }
0x15bc   :  { %v13199_v29 = vpop.f32.mrb[26].mxu1 }
0x15bd   :  { %v8691_v50 = vpack.c.bf16 %v13199_v29, %v13198_v39  ;;  %v8658_v57 = vpop.f32.mrb[27].mxu1 }
0x15be   :  { %v8690_v58 = vpack.c.bf16 %v8658_v57, %v8655_v45  ;;  %v14121_v57 = vld [vmem:[#allocation25 + $0x30] sm:$0xff]  }
0x15c1   :  { %13165 = vmatmul.mubr.msk.bf16.gmra.mrb[160].mxu0 %vm1680_vm9, %v8092_v61 }
0x15c2   :  { %13168 = vmatprep.mubr.msk.bf16.mxu0 %vm1680_vm9, %v8093_v2  ;;  %v13202_v48 = vpop.f32.mrb[28].mxu1  ;;  %v14119_v2 = vld [vmem:[#allocation25 + $0x20] sm:$0xff]  }
0x15c3   :  { %v8671_v54 = vpop.f32.mrb[29].mxu1 }
0x15c4   :  { %v13203_v56 = vpop.f32.mrb[30].mxu1 }
0x15c5   :  { %v8693_v59 = vpack.c.bf16 %v13203_v56, %v13202_v48  ;;  %v8674_v62 = vpop.f32.mrb[31].mxu1 }
0x15c6   :  { %v8692_v49 = vpack.c.bf16 %v8674_v62, %v8671_v54 }
0x15c9   :  { %13169 = vmatmul.mubr.msk.bf16.gmra.mrb[164].mxu0 %vm1680_vm9, %v8094_v6 }
0x15ca   :  { %13206 = vmatprep.mubr.msk.bf16.mxu0 %vm1680_vm9, %v8686_v5  ;;  %v13240_v30 = vpop.f32.mrb[32].mxu1 }
0x15cb   :  { %v8939_v53 = vpop.f32.mrb[33].mxu1 }
0x15cc   :  { %v13241_v61 = vpop.f32.mrb[34].mxu1 }
0x15cd   :  { %v9003_v10 = vpack.c.bf16 %v13241_v61, %v13240_v30  ;;  %v8942_v0 = vpop.f32.mrb[35].mxu1 }
0x15ce   :  { %v9002_v4 = vpack.c.bf16 %v8942_v0, %v8939_v53 }
0x15d1   :  { %13207 = vmatmul.mubr.msk.bf16.vlgmr.msra.gmra.mrb[152].mxu0 %vm1680_vm9, %v8687_v51 }
0x15d2   :  { %13255 = vmatpush3.bf16.msra.mxu0 %v14118_v63  ;;  %13210 = vmatprep.mubr.msk.bf16.mxu0 %vm1680_vm9, %v8688_v9  ;;  %v13244_v11 = vpop.f32.mrb[36].mxu1 }
0x15d3   :  { %v8955_v12 = vpop.f32.mrb[37].mxu1  ;;  %13304 = vmatprep.subr.bf16.mxu0 %v14119_v2 }
0x15d4   :  { %v13245_v17 = vpop.f32.mrb[38].mxu1 }
0x15d5   :  { %v9005_v3 = vpack.c.bf16 %v13245_v17, %v13244_v11  ;;  %v8958_v6 = vpop.f32.mrb[39].mxu1 }
0x15d6   :  { %v9004_v14 = vpack.c.bf16 %v8958_v6, %v8955_v12 }
0x15d9   :  { %13211 = vmatmul.mubr.msk.bf16.gmra.mrb[156].mxu0 %vm1680_vm9, %v8689_v7 }
0x15da   :  { %13214 = vmatprep.mubr.msk.bf16.mxu0 %vm1680_vm9, %v8690_v58  ;;  %v13248_v15 = vpop.f32.mrb[40].mxu1 }
0x15db   :  { %v8971_v21 = vpop.f32.mrb[41].mxu1 }
0x15dc   :  { %v13249_v18 = vpop.f32.mrb[42].mxu1 }
0x15dd   :  { %v9007_v16 = vpack.c.bf16 %v13249_v18, %v13248_v15  ;;  %v8974_v19 = vpop.f32.mrb[43].mxu1 }
0x15de   :  { %v9006_v20 = vpack.c.bf16 %v8974_v19, %v8971_v21  ;;  %v14122_v19 = vld [vmem:[#allocation25 + $0x38] sm:$0xff]  }
0x15e1   :  { %13215 = vmatmul.mubr.msk.bf16.gmra.mrb[160].mxu0 %vm1680_vm9, %v8691_v50 }
0x15e2   :  { %13218 = vmatprep.mubr.msk.bf16.mxu0 %vm1680_vm9, %v8692_v49  ;;  %v13252_v22 = vpop.f32.mrb[44].mxu1 }
0x15e3   :  { %v8987_v27 = vpop.f32.mrb[45].mxu1 }
0x15e4   :  { %v13253_v32 = vpop.f32.mrb[46].mxu1 }
0x15e5   :  { %v9009_v25 = vpack.c.bf16 %v13253_v32, %v13252_v22  ;;  %v8990_v33 = vpop.f32.mrb[47].mxu1 }
0x15e6   :  { %v9008_v13 = vpack.c.bf16 %v8990_v33, %v8987_v27 }
0x15e9   :  { %13219 = vmatmul.mubr.msk.bf16.gmra.mrb[164].mxu0 %vm1680_vm9, %v8693_v59 }
0x15ea   :  { %13256 = vmatprep.mubr.msk.bf16.mxu0 %vm1680_vm9, %v9002_v4  ;;  %v13290_v34 = vpop.f32.mrb[48].mxu1 }
0x15eb   :  { %v9255_v35 = vpop.f32.mrb[49].mxu1 }
0x15ec   :  { %v13291_v36 = vpop.f32.mrb[50].mxu1 }
0x15ed   :  { %v9319_v37 = vpack.c.bf16 %v13291_v36, %v13290_v34  ;;  %v9258_v40 = vpop.f32.mrb[51].mxu1 }
0x15ee   :  { %v9318_v23 = vpack.c.bf16 %v9258_v40, %v9255_v35 }
0x15f1   :  { %13257 = vmatmul.mubr.msk.bf16.vlgmr.msra.gmra.mrb[152].mxu0 %vm1680_vm9, %v9003_v10 }
0x15f2   :  { %13305 = vmatpush3.bf16.msra.mxu0 %v14119_v2  ;;  %13260 = vmatprep.mubr.msk.bf16.mxu0 %vm1680_vm9, %v9004_v14  ;;  %v13294_v41 = vpop.f32.mrb[52].mxu1 }
0x15f3   :  { %v9271_v42 = vpop.f32.mrb[53].mxu1  ;;  %13354 = vmatprep.subr.bf16.mxu0 %v14120_v38 }
0x15f4   :  { %v13295_v43 = vpop.f32.mrb[54].mxu1 }
0x15f5   :  { %v9321_v44 = vpack.c.bf16 %v13295_v43, %v13294_v41  ;;  %v9274_v24 = vpop.f32.mrb[55].mxu1 }
0x15f6   :  { %v9320_v28 = vpack.c.bf16 %v9274_v24, %v9271_v42 }
0x15f9   :  { %13261 = vmatmul.mubr.msk.bf16.gmra.mrb[156].mxu0 %vm1680_vm9, %v9005_v3 }
0x15fa   :  { %13264 = vmatprep.mubr.msk.bf16.mxu0 %vm1680_vm9, %v9006_v20  ;;  %v13298_v46 = vpop.f32.mrb[56].mxu1 }
0x15fb   :  { %v9287_v52 = vpop.f32.mrb[57].mxu1 }
0x15fc   :  { %v13299_v55 = vpop.f32.mrb[58].mxu1 }
0x15fd   :  { %v9323_v60 = vpack.c.bf16 %v13299_v55, %v13298_v46  ;;  %v9290_v51 = vpop.f32.mrb[59].mxu1 }
0x15fe   :  { %v9322_v1 = vpack.c.bf16 %v9290_v51, %v9287_v52  ;;  %v14123_v51 = vld [vmem:[#allocation25 + $0x40] sm:$0xff]  }
0x1601   :  { %13265 = vmatmul.mubr.msk.bf16.gmra.mrb[160].mxu0 %vm1680_vm9, %v9007_v16 }
0x1602   :  { %13268 = vmatprep.mubr.msk.bf16.mxu0 %vm1680_vm9, %v9008_v13  ;;  %v13302_v5 = vpop.f32.mrb[60].mxu1 }
0x1603   :  { %v9303_v63 = vpop.f32.mrb[61].mxu1 }
0x1604   :  { %v13303_v26 = vpop.f32.mrb[62].mxu1 }
0x1605   :  { %v9325_v47 = vpack.c.bf16 %v13303_v26, %v13302_v5  ;;  %v9306_v31 = vpop.f32.mrb[63].mxu1 }
0x1606   :  { %v9324_v7 = vpack.c.bf16 %v9306_v31, %v9303_v63 }
0x1609   :  { %13269 = vmatmul.mubr.msk.bf16.gmra.mrb[164].mxu0 %vm1680_vm9, %v9009_v25 }
0x160a   :  { %13306 = vmatprep.mubr.msk.bf16.mxu0 %vm1680_vm9, %v9318_v23  ;;  %v13340_v8 = vpop.f32.mrb[64].mxu1 }
0x160b   :  { %v9571_v9 = vpop.f32.mrb[65].mxu1 }
0x160c   :  { %v13341_v39 = vpop.f32.mrb[66].mxu1 }
0x160d   :  { %v9635_v45 = vpack.c.bf16 %v13341_v39, %v13340_v8  ;;  %v9574_v29 = vpop.f32.mrb[67].mxu1 }
0x160e   :  { %v9634_v50 = vpack.c.bf16 %v9574_v29, %v9571_v9 }
0x1611   :  { %13307 = vmatmul.mubr.msk.bf16.vlgmr.msra.gmra.mrb[152].mxu0 %vm1680_vm9, %v9319_v37 }
0x1612   :  { %13355 = vmatpush3.bf16.msra.mxu0 %v14120_v38  ;;  %13310 = vmatprep.mubr.msk.bf16.mxu0 %vm1680_vm9, %v9320_v28  ;;  %v13344_v58 = vpop.f32.mrb[68].mxu1 }
0x1613   :  { %v9587_v48 = vpop.f32.mrb[69].mxu1  ;;  %13404 = vmatprep.subr.bf16.mxu0 %v14121_v57 }
0x1614   :  { %v13345_v54 = vpop.f32.mrb[70].mxu1 }
0x1615   :  { %v9637_v56 = vpack.c.bf16 %v13345_v54, %v13344_v58  ;;  %v9590_v59 = vpop.f32.mrb[71].mxu1 }
0x1616   :  { %v9636_v62 = vpack.c.bf16 %v9590_v59, %v9587_v48 }
0x1619   :  { %13311 = vmatmul.mubr.msk.bf16.gmra.mrb[156].mxu0 %vm1680_vm9, %v9321_v44 }
0x161a   :  { %13314 = vmatprep.mubr.msk.bf16.mxu0 %vm1680_vm9, %v9322_v1  ;;  %v13348_v49 = vpop.f32.mrb[72].mxu1 }
0x161b   :  { %v9603_v30 = vpop.f32.mrb[73].mxu1 }
0x161c   :  { %v13349_v53 = vpop.f32.mrb[74].mxu1 }
0x161d   :  { %v9639_v61 = vpack.c.bf16 %v13349_v53, %v13348_v49  ;;  %v9606_v10 = vpop.f32.mrb[75].mxu1 }
0x161e   :  { %v9638_v0 = vpack.c.bf16 %v9606_v10, %v9603_v30 }
0x1621   :  { %13315 = vmatmul.mubr.msk.bf16.gmra.mrb[160].mxu0 %vm1680_vm9, %v9323_v60 }
0x1622   :  { %13318 = vmatprep.mubr.msk.bf16.mxu0 %vm1680_vm9, %v9324_v7  ;;  %v13352_v4 = vpop.f32.mrb[76].mxu1 }
0x1623   :  { %v9619_v2 = vpop.f32.mrb[77].mxu1 }
0x1624   :  { %v13353_v11 = vpop.f32.mrb[78].mxu1 }
0x1625   :  { %v9641_v12 = vpack.c.bf16 %v13353_v11, %v13352_v4  ;;  %v9622_v17 = vpop.f32.mrb[79].mxu1 }
0x1626   :  { %v9640_v3 = vpack.c.bf16 %v9622_v17, %v9619_v2 }
0x1629   :  { %13319 = vmatmul.mubr.msk.bf16.gmra.mrb[164].mxu0 %vm1680_vm9, %v9325_v47 }
0x162a   :  { %13356 = vmatprep.mubr.msk.bf16.mxu0 %vm1680_vm9, %v9634_v50  ;;  %v13390_v6 = vpop.f32.mrb[80].mxu1 }
0x162b   :  { %v9887_v14 = vpop.f32.mrb[81].mxu1 }
0x162c   :  { %v13391_v15 = vpop.f32.mrb[82].mxu1 }
0x162d   :  { %v9951_v21 = vpack.c.bf16 %v13391_v15, %v13390_v6  ;;  %v9890_v18 = vpop.f32.mrb[83].mxu1 }
0x162e   :  { %v9950_v16 = vpack.c.bf16 %v9890_v18, %v9887_v14 }
0x1631   :  { %13357 = vmatmul.mubr.msk.bf16.vlgmr.msra.gmra.mrb[152].mxu0 %vm1680_vm9, %v9635_v45 }
0x1632   :  { %13405 = vmatpush3.bf16.msra.mxu0 %v14121_v57  ;;  %13360 = vmatprep.mubr.msk.bf16.mxu0 %vm1680_vm9, %v9636_v62  ;;  %v13394_v20 = vpop.f32.mrb[84].mxu1 }
0x1633   :  { %v9903_v22 = vpop.f32.mrb[85].mxu1  ;;  %13454 = vmatprep.subr.bf16.mxu0 %v14122_v19 }
0x1634   :  { %v13395_v27 = vpop.f32.mrb[86].mxu1 }
0x1635   :  { %v9953_v32 = vpack.c.bf16 %v13395_v27, %v13394_v20  ;;  %v9906_v25 = vpop.f32.mrb[87].mxu1 }
0x1636   :  { %v9952_v33 = vpack.c.bf16 %v9906_v25, %v9903_v22 }
0x1639   :  { %13361 = vmatmul.mubr.msk.bf16.gmra.mrb[156].mxu0 %vm1680_vm9, %v9637_v56 }
0x163a   :  { %13364 = vmatprep.mubr.msk.bf16.mxu0 %vm1680_vm9, %v9638_v0  ;;  %v13398_v13 = vpop.f32.mrb[88].mxu1 }
0x163b   :  { %v9919_v34 = vpop.f32.mrb[89].mxu1 }
0x163c   :  { %v13399_v35 = vpop.f32.mrb[90].mxu1 }
0x163d   :  { %v9955_v36 = vpack.c.bf16 %v13399_v35, %v13398_v13  ;;  %v9922_v37 = vpop.f32.mrb[91].mxu1 }
0x163e   :  { %v9954_v40 = vpack.c.bf16 %v9922_v37, %v9919_v34 }
0x1641   :  { %13365 = vmatmul.mubr.msk.bf16.gmra.mrb[160].mxu0 %vm1680_vm9, %v9639_v61 }
0x1642   :  { %13368 = vmatprep.mubr.msk.bf16.mxu0 %vm1680_vm9, %v9640_v3  ;;  %v13402_v23 = vpop.f32.mrb[92].mxu1 }
0x1643   :  { %v9935_v38 = vpop.f32.mrb[93].mxu1 }
0x1644   :  { %v13403_v41 = vpop.f32.mrb[94].mxu1 }
0x1645   :  { %v9957_v42 = vpack.c.bf16 %v13403_v41, %v13402_v23  ;;  %v9938_v43 = vpop.f32.mrb[95].mxu1 }
0x1646   :  { %v9956_v44 = vpack.c.bf16 %v9938_v43, %v9935_v38 }
0x1649   :  { %13369 = vmatmul.mubr.msk.bf16.gmra.mrb[164].mxu0 %vm1680_vm9, %v9641_v12 }
0x164a   :  { %13406 = vmatprep.mubr.msk.bf16.mxu0 %vm1680_vm9, %v9950_v16  ;;  %v13440_v24 = vpop.f32.mrb[96].mxu1 }
0x164b   :  { %v10203_v28 = vpop.f32.mrb[97].mxu1 }
0x164c   :  { %v13441_v46 = vpop.f32.mrb[98].mxu1 }
0x164d   :  { %v10267_v52 = vpack.c.bf16 %v13441_v46, %v13440_v24  ;;  %v10206_v55 = vpop.f32.mrb[99].mxu1 }
0x164e   :  { %v10266_v60 = vpack.c.bf16 %v10206_v55, %v10203_v28 }
0x1651   :  { %13407 = vmatmul.mubr.msk.bf16.vlgmr.msra.gmra.mrb[152].mxu0 %vm1680_vm9, %v9951_v21 }
0x1652   :  { %13455 = vmatpush3.bf16.msra.mxu0 %v14122_v19  ;;  %13410 = vmatprep.mubr.msk.bf16.mxu0 %vm1680_vm9, %v9952_v33  ;;  %v13444_v1 = vpop.f32.mrb[100].mxu1 }
0x1653   :  { %v10219_v5 = vpop.f32.mrb[101].mxu1  ;;  %13504 = vmatprep.subr.bf16.mxu0 %v14123_v51 }
0x1654   :  { %v13445_v63 = vpop.f32.mrb[102].mxu1 }
0x1655   :  { %v10269_v26 = vpack.c.bf16 %v13445_v63, %v13444_v1  ;;  %v10222_v47 = vpop.f32.mrb[103].mxu1 }
0x1656   :  { %v10268_v31 = vpack.c.bf16 %v10222_v47, %v10219_v5 }
0x1659   :  { %13411 = vmatmul.mubr.msk.bf16.gmra.mrb[156].mxu0 %vm1680_vm9, %v9953_v32  ;;  %v11438_v32 = vld [vmem:[#allocation27] ss:$0 sm:$0xff] }
0x165a   :  { %13414 = vmatprep.mubr.msk.bf16.mxu0 %vm1680_vm9, %v9954_v40  ;;  %v13448_v7 = vpop.f32.mrb[104].mxu1 }
0x165b   :  { %v10235_v8 = vpop.f32.mrb[105].mxu1 }
0x165c   :  { %v13449_v9 = vpop.f32.mrb[106].mxu1 }
0x165d   :  { %v10271_v39 = vpack.c.bf16 %v13449_v9, %v13448_v7  ;;  %v10238_v45 = vpop.f32.mrb[107].mxu1 }
0x165e   :  { %v10270_v29 = vpack.c.bf16 %v10238_v45, %v10235_v8 }
0x1661   :  { %13415 = vmatmul.mubr.msk.bf16.gmra.mrb[160].mxu0 %vm1680_vm9, %v9955_v36 }
0x1662   :  { %13418 = vmatprep.mubr.msk.bf16.mxu0 %vm1680_vm9, %v9956_v44  ;;  %v13452_v50 = vpop.f32.mrb[108].mxu1 }
0x1663   :  { %v10251_v57 = vpop.f32.mrb[109].mxu1 }
0x1664   :  { %v13453_v58 = vpop.f32.mrb[110].mxu1 }
0x1665   :  { %v10273_v48 = vpack.c.bf16 %v13453_v58, %v13452_v50  ;;  %v10254_v54 = vpop.f32.mrb[111].mxu1 }
0x1666   :  { %v10272_v56 = vpack.c.bf16 %v10254_v54, %v10251_v57 }
0x1669   :  { %13419 = vmatmul.mubr.msk.bf16.gmra.mrb[164].mxu0 %vm1680_vm9, %v9957_v42 }
0x166a   :  { %13456 = vmatprep.mubr.msk.bf16.mxu0 %vm1680_vm9, %v10266_v60  ;;  %v13490_v59 = vpop.f32.mrb[112].mxu1 }
0x166b   :  { %v10519_v62 = vpop.f32.mrb[113].mxu1 }
0x166c   :  { %v13491_v49 = vpop.f32.mrb[114].mxu1 }
0x166d   :  { %v10583_v30 = vpack.c.bf16 %v13491_v49, %v13490_v59  ;;  %v10522_v53 = vpop.f32.mrb[115].mxu1 }
0x166e   :  { %v10582_v61 = vpack.c.bf16 %v10522_v53, %v10519_v62 }
0x1671   :  { %13457 = vmatmul.mubr.msk.bf16.vlgmr.msra.gmra.mrb[152].mxu0 %vm1680_vm9, %v10267_v52 }
0x1672   :  { %13505 = vmatpush3.bf16.msra.mxu0 %v14123_v51  ;;  %13460 = vmatprep.mubr.msk.bf16.mxu0 %vm1680_vm9, %v10268_v31  ;;  %v13494_v10 = vpop.f32.mrb[116].mxu1 }
0x1673   :  { %v10535_v0 = vpop.f32.mrb[117].mxu1 }
0x1674   :  { %v13495_v4 = vpop.f32.mrb[118].mxu1 }
0x1675   :  { %v10585_v2 = vpack.c.bf16 %v13495_v4, %v13494_v10  ;;  %v10538_v11 = vpop.f32.mrb[119].mxu1 }
0x1676   :  { %v10584_v12 = vpack.c.bf16 %v10538_v11, %v10535_v0 }
0x1679   :  { %13461 = vmatmul.mubr.msk.bf16.gmra.mrb[156].mxu0 %vm1680_vm9, %v10269_v26 }
0x167a   :  { %13464 = vmatprep.mubr.msk.bf16.mxu0 %vm1680_vm9, %v10270_v29  ;;  %v13498_v17 = vpop.f32.mrb[120].mxu1 }
0x167b   :  { %v10551_v3 = vpop.f32.mrb[121].mxu1 }
0x167c   :  { %v13499_v6 = vpop.f32.mrb[122].mxu1 }
0x167d   :  { %v10587_v14 = vpack.c.bf16 %v13499_v6, %v13498_v17  ;;  %v10554_v15 = vpop.f32.mrb[123].mxu1 }
0x167e   :  { %v10586_v21 = vpack.c.bf16 %v10554_v15, %v10551_v3 }
0x1681   :  { %13465 = vmatmul.mubr.msk.bf16.gmra.mrb[160].mxu0 %vm1680_vm9, %v10271_v39 }
0x1682   :  { %13468 = vmatprep.mubr.msk.bf16.mxu0 %vm1680_vm9, %v10272_v56  ;;  %v13502_v18 = vpop.f32.mrb[124].mxu1 }
0x1683   :  { %v10567_v16 = vpop.f32.mrb[125].mxu1 }
0x1684   :  { %v13503_v19 = vpop.f32.mrb[126].mxu1 }
0x1685   :  { %v10589_v20 = vpack.c.bf16 %v13503_v19, %v13502_v18  ;;  %v10570_v22 = vpop.f32.mrb[127].mxu1 }
0x1686   :  { %v10588_v27 = vpack.c.bf16 %v10570_v22, %v10567_v16 }
0x1689   :  { %13469 = vmatmul.mubr.msk.bf16.gmra.mrb[164].mxu0 %vm1680_vm9, %v10273_v48 }
0x168a   :  { %13506 = vmatprep.mubr.msk.bf16.mxu0 %vm1680_vm9, %v10582_v61 }
0x1691   :  { %13507 = vmatmul.mubr.msk.bf16.vlgmr.msra.gmra.mrb[152].mxu0 %vm1680_vm9, %v10583_v30 }
0x1692   :  { %13510 = vmatprep.mubr.msk.bf16.mxu0 %vm1680_vm9, %v10584_v12 }
0x1699   :  { %13511 = vmatmul.mubr.msk.bf16.gmra.mrb[156].mxu0 %vm1680_vm9, %v10585_v2 }
0x169a   :  { %13514 = vmatprep.mubr.msk.bf16.mxu0 %vm1680_vm9, %v10586_v21 }
0x16a1   :  { %13515 = vmatmul.mubr.msk.bf16.gmra.mrb[160].mxu0 %vm1680_vm9, %v10587_v14 }
0x16a2   :  { %13518 = vmatprep.mubr.msk.bf16.mxu0 %vm1680_vm9, %v10588_v27 }
0x16a9   :  { %13519 = vmatmul.mubr.msk.bf16.gmra.mrb[164].mxu0 %vm1680_vm9, %v10589_v20 }
0x1764   :  { %v13508_v25 = vpop.f32.mrb[152].mxu0 }
0x1765   :  { %v10744_v33 = vadd.f32 %v13508_v25, %v11438_v32  ;;  %v10657_v13 = vpop.f32.mrb[153].mxu0 }
0x1766   :  { %v10742_v34 = vadd.f32 %v11438_v32, %v10657_v13  ;;  %v13509_v35 = vpop.f32.mrb[154].mxu0 }
0x1767   :  { %14126 = vtanh.f32 %v10744_v33  ;;  %v10745_v36 = vadd.f32 %v13509_v35, %v11438_v32  ;;  %v10660_v37 = vpop.f32.mrb[155].mxu0 }
0x1768   :  { %14128 = vtanh.f32 %v10742_v34  ;;  %v10743_v40 = vadd.f32 %v11438_v32, %v10660_v37 }
0x1769   :  { %14130 = vtanh.f32 %v10745_v36 }
0x176a   :  { %14132 = vtanh.f32 %v10743_v40 }
0x176c   :  { %v13512_v23 = vpop.f32.mrb[156].mxu0 }
0x176d   :  { %v10748_v38 = vadd.f32 %v13512_v23, %v11438_v32  ;;  %v10673_v41 = vpop.f32.mrb[157].mxu0 }
0x176e   :  { %v10746_v42 = vadd.f32 %v11438_v32, %v10673_v41  ;;  %v13513_v43 = vpop.f32.mrb[158].mxu0 }
0x176f   :  { %14134 = vtanh.f32 %v10748_v38  ;;  %v10749_v44 = vadd.f32 %v13513_v43, %v11438_v32  ;;  %v10676_v24 = vpop.f32.mrb[159].mxu0 }
0x1770   :  { %14136 = vtanh.f32 %v10746_v42  ;;  %v10747_v28 = vadd.f32 %v11438_v32, %v10676_v24 }
0x1771   :  { %v14127_v46 = vpop.eup %14126  ;;  %14138 = vtanh.f32 %v10749_v44 }
0x1772   :  { %v14129_v52 = vpop.eup %14128  ;;  %10776 = vst [vmem:[%s16252_s1 + $0x10] sm:$0xff] %v14127_v46  ;;  %14140 = vtanh.f32 %v10747_v28 }
0x1773   :  { %v14131_v55 = vpop.eup %14130  ;;  %10774 = vst [vmem:[%s16252_s1] sm:$0xff] %v14129_v52 }
0x1774   :  { %v14133_v60 = vpop.eup %14132  ;;  %10777 = vst [vmem:[%s16252_s1 + $0x18] sm:$0xff] %v14131_v55  ;;  %v13516_v51 = vpop.f32.mrb[160].mxu0 }
0x1775   :  { %10775 = vst [vmem:[%s16252_s1 + $0x8] sm:$0xff] %v14133_v60  ;;  %v10752_v1 = vadd.f32 %v13516_v51, %v11438_v32  ;;  %v10689_v5 = vpop.f32.mrb[161].mxu0 }
0x1776   :  { %v10750_v63 = vadd.f32 %v11438_v32, %v10689_v5  ;;  %v13517_v26 = vpop.f32.mrb[162].mxu0 }
0x1777   :  { %14142 = vtanh.f32 %v10752_v1  ;;  %v10753_v47 = vadd.f32 %v13517_v26, %v11438_v32  ;;  %v10692_v31 = vpop.f32.mrb[163].mxu0 }
0x1778   :  { %14144 = vtanh.f32 %v10750_v63  ;;  %v10751_v7 = vadd.f32 %v11438_v32, %v10692_v31 }
0x1779   :  { %v14135_v8 = vpop.eup %14134  ;;  %14146 = vtanh.f32 %v10753_v47 }
0x177a   :  { %v14137_v9 = vpop.eup %14136  ;;  %10780 = vst [vmem:[%s16252_s1 + $0x30] sm:$0xff] %v14135_v8  ;;  %14148 = vtanh.f32 %v10751_v7 }
0x177b   :  { %v14139_v39 = vpop.eup %14138  ;;  %10778 = vst [vmem:[%s16252_s1 + $0x20] sm:$0xff] %v14137_v9 }
0x177c   :  { %v14141_v45 = vpop.eup %14140  ;;  %10781 = vst [vmem:[%s16252_s1 + $0x38] sm:$0xff] %v14139_v39  ;;  %v13520_v29 = vpop.f32.mrb[164].mxu0 }
0x177d   :  { %10779 = vst [vmem:[%s16252_s1 + $0x28] sm:$0xff] %v14141_v45  ;;  %v10756_v50 = vadd.f32 %v13520_v29, %v11438_v32  ;;  %v10705_v57 = vpop.f32.mrb[165].mxu0 }
0x177e   :  { %v10754_v58 = vadd.f32 %v11438_v32, %v10705_v57  ;;  %v13521_v48 = vpop.f32.mrb[166].mxu0 }
0x177f   :  { %14150 = vtanh.f32 %v10756_v50  ;;  %v10757_v54 = vadd.f32 %v13521_v48, %v11438_v32  ;;  %v10708_v56 = vpop.f32.mrb[167].mxu0 }
0x1780   :  { %14152 = vtanh.f32 %v10754_v58  ;;  %v10755_v59 = vadd.f32 %v11438_v32, %v10708_v56 }
0x1781   :  { %v14143_v62 = vpop.eup %14142  ;;  %14154 = vtanh.f32 %v10757_v54 }
0x1782   :  { %v14145_v49 = vpop.eup %14144  ;;  %10784 = vst [vmem:[%s16252_s1 + $0x50] sm:$0xff] %v14143_v62  ;;  %14156 = vtanh.f32 %v10755_v59 }
0x1783   :  { %v14147_v30 = vpop.eup %14146  ;;  %10782 = vst [vmem:[%s16252_s1 + $0x40] sm:$0xff] %v14145_v49 }
0x1784   :  { %v14149_v53 = vpop.eup %14148  ;;  %10785 = vst [vmem:[%s16252_s1 + $0x58] sm:$0xff] %v14147_v30 }
0x1785   :  { %10783 = vst [vmem:[%s16252_s1 + $0x48] sm:$0xff] %v14149_v53 }
0x1789   :  { %v14151_v61 = vpop.eup %14150 }
0x178a   :  { %v14153_v10 = vpop.eup %14152  ;;  %10788 = vst [vmem:[%s16252_s1 + $0x70] sm:$0xff] %v14151_v61 }
0x178b   :  { %v14155_v0 = vpop.eup %14154  ;;  %10786 = vst [vmem:[%s16252_s1 + $0x60] sm:$0xff] %v14153_v10 }
0x178c   :  { %v14157_v4 = vpop.eup %14156  ;;  %10789 = vst [vmem:[%s16252_s1 + $0x78] sm:$0xff] %v14155_v0 }
0x178d   :  { %10787 = vst [vmem:[%s16252_s1 + $0x68] sm:$0xff] %v14157_v4 }
0x178e   :  { %10802 = vsyncpa [#allocation3], 1 }
0x178f   :  { %10803 = vsyncpa [#allocation5], 1 }
0x1790   :  { %10804 = vsyncpa [#allocation8], 1 }
0x1791   :  { %10805 = vsyncpa [#allocation11], 1 }
0x1792   :  { %10806 = vsyncpa [#allocation14], 1 }
0x1793   :  { %10807 = vsyncpa [#allocation17], 1 }
0x1794   :  { %10808 = vsyncpa [#allocation20], 1 }
0x1795   :  { %10809 = vsyncpa [#allocation23], 1 }
0x1796   :  { %10810 = vsyncpa [#allocation26], 1 }

</bundles_post_ra>
